<compile_context>
chip_gen: v6e
topology: v6e:2x2x1
jax: 0.10.0
libtpu: 0.0.40
codegen_flags: <defaults>
</compile_context>

<pallas_src>
import jax
import jax.numpy as jnp
from jax.experimental import pallas as pl
from jax.experimental.pallas import tpu as pltpu

# Model hyper-parameters (consistent with the PyTorch module).
K = 32            # embedding dim (== per-head dim in this module)
NUM_HEADS = 8
DEPTH = 6
NUM_CLASSES = 6
NUM_TOKENS = 50
T = 8             # sequence length
B = 2             # batch
HK = K * NUM_HEADS
EPS = 1e-5        # nn.LayerNorm default

# Packed small-parameter row layout: [bu, ln1_g, ln1_b, bm1(4K), bm2, ln2_g, ln2_b, pad]
_N_SMALL_ROWS = 8


# ---------------------------------------------------------------------------
# Fused kernel: one grid step == one transformer block (plus embed/head phases).
# ---------------------------------------------------------------------------
def fused_transformer_kernel(ids_ref, embed_ref, wq_ref, wk_ref, wv_ref, wu_ref,
                             w1_ref, w2_ref, small_ref, wout_ref, bout_ref,
                             out_ref, x_scr):
    d = pl.program_id(0)

    # ---- token embedding via one-hot matmul (first grid step only) ----
    @pl.when(d == 0)
    def _():
        ids = ids_ref[...]                                              # (B*T, 1) int32
        iota = jax.lax.broadcasted_iota(jnp.int32, (B * T, NUM_TOKENS), 1)
        onehot = (iota == ids).astype(jnp.float32)                      # (B*T, NUM_TOKENS)
        x_scr[...] = jnp.dot(onehot, embed_ref[...],
                             preferred_element_type=jnp.float32)        # (B*T, K)

    x = x_scr[...]                                                      # (B*T, K)

    wq = wq_ref[...]                                                    # (H, K, K) (scale folded in)
    wk = wk_ref[...]                                                    # (H, K, K) (scale folded in)
    wv = wv_ref[...]                                                    # (H, K, K)
    wu = wu_ref[...]                                                    # (H, K, K)

    bu  = small_ref[0:1, 0:K]                                           # (1, K)
    g1  = small_ref[1:2, 0:K]
    be1 = small_ref[2:3, 0:K]
    bm1 = small_ref[3:4, :]                                             # (1, 4K)
    bm2 = small_ref[4:5, 0:K]
    g2  = small_ref[5:6, 0:K]
    be2 = small_ref[6:7, 0:K]

    # ---- multi-head self-attention, heads batched in one contraction each ----
    att_rows = []
    for b in range(B):                                                  # B=2, unrolled
        xb = x[b * T:(b + 1) * T, :]                                    # (T, K)
        xh = jnp.broadcast_to(xb[None, :, :], (NUM_HEADS, T, K))        # (H, T, K)
        q = jnp.einsum('htk,hkd->htd', xh, wq, preferred_element_type=jnp.float32)
        k = jnp.einsum('htk,hkd->htd', xh, wk, preferred_element_type=jnp.float32)
        v = jnp.einsum('htk,hkd->htd', xh, wv, preferred_element_type=jnp.float32)
        s = jnp.einsum('htd,hsd->hts', q, k, preferred_element_type=jnp.float32)
        s = s - jnp.max(s, axis=-1, keepdims=True)
        e = jnp.exp(s)
        w = e * pl.reciprocal(jnp.sum(e, axis=-1, keepdims=True), approx=True)
        o = jnp.einsum('hts,hsd->htd', w, v, preferred_element_type=jnp.float32)
        u = jnp.einsum('htd,hdk->htk', o, wu, preferred_element_type=jnp.float32)
        att_rows.append(jnp.sum(u, axis=0))                             # (T, K)
    att = jnp.concatenate(att_rows, axis=0) + bu                        # (B*T, K)

    def layernorm(y, g, be):
        mu = jnp.mean(y, axis=-1, keepdims=True)
        var = jnp.mean((y - mu) ** 2, axis=-1, keepdims=True)
        return (y - mu) * jax.lax.rsqrt(var + EPS) * g + be

    x1 = layernorm(x + att, g1, be1)                                    # (B*T, K)

    h = jnp.dot(x1, w1_ref[...], preferred_element_type=jnp.float32) + bm1
    h = jnp.maximum(h, 0.0)                                             # ReLU, (B*T, 4K)
    mlp = jnp.dot(h, w2_ref[...], preferred_element_type=jnp.float32) + bm2

    x2 = layernorm(x1 + mlp, g2, be2)                                   # (B*T, K)
    x_scr[...] = x2

    # ---- classification head (last grid step only) ----
    @pl.when(d == DEPTH - 1)
    def _():
        pooled = jnp.concatenate(
            [jnp.mean(x2[b * T:(b + 1) * T, :], axis=0, keepdims=True)
             for b in range(B)], axis=0)                                # (B, K)
        logits = jnp.dot(pooled, wout_ref[...],
                         preferred_element_type=jnp.float32) + bout_ref[...]
        m = jnp.max(logits, axis=-1, keepdims=True)
        sh = logits - m
        lse = jnp.log(jnp.sum(jnp.exp(sh), axis=-1, keepdims=True))
        out_ref[...] = sh - lse                                         # (B, NUM_CLASSES)


def make_fused_call():
    in_specs = [
        pl.BlockSpec((B * T, 1), lambda d: (0, 0)),                       # token ids
        pl.BlockSpec((NUM_TOKENS, K), lambda d: (0, 0)),                  # embedding table
        pl.BlockSpec((None, NUM_HEADS, K, K), lambda d: (d, 0, 0, 0)),    # Wq (head-stacked, scaled)
        pl.BlockSpec((None, NUM_HEADS, K, K), lambda d: (d, 0, 0, 0)),    # Wk (head-stacked, scaled)
        pl.BlockSpec((None, NUM_HEADS, K, K), lambda d: (d, 0, 0, 0)),    # Wv (head-stacked)
        pl.BlockSpec((None, NUM_HEADS, K, K), lambda d: (d, 0, 0, 0)),    # Wu (head-stacked)
        pl.BlockSpec((None, K, 4 * K), lambda d: (d, 0, 0)),              # W1^T
        pl.BlockSpec((None, 4 * K, K), lambda d: (d, 0, 0)),              # W2^T
        pl.BlockSpec((None, _N_SMALL_ROWS, 4 * K), lambda d: (d, 0, 0)),  # packed small params
        pl.BlockSpec((K, NUM_CLASSES), lambda d: (0, 0)),                 # Wout^T
        pl.BlockSpec((1, NUM_CLASSES), lambda d: (0, 0)),                 # bout
    ]
    return pl.pallas_call(
        fused_transformer_kernel,
        out_shape=jax.ShapeDtypeStruct((B, NUM_CLASSES), jnp.float32),
        grid=(DEPTH,),
        in_specs=in_specs,
        out_specs=pl.BlockSpec((B, NUM_CLASSES), lambda d: (0, 0)),
        scratch_shapes=[pltpu.VMEM((B * T, K), jnp.float32)],             # resident activation
        compiler_params=pltpu.CompilerParams(dimension_semantics=("arbitrary",)),
    )


# ---------------------------------------------------------------------------
# Parameter init (deterministic, PyTorch-like distributions), stacked per layer.
# ---------------------------------------------------------------------------
def _uniform(key, shape, fan_in):
    bound = 1.0 / (fan_in ** 0.5)
    return jax.random.uniform(key, shape, jnp.float32, -bound, bound)


def _head_stack(w_t):
    # (K, H*K) transposed weight -> (H, K, K) so head h is a leading-dim slice.
    return jnp.transpose(w_t.reshape(K, NUM_HEADS, K), (1, 0, 2))


def init_params(key):
    keys = jax.random.split(key, 2 + DEPTH)
    embed = jax.random.normal(keys[0], (NUM_TOKENS, K), jnp.float32)
    ko1, ko2 = jax.random.split(keys[1])
    wout = _uniform(ko1, (K, NUM_CLASSES), K)          # stored (in, out)
    bout = _uniform(ko2, (1, NUM_CLASSES), K)

    scale = float(K) ** (-0.25)                        # folded into Wq and Wk (exact: no q/k bias)
    wq_l, wk_l, wv_l, wu_l, w1_l, w2_l, small_l = [], [], [], [], [], [], []
    for d in range(DEPTH):
        bk = jax.random.split(keys[2 + d], 10)
        wq_l.append(_head_stack(_uniform(bk[0], (K, HK), K)) * scale)
        wk_l.append(_head_stack(_uniform(bk[1], (K, HK), K)) * scale)
        wv_l.append(_head_stack(_uniform(bk[2], (K, HK), K)))
        wu_l.append(_uniform(bk[3], (HK, K), HK).reshape(NUM_HEADS, K, K))
        w1_l.append(_uniform(bk[5], (K, 4 * K), K))
        w2_l.append(_uniform(bk[7], (4 * K, K), 4 * K))

        bu = _uniform(bk[4], (K,), HK)
        bm1 = _uniform(bk[6], (4 * K,), K)
        bm2 = _uniform(bk[8], (K,), 4 * K)
        small = jnp.zeros((_N_SMALL_ROWS, 4 * K), jnp.float32)
        small = small.at[0, :K].set(bu)                              # unify bias
        small = small.at[1, :K].set(jnp.ones((K,), jnp.float32))     # ln1 gamma
        # row 2: ln1 beta (zeros)
        small = small.at[3, :].set(bm1)                              # mlp bias 1
        small = small.at[4, :K].set(bm2)                             # mlp bias 2
        small = small.at[5, :K].set(jnp.ones((K,), jnp.float32))     # ln2 gamma
        # row 6: ln2 beta (zeros)
        small_l.append(small)

    return {
        "embed": embed,
        "wq": jnp.stack(wq_l), "wk": jnp.stack(wk_l), "wv": jnp.stack(wv_l),
        "wu": jnp.stack(wu_l), "w1": jnp.stack(w1_l), "w2": jnp.stack(w2_l),
        "small": jnp.stack(small_l),
        "wout": wout, "bout": bout,
    }


@jax.jit
def transformer_forward(token_ids, params):
    ids = token_ids.reshape(B * T, 1).astype(jnp.int32)
    return make_fused_call()(
        ids, params["embed"],
        params["wq"], params["wk"], params["wv"], params["wu"],
        params["w1"], params["w2"], params["small"],
        params["wout"], params["bout"])


if __name__ == "__main__":
    key = jax.random.PRNGKey(0)
    pkey, dkey = jax.random.split(key)
    params = init_params(pkey)
    token_ids = jax.random.randint(dkey, (B, T), 0, NUM_TOKENS, dtype=jnp.int32)

    out = transformer_forward(token_ids, params)
    out = jax.block_until_ready(out)

    assert out.shape == (B, NUM_CLASSES)
    # log_softmax rows should exponentiate-sum to ~1
    assert bool(jnp.all(jnp.abs(jnp.sum(jnp.exp(out), axis=1) - 1.0) < 1e-4))
    print("KERNEL_OK")
</pallas_src>

<mosaic_0001>
module attributes {stable_mosaic.version = 11 : i64} {
  func.func @fused_transformer_kernel(%arg0: i32, %arg1: memref<16x1xi32, #tpu.memory_space<vmem>>, %arg2: memref<50x32xf32, #tpu.memory_space<vmem>>, %arg3: memref<1x8x32x32xf32, #tpu.memory_space<vmem>>, %arg4: memref<1x8x32x32xf32, #tpu.memory_space<vmem>>, %arg5: memref<1x8x32x32xf32, #tpu.memory_space<vmem>>, %arg6: memref<1x8x32x32xf32, #tpu.memory_space<vmem>>, %arg7: memref<1x32x128xf32, #tpu.memory_space<vmem>>, %arg8: memref<1x128x32xf32, #tpu.memory_space<vmem>>, %arg9: memref<1x8x128xf32, #tpu.memory_space<vmem>>, %arg10: memref<32x6xf32, #tpu.memory_space<vmem>>, %arg11: memref<1x6xf32, #tpu.memory_space<vmem>>, %arg12: memref<2x6xf32, #tpu.memory_space<vmem>>, %arg13: memref<16x32xf32, #tpu.memory_space<vmem>>) attributes {dimension_semantics = [#tpu.dimension_semantics<arbitrary>], iteration_bounds = array<i64: 6>, scalar_prefetch = 0 : i64, scratch_operands = 1 : i64, tpu.core_type = #tpu.core_type<tc>, window_params = [{pipeline_mode = #tpu.pipeline_mode<synchronous>, transform_indices = @transform_0, window_bounds = array<i64: 16, 1>}, {pipeline_mode = #tpu.pipeline_mode<synchronous>, transform_indices = @transform_1, window_bounds = array<i64: 50, 32>}, {transform_indices = @transform_2, window_bounds = array<i64: 1, 8, 32, 32>}, {transform_indices = @transform_3, window_bounds = array<i64: 1, 8, 32, 32>}, {transform_indices = @transform_4, window_bounds = array<i64: 1, 8, 32, 32>}, {transform_indices = @transform_5, window_bounds = array<i64: 1, 8, 32, 32>}, {transform_indices = @transform_6, window_bounds = array<i64: 1, 32, 128>}, {transform_indices = @transform_7, window_bounds = array<i64: 1, 128, 32>}, {transform_indices = @transform_8, window_bounds = array<i64: 1, 8, 128>}, {pipeline_mode = #tpu.pipeline_mode<synchronous>, transform_indices = @transform_9, window_bounds = array<i64: 32, 6>}, {pipeline_mode = #tpu.pipeline_mode<synchronous>, transform_indices = @transform_10, window_bounds = array<i64: 1, 6>}, {pipeline_mode = #tpu.pipeline_mode<synchronous>, transform_indices = @transform_11, window_bounds = array<i64: 2, 6>}]} {
    %c0_i32 = arith.constant 0 : i32
    %0 = arith.cmpi eq, %arg0, %c0_i32 : i32
    %1 = arith.extui %0 : i1 to i32
    %c0_i32_0 = arith.constant 0 : i32
    %2 = arith.cmpi ne, %1, %c0_i32_0 : i32
    scf.if %2 {
      %c0_72 = arith.constant 0 : index
      %c0_73 = arith.constant 0 : index
      %133 = vector.load %arg1[%c0_72, %c0_73] : memref<16x1xi32, #tpu.memory_space<vmem>>, vector<16x1xi32>
      %134 = tpu.iota {dimensions = array<i32: 1>} : vector<16x50xi32>
      %135 = vector.broadcast %133 : vector<16x1xi32> to vector<16x50xi32>
      %136 = arith.cmpi eq, %134, %135 : vector<16x50xi32>
      %137 = arith.extui %136 : vector<16x50xi1> to vector<16x50xi32>
      %138 = arith.sitofp %137 : vector<16x50xi32> to vector<16x50xf32>
      %c0_74 = arith.constant 0 : index
      %c0_75 = arith.constant 0 : index
      %139 = vector.load %arg2[%c0_74, %c0_75] : memref<50x32xf32, #tpu.memory_space<vmem>>, vector<50x32xf32>
      %cst_76 = arith.constant dense<0.000000e+00> : vector<16x32xf32>
      %140 = tpu.matmul %138, %139, %cst_76 {dimension_numbers = #tpu.dot_dimension_numbers<[1], [0], [0], [1], [0, 0, 1, 1], [], []>} : vector<16x50xf32>, vector<50x32xf32>, vector<16x32xf32> -> vector<16x32xf32>
      %c0_77 = arith.constant 0 : index
      %c0_78 = arith.constant 0 : index
      %141 = vector.load %arg13[%c0_77, %c0_78] : memref<16x32xf32, #tpu.memory_space<vmem>>, vector<16x32xf32>
      tpu.vector_store %arg13[%c0_77, %c0_78], %140 {strides = array<i32>} : memref<16x32xf32, #tpu.memory_space<vmem>>, vector<16x32xf32>,
    } else {
    }
    %c0 = arith.constant 0 : index
    %c0_1 = arith.constant 0 : index
    %3 = vector.load %arg13[%c0, %c0_1] : memref<16x32xf32, #tpu.memory_space<vmem>>, vector<16x32xf32>
    %c0_2 = arith.constant 0 : index
    %c0_3 = arith.constant 0 : index
    %c0_4 = arith.constant 0 : index
    %c0_5 = arith.constant 0 : index
    %4 = vector.load %arg3[%c0_2, %c0_3, %c0_4, %c0_5] : memref<1x8x32x32xf32, #tpu.memory_space<vmem>>, vector<1x8x32x32xf32>
    %5 = vector.shape_cast %4 : vector<1x8x32x32xf32> to vector<8x32x32xf32>
    %c0_6 = arith.constant 0 : index
    %c0_7 = arith.constant 0 : index
    %c0_8 = arith.constant 0 : index
    %c0_9 = arith.constant 0 : index
    %6 = vector.load %arg4[%c0_6, %c0_7, %c0_8, %c0_9] : memref<1x8x32x32xf32, #tpu.memory_space<vmem>>, vector<1x8x32x32xf32>
    %7 = vector.shape_cast %6 : vector<1x8x32x32xf32> to vector<8x32x32xf32>
    %c0_10 = arith.constant 0 : index
    %c0_11 = arith.constant 0 : index
    %c0_12 = arith.constant 0 : index
    %c0_13 = arith.constant 0 : index
    %8 = vector.load %arg5[%c0_10, %c0_11, %c0_12, %c0_13] : memref<1x8x32x32xf32, #tpu.memory_space<vmem>>, vector<1x8x32x32xf32>
    %9 = vector.shape_cast %8 : vector<1x8x32x32xf32> to vector<8x32x32xf32>
    %c0_14 = arith.constant 0 : index
    %c0_15 = arith.constant 0 : index
    %c0_16 = arith.constant 0 : index
    %c0_17 = arith.constant 0 : index
    %10 = vector.load %arg6[%c0_14, %c0_15, %c0_16, %c0_17] : memref<1x8x32x32xf32, #tpu.memory_space<vmem>>, vector<1x8x32x32xf32>
    %11 = vector.shape_cast %10 : vector<1x8x32x32xf32> to vector<8x32x32xf32>
    %c0_18 = arith.constant 0 : index
    %c0_19 = arith.constant 0 : index
    %c0_20 = arith.constant 0 : index
    %12 = vector.load %arg9[%c0_18, %c0_19, %c0_20] : memref<1x8x128xf32, #tpu.memory_space<vmem>>, vector<1x1x32xf32>
    %13 = vector.shape_cast %12 : vector<1x1x32xf32> to vector<1x32xf32>
    %c0_21 = arith.constant 0 : index
    %c1 = arith.constant 1 : index
    %c0_22 = arith.constant 0 : index
    %14 = vector.load %arg9[%c0_21, %c1, %c0_22] : memref<1x8x128xf32, #tpu.memory_space<vmem>>, vector<1x1x32xf32>
    %15 = vector.shape_cast %14 : vector<1x1x32xf32> to vector<1x32xf32>
    %c0_23 = arith.constant 0 : index
    %c2 = arith.constant 2 : index
    %c0_24 = arith.constant 0 : index
    %16 = vector.load %arg9[%c0_23, %c2, %c0_24] : memref<1x8x128xf32, #tpu.memory_space<vmem>>, vector<1x1x32xf32>
    %17 = vector.shape_cast %16 : vector<1x1x32xf32> to vector<1x32xf32>
    %c0_25 = arith.constant 0 : index
    %c3 = arith.constant 3 : index
    %c0_26 = arith.constant 0 : index
    %18 = vector.load %arg9[%c0_25, %c3, %c0_26] : memref<1x8x128xf32, #tpu.memory_space<vmem>>, vector<1x1x128xf32>
    %19 = vector.shape_cast %18 : vector<1x1x128xf32> to vector<1x128xf32>
    %c0_27 = arith.constant 0 : index
    %c4 = arith.constant 4 : index
    %c0_28 = arith.constant 0 : index
    %20 = vector.load %arg9[%c0_27, %c4, %c0_28] : memref<1x8x128xf32, #tpu.memory_space<vmem>>, vector<1x1x32xf32>
    %21 = vector.shape_cast %20 : vector<1x1x32xf32> to vector<1x32xf32>
    %c0_29 = arith.constant 0 : index
    %c5 = arith.constant 5 : index
    %c0_30 = arith.constant 0 : index
    %22 = vector.load %arg9[%c0_29, %c5, %c0_30] : memref<1x8x128xf32, #tpu.memory_space<vmem>>, vector<1x1x32xf32>
    %23 = vector.shape_cast %22 : vector<1x1x32xf32> to vector<1x32xf32>
    %c0_31 = arith.constant 0 : index
    %c6 = arith.constant 6 : index
    %c0_32 = arith.constant 0 : index
    %24 = vector.load %arg9[%c0_31, %c6, %c0_32] : memref<1x8x128xf32, #tpu.memory_space<vmem>>, vector<1x1x32xf32>
    %25 = vector.shape_cast %24 : vector<1x1x32xf32> to vector<1x32xf32>
    %26 = vector.extract_strided_slice %3 {offsets = [0, 0], sizes = [8, 32], strides = [1, 1]} : vector<16x32xf32> to vector<8x32xf32>
    %27 = vector.shape_cast %26 : vector<8x32xf32> to vector<1x8x32xf32>
    %28 = vector.shape_cast %27 : vector<1x8x32xf32> to vector<1x8x32xf32>
    %29 = vector.broadcast %28 : vector<1x8x32xf32> to vector<8x8x32xf32>
    "tpu.trace_start"() <{level = 10 : i32, message = "htk,hkd->htd"}> : () -> ()
    %cst = arith.constant dense<0.000000e+00> : vector<8x8x32xf32>
    %30 = tpu.matmul %29, %5, %cst {dimension_numbers = #tpu.dot_dimension_numbers<[2], [1], [1], [2], [0, 0, 0, 1, 1, 2], [0], [0]>} : vector<8x8x32xf32>, vector<8x32x32xf32>, vector<8x8x32xf32> -> vector<8x8x32xf32>
    %cst_33 = arith.constant dense<0.000000e+00> : vector<8x8x32xf32>
    %31 = tpu.matmul %29, %7, %cst_33 {dimension_numbers = #tpu.dot_dimension_numbers<[2], [1], [1], [2], [0, 0, 0, 1, 1, 2], [0], [0]>} : vector<8x8x32xf32>, vector<8x32x32xf32>, vector<8x8x32xf32> -> vector<8x8x32xf32>
    %cst_34 = arith.constant dense<0.000000e+00> : vector<8x8x32xf32>
    %32 = tpu.matmul %29, %9, %cst_34 {dimension_numbers = #tpu.dot_dimension_numbers<[2], [1], [1], [2], [0, 0, 0, 1, 1, 2], [0], [0]>} : vector<8x8x32xf32>, vector<8x32x32xf32>, vector<8x8x32xf32> -> vector<8x8x32xf32>
    "tpu.trace_stop"() : () -> ()
    "tpu.trace_start"() <{level = 10 : i32, message = "htd,hsd->hts"}> : () -> ()
    %cst_35 = arith.constant dense<0.000000e+00> : vector<8x8x8xf32>
    %33 = tpu.matmul %30, %31, %cst_35 {dimension_numbers = #tpu.dot_dimension_numbers<[2], [2], [1], [1], [0, 0, 0, 1, 1, 1], [0], [0]>} : vector<8x8x32xf32>, vector<8x8x32xf32>, vector<8x8x8xf32> -> vector<8x8x8xf32>
    "tpu.trace_stop"() : () -> ()
    %cst_36 = arith.constant dense<0xFF800000> : vector<8x8xf32>
    %34 = vector.multi_reduction <maximumf>, %33, %cst_36 [2] : vector<8x8x8xf32> to vector<8x8xf32>
    %35 = vector.shape_cast %34 : vector<8x8xf32> to vector<8x8x1xf32>
    %36 = vector.broadcast %35 : vector<8x8x1xf32> to vector<8x8x8xf32>
    %37 = arith.subf %33, %36 : vector<8x8x8xf32>
    %38 = math.exp %37 : vector<8x8x8xf32>
    %cst_37 = arith.constant dense<0.000000e+00> : vector<8x8xf32>
    %39 = vector.multi_reduction <add>, %38, %cst_37 [2] : vector<8x8x8xf32> to vector<8x8xf32>
    %40 = vector.shape_cast %39 : vector<8x8xf32> to vector<8x8x1xf32>
    %41 = tpu.reciprocal %40 {approx = true} : vector<8x8x1xf32> -> vector<8x8x1xf32>
    %42 = vector.broadcast %41 : vector<8x8x1xf32> to vector<8x8x8xf32>
    %43 = arith.mulf %38, %42 : vector<8x8x8xf32>
    "tpu.trace_start"() <{level = 10 : i32, message = "hts,hsd->htd"}> : () -> ()
    %cst_38 = arith.constant dense<0.000000e+00> : vector<8x8x32xf32>
    %44 = tpu.matmul %43, %32, %cst_38 {dimension_numbers = #tpu.dot_dimension_numbers<[2], [1], [1], [2], [0, 0, 0, 1, 1, 2], [0], [0]>} : vector<8x8x8xf32>, vector<8x8x32xf32>, vector<8x8x32xf32> -> vector<8x8x32xf32>
    "tpu.trace_stop"() : () -> ()
    "tpu.trace_start"() <{level = 10 : i32, message = "htd,hdk->htk"}> : () -> ()
    %cst_39 = arith.constant dense<0.000000e+00> : vector<8x8x32xf32>
    %45 = tpu.matmul %44, %11, %cst_39 {dimension_numbers = #tpu.dot_dimension_numbers<[2], [1], [1], [2], [0, 0, 0, 1, 1, 2], [0], [0]>} : vector<8x8x32xf32>, vector<8x32x32xf32>, vector<8x8x32xf32> -> vector<8x8x32xf32>
    "tpu.trace_stop"() : () -> ()
    %cst_40 = arith.constant dense<0.000000e+00> : vector<8x32xf32>
    %46 = vector.multi_reduction <add>, %45, %cst_40 [0] : vector<8x8x32xf32> to vector<8x32xf32>
    %47 = vector.extract_strided_slice %3 {offsets = [8, 0], sizes = [8, 32], strides = [1, 1]} : vector<16x32xf32> to vector<8x32xf32>
    %48 = vector.shape_cast %47 : vector<8x32xf32> to vector<1x8x32xf32>
    %49 = vector.shape_cast %48 : vector<1x8x32xf32> to vector<1x8x32xf32>
    %50 = vector.broadcast %49 : vector<1x8x32xf32> to vector<8x8x32xf32>
    "tpu.trace_start"() <{level = 10 : i32, message = "htk,hkd->htd"}> : () -> ()
    %cst_41 = arith.constant dense<0.000000e+00> : vector<8x8x32xf32>
    %51 = tpu.matmul %50, %5, %cst_41 {dimension_numbers = #tpu.dot_dimension_numbers<[2], [1], [1], [2], [0, 0, 0, 1, 1, 2], [0], [0]>} : vector<8x8x32xf32>, vector<8x32x32xf32>, vector<8x8x32xf32> -> vector<8x8x32xf32>
    %cst_42 = arith.constant dense<0.000000e+00> : vector<8x8x32xf32>
    %52 = tpu.matmul %50, %7, %cst_42 {dimension_numbers = #tpu.dot_dimension_numbers<[2], [1], [1], [2], [0, 0, 0, 1, 1, 2], [0], [0]>} : vector<8x8x32xf32>, vector<8x32x32xf32>, vector<8x8x32xf32> -> vector<8x8x32xf32>
    %cst_43 = arith.constant dense<0.000000e+00> : vector<8x8x32xf32>
    %53 = tpu.matmul %50, %9, %cst_43 {dimension_numbers = #tpu.dot_dimension_numbers<[2], [1], [1], [2], [0, 0, 0, 1, 1, 2], [0], [0]>} : vector<8x8x32xf32>, vector<8x32x32xf32>, vector<8x8x32xf32> -> vector<8x8x32xf32>
    "tpu.trace_stop"() : () -> ()
    "tpu.trace_start"() <{level = 10 : i32, message = "htd,hsd->hts"}> : () -> ()
    %cst_44 = arith.constant dense<0.000000e+00> : vector<8x8x8xf32>
    %54 = tpu.matmul %51, %52, %cst_44 {dimension_numbers = #tpu.dot_dimension_numbers<[2], [2], [1], [1], [0, 0, 0, 1, 1, 1], [0], [0]>} : vector<8x8x32xf32>, vector<8x8x32xf32>, vector<8x8x8xf32> -> vector<8x8x8xf32>
    "tpu.trace_stop"() : () -> ()
    %cst_45 = arith.constant dense<0xFF800000> : vector<8x8xf32>
    %55 = vector.multi_reduction <maximumf>, %54, %cst_45 [2] : vector<8x8x8xf32> to vector<8x8xf32>
    %56 = vector.shape_cast %55 : vector<8x8xf32> to vector<8x8x1xf32>
    %57 = vector.broadcast %56 : vector<8x8x1xf32> to vector<8x8x8xf32>
    %58 = arith.subf %54, %57 : vector<8x8x8xf32>
    %59 = math.exp %58 : vector<8x8x8xf32>
    %cst_46 = arith.constant dense<0.000000e+00> : vector<8x8xf32>
    %60 = vector.multi_reduction <add>, %59, %cst_46 [2] : vector<8x8x8xf32> to vector<8x8xf32>
    %61 = vector.shape_cast %60 : vector<8x8xf32> to vector<8x8x1xf32>
    %62 = tpu.reciprocal %61 {approx = true} : vector<8x8x1xf32> -> vector<8x8x1xf32>
    %63 = vector.broadcast %62 : vector<8x8x1xf32> to vector<8x8x8xf32>
    %64 = arith.mulf %59, %63 : vector<8x8x8xf32>
    "tpu.trace_start"() <{level = 10 : i32, message = "hts,hsd->htd"}> : () -> ()
    %cst_47 = arith.constant dense<0.000000e+00> : vector<8x8x32xf32>
    %65 = tpu.matmul %64, %53, %cst_47 {dimension_numbers = #tpu.dot_dimension_numbers<[2], [1], [1], [2], [0, 0, 0, 1, 1, 2], [0], [0]>} : vector<8x8x8xf32>, vector<8x8x32xf32>, vector<8x8x32xf32> -> vector<8x8x32xf32>
    "tpu.trace_stop"() : () -> ()
    "tpu.trace_start"() <{level = 10 : i32, message = "htd,hdk->htk"}> : () -> ()
    %cst_48 = arith.constant dense<0.000000e+00> : vector<8x8x32xf32>
    %66 = tpu.matmul %65, %11, %cst_48 {dimension_numbers = #tpu.dot_dimension_numbers<[2], [1], [1], [2], [0, 0, 0, 1, 1, 2], [0], [0]>} : vector<8x8x32xf32>, vector<8x32x32xf32>, vector<8x8x32xf32> -> vector<8x8x32xf32>
    "tpu.trace_stop"() : () -> ()
    %cst_49 = arith.constant dense<0.000000e+00> : vector<8x32xf32>
    %67 = vector.multi_reduction <add>, %66, %cst_49 [0] : vector<8x8x32xf32> to vector<8x32xf32>
    %68 = tpu.concatenate %46, %67 in 0 : vector<8x32xf32>, vector<8x32xf32> -> vector<16x32xf32>
    %69 = vector.broadcast %13 : vector<1x32xf32> to vector<16x32xf32>
    %70 = arith.addf %68, %69 : vector<16x32xf32>
    %71 = arith.addf %3, %70 : vector<16x32xf32>
    %cst_50 = arith.constant dense<0.000000e+00> : vector<16xf32>
    %72 = vector.multi_reduction <add>, %71, %cst_50 [1] : vector<16x32xf32> to vector<16xf32>
    %73 = vector.shape_cast %72 : vector<16xf32> to vector<16x1xf32>
    %cst_51 = arith.constant 3.200000e+01 : f32
    %74 = vector.broadcast %cst_51 : f32 to vector<16x1xf32>
    %75 = arith.divf %73, %74 : vector<16x1xf32>
    %76 = vector.broadcast %75 : vector<16x1xf32> to vector<16x32xf32>
    %77 = arith.subf %71, %76 : vector<16x32xf32>
    %78 = arith.mulf %77, %77 : vector<16x32xf32>
    %cst_52 = arith.constant dense<0.000000e+00> : vector<16xf32>
    %79 = vector.multi_reduction <add>, %78, %cst_52 [1] : vector<16x32xf32> to vector<16xf32>
    %80 = vector.shape_cast %79 : vector<16xf32> to vector<16x1xf32>
    %cst_53 = arith.constant 3.200000e+01 : f32
    %81 = vector.broadcast %cst_53 : f32 to vector<16x1xf32>
    %82 = arith.divf %80, %81 : vector<16x1xf32>
    %83 = vector.broadcast %75 : vector<16x1xf32> to vector<16x32xf32>
    %84 = arith.subf %71, %83 : vector<16x32xf32>
    %cst_54 = arith.constant 9.99999974E-6 : f32
    %85 = vector.broadcast %cst_54 : f32 to vector<16x1xf32>
    %86 = arith.addf %82, %85 : vector<16x1xf32>
    %87 = math.rsqrt %86 : vector<16x1xf32>
    %88 = vector.broadcast %87 : vector<16x1xf32> to vector<16x32xf32>
    %89 = arith.mulf %84, %88 : vector<16x32xf32>
    %90 = vector.broadcast %15 : vector<1x32xf32> to vector<16x32xf32>
    %91 = arith.mulf %89, %90 : vector<16x32xf32>
    %92 = vector.broadcast %17 : vector<1x32xf32> to vector<16x32xf32>
    %93 = arith.addf %91, %92 : vector<16x32xf32>
    %c0_55 = arith.constant 0 : index
    %c0_56 = arith.constant 0 : index
    %c0_57 = arith.constant 0 : index
    %94 = vector.load %arg7[%c0_55, %c0_56, %c0_57] : memref<1x32x128xf32, #tpu.memory_space<vmem>>, vector<1x32x128xf32>
    %95 = vector.shape_cast %94 : vector<1x32x128xf32> to vector<32x128xf32>
    %cst_58 = arith.constant dense<0.000000e+00> : vector<16x128xf32>
    %96 = tpu.matmul %93, %95, %cst_58 {dimension_numbers = #tpu.dot_dimension_numbers<[1], [0], [0], [1], [0, 0, 1, 1], [], []>} : vector<16x32xf32>, vector<32x128xf32>, vector<16x128xf32> -> vector<16x128xf32>
    %97 = vector.broadcast %19 : vector<1x128xf32> to vector<16x128xf32>
    %98 = arith.addf %96, %97 : vector<16x128xf32>
    %cst_59 = arith.constant 0.000000e+00 : f32
    %99 = vector.broadcast %cst_59 : f32 to vector<16x128xf32>
    %100 = arith.maximumf %98, %99 : vector<16x128xf32>
    %c0_60 = arith.constant 0 : index
    %c0_61 = arith.constant 0 : index
    %c0_62 = arith.constant 0 : index
    %101 = vector.load %arg8[%c0_60, %c0_61, %c0_62] : memref<1x128x32xf32, #tpu.memory_space<vmem>>, vector<1x128x32xf32>
    %102 = vector.shape_cast %101 : vector<1x128x32xf32> to vector<128x32xf32>
    %cst_63 = arith.constant dense<0.000000e+00> : vector<16x32xf32>
    %103 = tpu.matmul %100, %102, %cst_63 {dimension_numbers = #tpu.dot_dimension_numbers<[1], [0], [0], [1], [0, 0, 1, 1], [], []>} : vector<16x128xf32>, vector<128x32xf32>, vector<16x32xf32> -> vector<16x32xf32>
    %104 = vector.broadcast %21 : vector<1x32xf32> to vector<16x32xf32>
    %105 = arith.addf %103, %104 : vector<16x32xf32>
    %106 = arith.addf %93, %105 : vector<16x32xf32>
    %cst_64 = arith.constant dense<0.000000e+00> : vector<16xf32>
    %107 = vector.multi_reduction <add>, %106, %cst_64 [1] : vector<16x32xf32> to vector<16xf32>
    %108 = vector.shape_cast %107 : vector<16xf32> to vector<16x1xf32>
    %cst_65 = arith.constant 3.200000e+01 : f32
    %109 = vector.broadcast %cst_65 : f32 to vector<16x1xf32>
    %110 = arith.divf %108, %109 : vector<16x1xf32>
    %111 = vector.broadcast %110 : vector<16x1xf32> to vector<16x32xf32>
    %112 = arith.subf %106, %111 : vector<16x32xf32>
    %113 = arith.mulf %112, %112 : vector<16x32xf32>
    %cst_66 = arith.constant dense<0.000000e+00> : vector<16xf32>
    %114 = vector.multi_reduction <add>, %113, %cst_66 [1] : vector<16x32xf32> to vector<16xf32>
    %115 = vector.shape_cast %114 : vector<16xf32> to vector<16x1xf32>
    %cst_67 = arith.constant 3.200000e+01 : f32
    %116 = vector.broadcast %cst_67 : f32 to vector<16x1xf32>
    %117 = arith.divf %115, %116 : vector<16x1xf32>
    %118 = vector.broadcast %110 : vector<16x1xf32> to vector<16x32xf32>
    %119 = arith.subf %106, %118 : vector<16x32xf32>
    %cst_68 = arith.constant 9.99999974E-6 : f32
    %120 = vector.broadcast %cst_68 : f32 to vector<16x1xf32>
    %121 = arith.addf %117, %120 : vector<16x1xf32>
    %122 = math.rsqrt %121 : vector<16x1xf32>
    %123 = vector.broadcast %122 : vector<16x1xf32> to vector<16x32xf32>
    %124 = arith.mulf %119, %123 : vector<16x32xf32>
    %125 = vector.broadcast %23 : vector<1x32xf32> to vector<16x32xf32>
    %126 = arith.mulf %124, %125 : vector<16x32xf32>
    %127 = vector.broadcast %25 : vector<1x32xf32> to vector<16x32xf32>
    %128 = arith.addf %126, %127 : vector<16x32xf32>
    %c0_69 = arith.constant 0 : index
    %c0_70 = arith.constant 0 : index
    %129 = vector.load %arg13[%c0_69, %c0_70] : memref<16x32xf32, #tpu.memory_space<vmem>>, vector<16x32xf32>
    tpu.vector_store %arg13[%c0_69, %c0_70], %128 {strides = array<i32>} : memref<16x32xf32, #tpu.memory_space<vmem>>, vector<16x32xf32>,
    %c5_i32 = arith.constant 5 : i32
    %130 = arith.cmpi eq, %arg0, %c5_i32 : i32
    %131 = arith.extui %130 : i1 to i32
    %c0_i32_71 = arith.constant 0 : i32
    %132 = arith.cmpi ne, %131, %c0_i32_71 : i32
    scf.if %132 {
      %133 = vector.extract_strided_slice %128 {offsets = [0, 0], sizes = [8, 32], strides = [1, 1]} : vector<16x32xf32> to vector<8x32xf32>
      %cst_72 = arith.constant dense<0.000000e+00> : vector<32xf32>
      %134 = vector.multi_reduction <add>, %133, %cst_72 [0] : vector<8x32xf32> to vector<32xf32>
      %135 = vector.shape_cast %134 : vector<32xf32> to vector<1x32xf32>
      %cst_73 = arith.constant 8.000000e+00 : f32
      %136 = vector.broadcast %cst_73 : f32 to vector<1x32xf32>
      %137 = arith.divf %135, %136 : vector<1x32xf32>
      %138 = vector.extract_strided_slice %128 {offsets = [8, 0], sizes = [8, 32], strides = [1, 1]} : vector<16x32xf32> to vector<8x32xf32>
      %cst_74 = arith.constant dense<0.000000e+00> : vector<32xf32>
      %139 = vector.multi_reduction <add>, %138, %cst_74 [0] : vector<8x32xf32> to vector<32xf32>
      %140 = vector.shape_cast %139 : vector<32xf32> to vector<1x32xf32>
      %cst_75 = arith.constant 8.000000e+00 : f32
      %141 = vector.broadcast %cst_75 : f32 to vector<1x32xf32>
      %142 = arith.divf %140, %141 : vector<1x32xf32>
      %143 = tpu.concatenate %137, %142 in 0 : vector<1x32xf32>, vector<1x32xf32> -> vector<2x32xf32>
      %c0_76 = arith.constant 0 : index
      %c0_77 = arith.constant 0 : index
      %144 = vector.load %arg10[%c0_76, %c0_77] : memref<32x6xf32, #tpu.memory_space<vmem>>, vector<32x6xf32>
      %cst_78 = arith.constant dense<0.000000e+00> : vector<2x6xf32>
      %145 = tpu.matmul %143, %144, %cst_78 {dimension_numbers = #tpu.dot_dimension_numbers<[1], [0], [0], [1], [0, 0, 1, 1], [], []>} : vector<2x32xf32>, vector<32x6xf32>, vector<2x6xf32> -> vector<2x6xf32>
      %c0_79 = arith.constant 0 : index
      %c0_80 = arith.constant 0 : index
      %146 = vector.load %arg11[%c0_79, %c0_80] : memref<1x6xf32, #tpu.memory_space<vmem>>, vector<1x6xf32>
      %147 = vector.broadcast %146 : vector<1x6xf32> to vector<2x6xf32>
      %148 = arith.addf %145, %147 : vector<2x6xf32>
      %cst_81 = arith.constant dense<0xFF800000> : vector<2xf32>
      %149 = vector.multi_reduction <maximumf>, %148, %cst_81 [1] : vector<2x6xf32> to vector<2xf32>
      %150 = vector.shape_cast %149 : vector<2xf32> to vector<2x1xf32>
      %151 = vector.broadcast %150 : vector<2x1xf32> to vector<2x6xf32>
      %152 = arith.subf %148, %151 : vector<2x6xf32>
      %153 = math.exp %152 : vector<2x6xf32>
      %cst_82 = arith.constant dense<0.000000e+00> : vector<2xf32>
      %154 = vector.multi_reduction <add>, %153, %cst_82 [1] : vector<2x6xf32> to vector<2xf32>
      %155 = vector.shape_cast %154 : vector<2xf32> to vector<2x1xf32>
      %156 = math.log %155 : vector<2x1xf32>
      %157 = vector.broadcast %156 : vector<2x1xf32> to vector<2x6xf32>
      %158 = arith.subf %152, %157 : vector<2x6xf32>
      %c0_83 = arith.constant 0 : index
      %c0_84 = arith.constant 0 : index
      %159 = vector.load %arg12[%c0_83, %c0_84] : memref<2x6xf32, #tpu.memory_space<vmem>>, vector<2x6xf32>
      tpu.vector_store %arg12[%c0_83, %c0_84], %158 {strides = array<i32>} : memref<2x6xf32, #tpu.memory_space<vmem>>, vector<2x6xf32>,
    } else {
    }
    return
  }
  func.func @transform_0(%arg0: i32) -> (i32, i32) {
    %c0_i32 = arith.constant 0 : i32
    %c0_i32_0 = arith.constant 0 : i32
    %c0_i32_1 = arith.constant 0 : i32
    return %c0_i32, %c0_i32_0 : i32, i32
  }
  func.func @transform_1(%arg0: i32) -> (i32, i32) {
    %c0_i32 = arith.constant 0 : i32
    %c0_i32_0 = arith.constant 0 : i32
    %c0_i32_1 = arith.constant 0 : i32
    return %c0_i32, %c0_i32_0 : i32, i32
  }
  func.func @transform_2(%arg0: i32) -> (i32, i32, i32, i32) {
    %c0_i32 = arith.constant 0 : i32
    %c0_i32_0 = arith.constant 0 : i32
    %c0_i32_1 = arith.constant 0 : i32
    %c0_i32_2 = arith.constant 0 : i32
    return %arg0, %c0_i32, %c0_i32_0, %c0_i32_1 : i32, i32, i32, i32
  }
  func.func @transform_3(%arg0: i32) -> (i32, i32, i32, i32) {
    %c0_i32 = arith.constant 0 : i32
    %c0_i32_0 = arith.constant 0 : i32
    %c0_i32_1 = arith.constant 0 : i32
    %c0_i32_2 = arith.constant 0 : i32
    return %arg0, %c0_i32, %c0_i32_0, %c0_i32_1 : i32, i32, i32, i32
  }
  func.func @transform_4(%arg0: i32) -> (i32, i32, i32, i32) {
    %c0_i32 = arith.constant 0 : i32
    %c0_i32_0 = arith.constant 0 : i32
    %c0_i32_1 = arith.constant 0 : i32
    %c0_i32_2 = arith.constant 0 : i32
    return %arg0, %c0_i32, %c0_i32_0, %c0_i32_1 : i32, i32, i32, i32
  }
  func.func @transform_5(%arg0: i32) -> (i32, i32, i32, i32) {
    %c0_i32 = arith.constant 0 : i32
    %c0_i32_0 = arith.constant 0 : i32
    %c0_i32_1 = arith.constant 0 : i32
    %c0_i32_2 = arith.constant 0 : i32
    return %arg0, %c0_i32, %c0_i32_0, %c0_i32_1 : i32, i32, i32, i32
  }
  func.func @transform_6(%arg0: i32) -> (i32, i32, i32) {
    %c0_i32 = arith.constant 0 : i32
    %c0_i32_0 = arith.constant 0 : i32
    %c0_i32_1 = arith.constant 0 : i32
    return %arg0, %c0_i32, %c0_i32_0 : i32, i32, i32
  }
  func.func @transform_7(%arg0: i32) -> (i32, i32, i32) {
    %c0_i32 = arith.constant 0 : i32
    %c0_i32_0 = arith.constant 0 : i32
    %c0_i32_1 = arith.constant 0 : i32
    return %arg0, %c0_i32, %c0_i32_0 : i32, i32, i32
  }
  func.func @transform_8(%arg0: i32) -> (i32, i32, i32) {
    %c0_i32 = arith.constant 0 : i32
    %c0_i32_0 = arith.constant 0 : i32
    %c0_i32_1 = arith.constant 0 : i32
    return %arg0, %c0_i32, %c0_i32_0 : i32, i32, i32
  }
  func.func @transform_9(%arg0: i32) -> (i32, i32) {
    %c0_i32 = arith.constant 0 : i32
    %c0_i32_0 = arith.constant 0 : i32
    %c0_i32_1 = arith.constant 0 : i32
    return %c0_i32, %c0_i32_0 : i32, i32
  }
  func.func @transform_10(%arg0: i32) -> (i32, i32) {
    %c0_i32 = arith.constant 0 : i32
    %c0_i32_0 = arith.constant 0 : i32
    %c0_i32_1 = arith.constant 0 : i32
    return %c0_i32, %c0_i32_0 : i32, i32
  }
  func.func @transform_11(%arg0: i32) -> (i32, i32) {
    %c0_i32 = arith.constant 0 : i32
    %c0_i32_0 = arith.constant 0 : i32
    %c0_i32_1 = arith.constant 0 : i32
    return %c0_i32, %c0_i32_0 : i32, i32
  }
}

</mosaic_0001>

<bundles_post_ra>
// kernel: transformer_forward.1
= control target key start
LH: loop header
LB: loop body
LE: loop exit
PB: predicated region body
PF: predicated region fallthrough
CT: control target
= control target key end

     0   :  { %s11936_s0 = inlined_call_operand.vmem [shape: s32[16,1], index: 0, kind: input, shape index: {}]   ;;  %s11937_s1 = inlined_call_operand.vmem [shape: f32[50,32], index: 1, kind: input, shape index: {}]   ;;  %s11938_s2 = inlined_call_operand.hbm [shape: f32[6,8,32,32], index: 2, kind: input, shape index: {}]   ;;  %s11939_s3 = inlined_call_operand.hbm [shape: f32[6,8,32,32], index: 3, kind: input, shape index: {}]   ;;  %s11940_s4 = inlined_call_operand.hbm [shape: f32[6,8,32,32], index: 4, kind: input, shape index: {}]   ;;  %s11941_s5 = inlined_call_operand.hbm [shape: f32[6,8,32,32], index: 5, kind: input, shape index: {}]   ;;  %s11942_s6 = inlined_call_operand.vmem [shape: f32[6,32,128], index: 6, kind: input, shape index: {}]   ;;  %s11943_s7 = inlined_call_operand.vmem [shape: f32[6,128,32], index: 7, kind: input, shape index: {}]   ;;  %s11944_s8 = inlined_call_operand.vmem [shape: f32[6,8,128], index: 8, kind: input, shape index: {}]   ;;  %s11945_s9 = inlined_call_operand.vmem [shape: f32[32,6], index: 9, kind: input, shape index: {}]   ;;  %s11946_s10 = inlined_call_operand.vmem [shape: f32[1,6], index: 10, kind: input, shape index: {}]   ;;  %s11947_s11 = inlined_call_operand.hbm [shape: f32[2,6], index: 11, kind: output, shape index: {}]  }
   0x1   :  { %11957 = sst [smem:[#allocation19_spill]] %s11938_s2 }
   0x2   :  { %11958 = sst [smem:[#allocation20_spill]] %s11939_s3 }
   0x3   :  { %11959 = sst [smem:[#allocation21_spill]] %s11945_s9 }
   0x4   :  { %11960 = sst [smem:[#allocation22_spill]] %s11946_s10 }
   0x5   :  { %11961 = sst [smem:[#allocation23_spill]] %s11947_s11 }
   0x6   :  { %16 = vsyncpa [#allocation4], 0 }
   0x7   :  { %18 = vsyncpa [#allocation4 + $0x1], 0 }
   0x8   :  { %19 = vsyncpa [#allocation7], 0 }
   0x9   :  { %21 = vsyncpa [#allocation7 + $0x1], 0 }
   0xa   :  { %22 = vsyncpa [#allocation10], 0 }
   0xb   :  { %24 = vsyncpa [#allocation10 + $0x1], 0 }
   0xc   :  { %25 = vsyncpa [#allocation5], 0  ;;  %s10559_s17 = smov 0   ;;  %s10561_s18 = smov 0  }
   0xd   :  { %s10563_s19 = smov 0   ;;  %s10565_s20 = smov 0  }
   0xe LB: > { %11962 = sst [smem:[#allocation16_spill]] %s10480_s19  ;;  %s10578_s21 = sadd.s32 4294967295, %s10484_s20   ;;  %s10484_s20 = sphi %s10565_s20, %s11980_s20   ;;  %s10480_s19 = sphi %s10563_s19, %s11982_s19   ;;  %s10476_s18 = sphi %s10561_s18, %s11984_s18   ;;  %s10472_s17 = sphi %s10559_s17, %s11983_s17  }
   0xf   : > { %s10581_s22 = sadd.s32 1, %s10484_s20   ;;  %s80_s24 = sadd.s32 1, %s10480_s19 }
  0x10   : > { %11963 = sst [smem:[#allocation17_spill]] %s10581_s22  ;;  %s77_s23 = ssub.s32 %s10484_s20, %s10581_s22 }
  0x11   : > { %p78_p0 = scmp.eq.s32.totalorder %s77_s23, 0  ;;  %p87_p1 = scmp.ne.s32.totalorder %s10480_s19, %s10476_s18 }
  0x12   : > { %p88_p2 = scmp.eq.s32.totalorder %s10484_s20, 0  ;;  %p93_p3 = scmp.ne.s32.totalorder %s10476_s18, %s10472_s17 }
  0x13   : > { %s10591_s25 = scalar_select %p78_p0, %s10480_s19, %s80_s24  }
  0x14   : > { %p89_p4 = por %p88_p2, %p87_p1  ;;  %p94_p5 = scmp.eq.s32.totalorder %s10578_s21, 0 }
  0x15   : > { %11964 = sst [smem:[#allocation18_spill]] %s10591_s25  ;;  %p10051_p6 = scmp.lt.s32.totalorder %s10484_s20, 6 }
  0x16   : > { %p10595_p7 = por %p94_p5, %p93_p3  ;;  %s10600_s27 = sand.u32 1, %s10480_s19  }
  0x17   : > { %s10603_s28 = sshll.u32 %s10600_s27, 8  ;;  %s10606_s29 = sshll.u32 %s10484_s20, 12 }
  0x18   : > { %s11965_s26 = scalar_select %p10595_p7, 1, 0 }
  0x19   : > { %p10608_p8 = pnand %p10051_p6, %p89_p4  ;;  %s369_s12 = sand.u32 1, %s10484_s20  }
  0x1a   : > { %s11967_s3 = sld [smem:[#allocation20_spill]]  ;;  %s373_s16 = scalar_lea.vmem [#allocation6], %s10603_s28 }
  0x1b   : > { %s380_s17 = sshll.u32 %s373_s16, 4  ;;  %s10624_s23 = scalar_lea.sflag [#allocation7], %s369_s12  ;;  %s10621_s17 = int_to_ptr.vmem [resolvable:$true] %s380_s17 }
  0x1c   : > { %p10630_p12 = pneg %p10608_p8 }
  0x20   : > { %s10617_s15 = scalar_lea.hbm %s11967_s3, %s10606_s29  ;;  %s10307_s16 = scalar_lea.hbm %s11967_s3, 24576 }
  0x21   : > { %s10302_s24 = scalar_lea.hbm %s10617_s15, 4096  ;;  %p10308_p1 = scmp.lt.s32.totalorder %s10617_s15, %s11967_s3 }
  0x22   : > { %p10303_p11 = scmp.ne.s32.totalorder %s10617_s15, %s10302_s24  ;;  %p10309_p2 = scmp.lt.s32.totalorder %s10307_s16, %s10302_s24 }
  0x24   : > { %p10305_p13 = pnand %p10630_p12, %p10303_p11  ;;  %p10310_p3 = por %p10309_p2, %p10308_p1 }
  0x26   : > { %p10306_p0 = pneg %p10305_p13 }
  0x28   : > { %p10311_p4 = pnand %p10310_p3, %p10306_p0 }
  0x2a   : > { %10314 = shalt.err (!%p10311_p4)
}
  0x2b   : > { %s10315_s12 = scalar_lea.vmem %s10621_s17, 4096  ;;  %s10486_s11 = smov [#allocation6]  }
  0x2c   : > { %p10316_p5 = scmp.ne.s32.totalorder %s10621_s17, %s10315_s12  ;;  %s10320_s13 = sshll.u32 %s10486_s11, 4  ;;  %s10321_s13 = int_to_ptr.vmem [resolvable:$false] %s10320_s13 }
  0x2d   : > { %s10322_s14 = scalar_lea.vmem %s10321_s13, 8192  ;;  %p10323_p13 = scmp.lt.s32.totalorder %s10621_s17, %s10321_s13 }
  0x2e   : > { %p10318_p6 = pnand %p10316_p5, %p10630_p12  ;;  %p10324_p9 = scmp.lt.s32.totalorder %s10322_s14, %s10315_s12 }
  0x30   : > { %p10319_p11 = pneg %p10318_p6  ;;  %p10325_p10 = por %p10324_p9, %p10323_p13 }
  0x32   : > { %p10326_p7 = pnand %p10325_p10, %p10319_p11 }
  0x34   : > { %10329 = shalt.err (!%p10326_p7)
}
  0x35   : > { %s11952_s19 = smov 128   ;;  %s11954_s11 = smov 8  }
  0x36   : > { %10044 = dma.hbm_to_vmem [thread:$0]  (!%p10608_p8), %s10617_s15, 4096, %s10621_s17, %s10624_s23, %s11952_s19, %s11952_s19, %s11954_s11  }
  0x37   : > { %p11969_p9 = scmp.lt.s32.totalorder %s10484_s20, 7  ;;  %p11970_p7 = scmp.ge.s32.totalorder %s10484_s20, 1 }
  0x38   : > { %s11972_s2 = sld [smem:[#allocation19_spill]]  ;;  %s352_s13 = scalar_lea.vmem [#allocation3], %s10603_s28 }
  0x39   : > { %p10660_p10 = pnand %p11970_p7, %p11969_p9  ;;  %s359_s14 = sshll.u32 %s352_s13, 4  ;;  %s10671_s14 = int_to_ptr.vmem [resolvable:$true] %s359_s14 }
  0x3a   : > { %s10677_s20 = scalar_lea.hbm %s11940_s4, %s10606_s29  ;;  %s349_s17 = scalar_lea.sflag [#allocation4], %s10600_s27 }
  0x3b   : > { %s11971_s22 = scalar_select %p10660_p10, 1, 0 }
  0x3e   : > { %s10668_s12 = scalar_lea.hbm %s11972_s2, %s10606_s29  ;;  %s10335_s11 = scalar_lea.hbm %s11972_s2, 24576 }
  0x3f   : > { %s10330_s19 = scalar_lea.hbm %s10668_s12, 4096  ;;  %p10336_p3 = scmp.lt.s32.totalorder %s10668_s12, %s11972_s2 }
  0x40   : > { %p10331_p0 = scmp.ne.s32.totalorder %s10668_s12, %s10330_s19  ;;  %p10337_p4 = scmp.lt.s32.totalorder %s10335_s11, %s10330_s19 }
  0x42   : > { %p10333_p1 = pnand %p10331_p0, %p10630_p12  ;;  %p10338_p5 = por %p10337_p4, %p10336_p3 }
  0x44   : > { %p10334_p2 = pneg %p10333_p1 }
  0x46   : > { %p10339_p6 = pnand %p10338_p5, %p10334_p2 }
  0x48   : > { %10342 = shalt.err (!%p10339_p6)
}
  0x49   : > { %s10343_s3 = scalar_lea.vmem %s10671_s14, 4096  ;;  %s10489_s13 = smov [#allocation3]  }
  0x4a   : > { %p10344_p11 = scmp.ne.s32.totalorder %s10671_s14, %s10343_s3  ;;  %s10348_s15 = sshll.u32 %s10489_s13, 4  ;;  %s10349_s15 = int_to_ptr.vmem [resolvable:$false] %s10348_s15 }
  0x4b   : > { %s10350_s24 = scalar_lea.vmem %s10349_s15, 8192  ;;  %p10351_p7 = scmp.lt.s32.totalorder %s10671_s14, %s10349_s15 }
  0x4c   : > { %p10346_p13 = pnand %p10344_p11, %p10630_p12  ;;  %p10352_p0 = scmp.lt.s32.totalorder %s10350_s24, %s10343_s3 }
  0x4e   : > { %p10347_p9 = pneg %p10346_p13  ;;  %p10353_p1 = por %p10352_p0, %p10351_p7 }
  0x50   : > { %p10354_p10 = pnand %p10353_p1, %p10347_p9 }
  0x52   : > { %10357 = shalt.err (!%p10354_p10)
}
  0x53   : > { %s11973_s9 = smov 8   ;;  %s11974_s10 = smov 128  }
  0x54   : > { %10041 = dma.hbm_to_vmem [thread:$0]  (!%p10608_p8), %s10668_s12, 4096, %s10671_s14, %s349_s17, %s11974_s10, %s11974_s10, %s11973_s9  }
  0x55   : > { %s394_s19 = scalar_lea.vmem [#allocation8], %s10603_s28  ;;  %s10358_s16 = scalar_lea.hbm %s10677_s20, 4096 }
  0x56   : > { %s401_s11 = sshll.u32 %s394_s19, 4  ;;  %p10359_p2 = scmp.ne.s32.totalorder %s10677_s20, %s10358_s16  ;;  %s402_s11 = int_to_ptr.vmem [resolvable:$true] %s401_s11 }
  0x57   : > { %s10363_s15 = scalar_lea.hbm %s11940_s4, 24576  ;;  %p10364_p4 = scmp.lt.s32.totalorder %s10677_s20, %s11940_s4 }
  0x58   : > { %p10361_p10 = pnand %p10359_p2, %p10630_p12  ;;  %p10365_p5 = scmp.lt.s32.totalorder %s10363_s15, %s10358_s16 }
  0x5a   : > { %p10362_p3 = pneg %p10361_p10  ;;  %p10366_p6 = por %p10365_p5, %p10364_p4 }
  0x5c   : > { %p10367_p11 = pnand %p10366_p6, %p10362_p3 }
  0x5e   : > { %10370 = shalt.err (!%p10367_p11)
}
  0x5f   : > { %s10371_s12 = scalar_lea.vmem %s402_s11, 4096  ;;  %s10490_s14 = smov [#allocation8]  }
  0x60   : > { %p10372_p13 = scmp.ne.s32.totalorder %s402_s11, %s10371_s12  ;;  %s10376_s17 = sshll.u32 %s10490_s14, 4  ;;  %s10377_s17 = int_to_ptr.vmem [resolvable:$false] %s10376_s17 }
  0x61   : > { %s10378_s19 = scalar_lea.vmem %s10377_s17, 8192  ;;  %p10379_p0 = scmp.lt.s32.totalorder %s402_s11, %s10377_s17 }
  0x62   : > { %p10374_p9 = pnand %p10372_p13, %p10630_p12  ;;  %p10380_p1 = scmp.lt.s32.totalorder %s10378_s19, %s10371_s12 }
  0x64   : > { %p10375_p7 = pneg %p10374_p9  ;;  %p10381_p2 = por %p10380_p1, %p10379_p0 }
  0x66   : > { %p10382_p10 = pnand %p10381_p2, %p10375_p7 }
  0x68   : > { %10385 = shalt.err (!%p10382_p10)
}
  0x69   : > { %10047 = dma.hbm_to_vmem [thread:$0]  (!%p10608_p8), %s10677_s20, 4096, %s402_s11, %s10624_s23, %s11974_s10, %s11974_s10, %s11973_s9  }
  0x6a   : > { %s10728_s3 = scalar_lea.hbm %s11941_s5, %s10606_s29  ;;  %s415_s13 = scalar_lea.vmem [#allocation9], %s10603_s28 }
  0x6b   : > { %s422_s15 = sshll.u32 %s415_s13, 4  ;;  %s412_s24 = scalar_lea.sflag [#allocation10], %s10600_s27  ;;  %s10731_s15 = int_to_ptr.vmem [resolvable:$true] %s422_s15 }
  0x6c   : > { %s10386_s12 = scalar_lea.hbm %s10728_s3, 4096  ;;  %s10391_s20 = scalar_lea.hbm %s11941_s5, 24576 }
  0x6d   : > { %p10387_p3 = scmp.ne.s32.totalorder %s10728_s3, %s10386_s12  ;;  %p10392_p6 = scmp.lt.s32.totalorder %s10728_s3, %s11941_s5 }
  0x6e   : > { %p10393_p11 = scmp.lt.s32.totalorder %s10391_s20, %s10386_s12 }
  0x6f   : > { %p10389_p4 = pnand %p10387_p3, %p10630_p12 }
  0x70   : > { %p10394_p13 = por %p10393_p11, %p10392_p6 }
  0x71   : > { %p10390_p5 = pneg %p10389_p4 }
  0x73   : > { %p10395_p9 = pnand %p10394_p13, %p10390_p5 }
  0x75   : > { %10398 = shalt.err (!%p10395_p9)
}
  0x76   : > { %s10399_s27 = scalar_lea.vmem %s10731_s15, 4096  ;;  %s10491_s28 = smov [#allocation9]  }
  0x77   : > { %p10400_p7 = scmp.ne.s32.totalorder %s10731_s15, %s10399_s27  ;;  %s10404_s17 = sshll.u32 %s10491_s28, 4  ;;  %s10405_s17 = int_to_ptr.vmem [resolvable:$false] %s10404_s17 }
  0x78   : > { %s10406_s19 = scalar_lea.vmem %s10405_s17, 8192  ;;  %p10407_p2 = scmp.lt.s32.totalorder %s10731_s15, %s10405_s17 }
  0x79   : > { %p10402_p0 = pnand %p10400_p7, %p10630_p12  ;;  %p10408_p10 = scmp.lt.s32.totalorder %s10406_s19, %s10399_s27 }
  0x7b   : > { %p10403_p1 = pneg %p10402_p0  ;;  %p10409_p3 = por %p10408_p10, %p10407_p2 }
  0x7d   : > { %p10410_p4 = pnand %p10409_p3, %p10403_p1 }
  0x7f   : > { %10413 = shalt.err (!%p10410_p4)
}
  0x80   : > { %10050 = dma.hbm_to_vmem [thread:$0]  (!%p10608_p8), %s10728_s3, 4096, %s10731_s15, %s412_s24, %s11974_s10, %s11974_s10, %s11973_s9  }
  0x81   : > { %p11975_p12 = scmp.ne.s32.totalorder %s11971_s22, 0 }
  0x82   : > { %s459_s25 = sand.u32 (!%p11975_p12), 1, %s10476_s18   ;;  %p11976_p5 = scmp.ne.s32.totalorder (!%p11975_p12), %s11965_s26, 0 }
  0x83   : > { %457 = sbr.rel (%p11975_p12) target bundleno = 4202 (0x106a), region = 64  ;;  %s8517_s2 = sshll.u32 (!%p11975_p12), %s459_s25, 8 }
  0x84   : > { %s460_s16 = scalar_lea.sflag (!%p11975_p12), [#allocation4], %s459_s25  ;;  %s10760_s13 = scalar_lea.vmem (!%p11975_p12), [#allocation3], %s8517_s2 }
  0x88   : > { %10455 = dma.done.wait (%p11976_p5), %s460_s16, 4096  }
  0x89   : > { %10457 = vsyncadd (%p11976_p5), %s460_s16, 4294963200  ;;  %s468_s30 = sand.u32 1, %s10578_s21   ;;  %s10767_s9 = scalar_lea.vmem [#allocation6], %s8517_s2 }
  0x8a   : > { %s469_s12 = scalar_lea.sflag [#allocation7], %s468_s30 }
  0x8b   : > { %10459 = dma.done.wait (%p11976_p5), %s469_s12, 8192  }
  0x8c   : > { %10461 = vsyncadd (%p11976_p5), %s469_s12, 4294959104  ;;  %s10773_s22 = scalar_lea.vmem [#allocation8], %s8517_s2  ;;  %s487_s10 = scalar_lea.sflag [#allocation10], %s459_s25 }
  0x8d   : > { %s10775_s3 = scalar_lea.vmem [#allocation9], %s8517_s2 }
  0x8e   : > { %10463 = dma.done.wait (%p11976_p5), %s487_s10, 4096  }
  0x8f   : > { %10465 = vsyncadd (%p11976_p5), %s487_s10, 4294963200  ;;  %p553_p8 = scmp.lt.s32.totalorder %s10578_s21, 5  ;;  %p8526_p6 = scmp.ne.s32.totalorder %s10578_s21, 0 }
  0x91   : > { %s554_s15 = scalar_select %p553_p8, %s10578_s21, 5 }
  0x92   : > { %570 = sbr.rel (%p8526_p6) target bundleno = 479 (0x1df), region = 84 }
  0x93   : > { %s8664_s24 = sshll.u32 %s554_s15, 5  ;;  %s8665_s14 = sshll.u32 %s554_s15, 7 }
  0x94   : > { %s10786_s11 = scalar_lea.vmem %s11942_s6, %s8664_s24  ;;  %s10791_s28 = scalar_lea.vmem %s11943_s7, %s8665_s14 }
  0x95   : > { %s8525_s17 = sshll.u32 %s554_s15, 3 }
  0x96   : > { %s10796_s25 = scalar_lea.vmem %s11944_s8, %s8525_s17 }
  0x97   : > { %v571_v0 = vld [vmem:[%s11936_s0] sm:$0xff]  ;;  %v593_v1 = vld [vmem:[%s11937_s1 + $0x30] sm:$0x3]  ;;  %vm601_vm0 = vcmask 1041408   ;;  %v10492_v2 = vmov 0   ;;  %v592_v3 = vld [vmem:[%s11937_s1 + $0x28] sm:$0xff]  ;;  %v573_v10 = vlaneseq }
  0x98   : > { %10095 = vset.pattern.permute.xlu0 %v10492_v2  ;;  %9088 = vmatprep.subr.msk.mxu0 %vm601_vm0, %v593_v1  ;;  %v591_v4 = vld [vmem:[%s11937_s1 + $0x20] sm:$0xff]  ;;  %v572_v5 = vld [vmem:[%s11936_s0 + $0x8] sm:$0xff]  ;;  %v590_v6 = vld [vmem:[%s11937_s1 + $0x18] sm:$0xff]  ;;  %vm594_vm1 = vcmask 408576   ;;  %v10493_v13 = vmov 0.0   ;;  %vm680_vm4 = vcmask 261120  }
  0x99   : > { %576 = vperm.xlu0 %10095, %v571_v0   ;;  %9089 = vmatpush3.msk.msra.mxu0 %vm601_vm0, %v593_v1  ;;  %v589_v7 = vld [vmem:[%s11937_s1 + $0x10] sm:$0xff]  ;;  %v588_v8 = vld [vmem:[%s11937_s1 + $0x8] sm:$0xff]  ;;  %v587_v9 = vld [vmem:[%s11937_s1] sm:$0xff]  ;;  %v574_v11 = vand.u32 127, %v573_v10 }
  0x9a   : > { %9090 = vmatprep.subr.mxu0 %v592_v3 }
  0x9b   : > { %9091 = vmatpush3.msra.mxu0 %v592_v3 }
  0x9c   : > { %9092 = vmatprep.subr.mxu0 %v591_v4 }
  0x9d   : > { %579 = vperm.xlu0 %10095, %v572_v5   ;;  %9093 = vmatpush3.msra.mxu0 %v591_v4 }
  0x9e   : > { %9094 = vmatprep.subr.mxu0 %v590_v6 }
  0x9f   : > { %9095 = vmatpush3.msra.mxu0 %v590_v6 }
  0xa0   : > { %9096 = vmatprep.subr.mxu0 %v589_v7 }
  0xa1   : > { %9097 = vmatpush3.msra.mxu0 %v589_v7 }
  0xa2   : > { %9098 = vmatprep.subr.mxu0 %v588_v8 }
  0xa3   : > { %9099 = vmatpush3.msra.mxu0 %v588_v8 }
  0xa4   : > { %9100 = vmatprep.subr.mxu0 %v587_v9 }
  0xa5   : > { %9101 = vmatpush3.msra.mxu0 %v587_v9 }
 0x114   : > { %v577_v12 = vpop.permute.xlu0 %576 }
 0x115   : > { %vm581_vm2 = vcmp.eq.s32.totalorder %v574_v11, %v577_v12 }
 0x116   : > { %v8527_v14 = vsel %vm581_vm2, 1.0, %v10493_v13 }
 0x117   : > { %9102 = vmatprep.mubr.msk.f32.mxu0 %vm594_vm1, %v8527_v14 }
 0x118   : > { %v580_v15 = vpop.permute.xlu0 %579 }
 0x119   : > { %vm582_vm3 = vcmp.eq.s32.totalorder %v574_v11, %v580_v15 }
 0x11a   : > { %v8528_v16 = vsel %vm582_vm3, 1.0, %v10493_v13 }
 0x11b   : > { %9103 = vmatmul.mubr.msk.f32.vlgmr.msra.gmra.mxu0 %vm594_vm1, %v8528_v16 }
 0x1db   : > { %v9104_v17 = vpop.f32.mrf.mxu0 }
 0x1dc   : > { %682 = vst.msk [vmem:[#allocation2 + $0x8] sm:$0xff] %vm680_vm4, %v9104_v17 }
 0x1dd   : > { %v671_v18 = vpop.f32.mrf.mxu0 }
 0x1de   : > { %681 = vst.msk [vmem:[#allocation2] sm:$0xff] %vm680_vm4, %v671_v18 }
 0x1df PF: > { %v688_v19 = vld [vmem:[%s10760_s13 + $0x18] sm:$0xff]  ;;  %v10494_v21 = vmov 0.0   ;;  %v687_v22 = vld [vmem:[%s10760_s13 + $0x10] sm:$0xff]  ;;  %v686_v24 = vld [vmem:[%s10760_s13 + $0x8] sm:$0xff]  ;;  %vm820_vm5 = vcmask 261120   ;;  %vm10495_vm6 = vmmov 0  }
 0x1e0   : > { %v700_v20 = vld [vmem:[%s10760_s13 + $0x78] sm:$0xff]  ;;  %9105 = vmatprep.subr.mxu0 %v10494_v21  ;;  %9138 = vmatprep.subr.mxu1 %v10494_v21  ;;  %v699_v23 = vld [vmem:[%s10760_s13 + $0x70] sm:$0xff]  ;;  %v698_v25 = vld [vmem:[%s10760_s13 + $0x68] sm:$0xff]  ;;  %vm3112_vm7 = vcmask 64512   ;;  %p8653_p11 = scmp.ne.s32.totalorder %s10578_s21, 5 }
 0x1e1   : > { %9106 = vmatpush3.msra.mxu0 %v688_v19  ;;  %9139 = vmatpush3.msra.mxu1 %v700_v20  ;;  %v685_v26 = vld [vmem:[%s10760_s13] sm:$0xff]  ;;  %v692_v29 = vld [vmem:[%s10760_s13 + $0x38] sm:$0xff]  ;;  %v691_v31 = vld [vmem:[%s10760_s13 + $0x30] sm:$0xff]  ;;  %s11978_s14 = sld [smem:[#allocation22_spill]] (!%p8653_p11) }
 0x1e2   : > { %9107 = vmatprep.subr.mxu0 %v10494_v21  ;;  %9140 = vmatprep.subr.mxu1 %v10494_v21  ;;  %v697_v27 = vld [vmem:[%s10760_s13 + $0x60] sm:$0xff]  ;;  %v708_v30 = vld [vmem:[%s10760_s13 + $0xb8] sm:$0xff]  ;;  %v707_v32 = vld [vmem:[%s10760_s13 + $0xb0] sm:$0xff] }
 0x1e3   : > { %9108 = vmatpush3.msra.mxu0 %v687_v22  ;;  %9141 = vmatpush3.msra.mxu1 %v699_v23  ;;  %v690_v33 = vld [vmem:[%s10760_s13 + $0x28] sm:$0xff]  ;;  %v689_v35 = vld [vmem:[%s10760_s13 + $0x20] sm:$0xff]  ;;  %v696_v37 = vld [vmem:[%s10760_s13 + $0x58] sm:$0xff] }
 0x1e4   : > { %9109 = vmatprep.subr.mxu0 %v10494_v21  ;;  %9142 = vmatprep.subr.mxu1 %v10494_v21  ;;  %v706_v34 = vld [vmem:[%s10760_s13 + $0xa8] sm:$0xff]  ;;  %v705_v36 = vld [vmem:[%s10760_s13 + $0xa0] sm:$0xff]  ;;  %v716_v38 = vld [vmem:[%s10760_s13 + $0xf8] sm:$0xff] }
 0x1e5   : > { %9110 = vmatpush3.msra.mxu0 %v686_v24  ;;  %9143 = vmatpush3.msra.mxu1 %v698_v25  ;;  %v10840_v28 = vld [vmem:[#allocation2] sm:$0xff]  ;;  %v694_v41 = vld [vmem:[%s10760_s13 + $0x48] sm:$0xff]  ;;  %v693_v43 = vld [vmem:[%s10760_s13 + $0x40] sm:$0xff] }
 0x1e6   : > { %9111 = vmatprep.subr.mxu0 %v10494_v21  ;;  %9144 = vmatprep.subr.mxu1 %v10494_v21  ;;  %v695_v39 = vld [vmem:[%s10760_s13 + $0x50] sm:$0xff]  ;;  %v714_v42 = vld [vmem:[%s10760_s13 + $0xe8] sm:$0xff]  ;;  %v713_v44 = vld [vmem:[%s10760_s13 + $0xe0] sm:$0xff] }
 0x1e7   : > { %9112 = vmatpush3.msra.mxu0 %v685_v26  ;;  %9113 = vmatprep.mubr.msk.f32.mxu0 %vm10495_vm6, %v10494_v21  ;;  %v715_v40 = vld [vmem:[%s10760_s13 + $0xf0] sm:$0xff]  ;;  %v704_v45 = vld [vmem:[%s10760_s13 + $0x98] sm:$0xff]  ;;  %v702_v49 = vld [vmem:[%s10760_s13 + $0x88] sm:$0xff] }
 0x1e8   : > { %9145 = vmatpush3.msra.mxu1 %v697_v27  ;;  %9114 = vmatmul.mubr.msk.f32.vlgmr.msra.gmra.mxu0 %vm820_vm5, %v10840_v28  ;;  %v724_v46 = vld [vmem:[%s10767_s9 + $0x38] sm:$0xff]  ;;  %v703_v47 = vld [vmem:[%s10760_s13 + $0x90] sm:$0xff]  ;;  %v722_v50 = vld [vmem:[%s10767_s9 + $0x28] sm:$0xff] }
 0x1e9   : > { %9116 = vmatprep.subr.mxu0 %v10494_v21  ;;  %9146 = vmatprep.mubr.msk.f32.mxu1 %vm10495_vm6, %v10494_v21  ;;  %v723_v48 = vld [vmem:[%s10767_s9 + $0x30] sm:$0xff]  ;;  %v701_v51 = vld [vmem:[%s10760_s13 + $0x80] sm:$0xff]  ;;  %v712_v53 = vld [vmem:[%s10760_s13 + $0xd8] sm:$0xff] }
 0x1ea   : > { %9160 = vmatprep.subr.mxu1 %v10494_v21  ;;  %9117 = vmatpush3.msra.mxu0 %v692_v29  ;;  %v721_v52 = vld [vmem:[%s10767_s9 + $0x20] sm:$0xff]  ;;  %v732_v54 = vld [vmem:[%s10767_s9 + $0x78] sm:$0xff]  ;;  %v711_v55 = vld [vmem:[%s10760_s13 + $0xd0] sm:$0xff] }
 0x1eb   : > { %9147 = vmatmul.mubr.msk.f32.vlgmr.msra.gmra.mxu1 %vm820_vm5, %v10840_v28  ;;  %9118 = vmatprep.subr.mxu0 %v10494_v21  ;;  %v731_v56 = vld [vmem:[%s10767_s9 + $0x70] sm:$0xff]  ;;  %v710_v57 = vld [vmem:[%s10760_s13 + $0xc8] sm:$0xff]  ;;  %v709_v59 = vld [vmem:[%s10760_s13 + $0xc0] sm:$0xff] }
 0x1ec   : > { %9161 = vmatpush3.msra.mxu1 %v708_v30  ;;  %9119 = vmatpush3.msra.mxu0 %v691_v31  ;;  %v730_v58 = vld [vmem:[%s10767_s9 + $0x68] sm:$0xff]  ;;  %v729_v60 = vld [vmem:[%s10767_s9 + $0x60] sm:$0xff]  ;;  %v720_v61 = vld [vmem:[%s10767_s9 + $0x18] sm:$0xff] }
 0x1ed   : > { %9162 = vmatprep.subr.mxu1 %v10494_v21  ;;  %9120 = vmatprep.subr.mxu0 %v10494_v21  ;;  %v740_v62 = vld [vmem:[%s10767_s9 + $0xb8] sm:$0xff]  ;;  %v719_v63 = vld [vmem:[%s10767_s9 + $0x10] sm:$0xff]  ;;  %v718_v1 = vld [vmem:[%s10767_s9 + $0x8] sm:$0xff] }
 0x1ee   : > { %9163 = vmatpush3.msra.mxu1 %v707_v32  ;;  %9121 = vmatpush3.msra.mxu0 %v690_v33  ;;  %v739_v0 = vld [vmem:[%s10767_s9 + $0xb0] sm:$0xff]  ;;  %v738_v2 = vld [vmem:[%s10767_s9 + $0xa8] sm:$0xff]  ;;  %v717_v3 = vld [vmem:[%s10767_s9] sm:$0xff] }
 0x1ef   : > { %9164 = vmatprep.subr.mxu1 %v10494_v21  ;;  %9122 = vmatprep.subr.mxu0 %v10494_v21  ;;  %v737_v4 = vld [vmem:[%s10767_s9 + $0xa0] sm:$0xff]  ;;  %v728_v5 = vld [vmem:[%s10767_s9 + $0x58] sm:$0xff]  ;;  %v727_v7 = vld [vmem:[%s10767_s9 + $0x50] sm:$0xff] }
 0x1f0   : > { %9165 = vmatpush3.msra.mxu1 %v706_v34  ;;  %9123 = vmatpush3.msra.mxu0 %v689_v35  ;;  %v748_v6 = vld [vmem:[%s10767_s9 + $0xf8] sm:$0xff]  ;;  %v747_v8 = vld [vmem:[%s10767_s9 + $0xf0] sm:$0xff]  ;;  %v726_v9 = vld [vmem:[%s10767_s9 + $0x48] sm:$0xff] }
 0x1f1   : > { %9166 = vmatprep.subr.mxu1 %v10494_v21  ;;  %9124 = vmatprep.mubr.msk.f32.mxu0 %vm10495_vm6, %v10494_v21  ;;  %v746_v10 = vld [vmem:[%s10767_s9 + $0xe8] sm:$0xff]  ;;  %v725_v11 = vld [vmem:[%s10767_s9 + $0x40] sm:$0xff]  ;;  %v736_v13 = vld [vmem:[%s10767_s9 + $0x98] sm:$0xff] }
 0x1f2   : > { %9167 = vmatpush3.msra.mxu1 %v705_v36  ;;  %9125 = vmatmul.mubr.msk.f32.vlgmr.msra.gmra.mxu0 %vm820_vm5, %v10840_v28  ;;  %v745_v12 = vld [vmem:[%s10767_s9 + $0xe0] sm:$0xff]  ;;  %v735_v14 = vld [vmem:[%s10767_s9 + $0x90] sm:$0xff]  ;;  %v734_v15 = vld [vmem:[%s10767_s9 + $0x88] sm:$0xff] }
 0x1f3   : > { %9127 = vmatprep.subr.mxu0 %v10494_v21  ;;  %9168 = vmatprep.mubr.msk.f32.mxu1 %vm10495_vm6, %v10494_v21  ;;  %v756_v16 = vld [vmem:[%s10773_s22 + $0x38] sm:$0xff]  ;;  %v733_v17 = vld [vmem:[%s10767_s9 + $0x80] sm:$0xff]  ;;  %v755_v18 = vld [vmem:[%s10773_s22 + $0x30] sm:$0xff] }
 0x1f4   : > { %9182 = vmatprep.subr.mxu1 %v10494_v21  ;;  %9128 = vmatpush3.msra.mxu0 %v696_v37  ;;  %v744_v19 = vld [vmem:[%s10767_s9 + $0xd8] sm:$0xff]  ;;  %v754_v20 = vld [vmem:[%s10773_s22 + $0x28] sm:$0xff]  ;;  %v743_v22 = vld [vmem:[%s10767_s9 + $0xd0] sm:$0xff] }
 0x1f5   : > { %9169 = vmatmul.mubr.msk.f32.vlgmr.msra.gmra.mxu1 %vm820_vm5, %v10840_v28  ;;  %9129 = vmatprep.subr.mxu0 %v10494_v21  ;;  %v753_v23 = vld [vmem:[%s10773_s22 + $0x20] sm:$0xff]  ;;  %v742_v24 = vld [vmem:[%s10767_s9 + $0xc8] sm:$0xff]  ;;  %v752_v26 = vld [vmem:[%s10773_s22 + $0x18] sm:$0xff] }
 0x1f6   : > { %9183 = vmatpush3.msra.mxu1 %v716_v38  ;;  %9130 = vmatpush3.msra.mxu0 %v695_v39  ;;  %v741_v25 = vld [vmem:[%s10767_s9 + $0xc0] sm:$0xff]  ;;  %v764_v27 = vld [vmem:[%s10773_s22 + $0x78] sm:$0xff]  ;;  %v751_v29 = vld [vmem:[%s10773_s22 + $0x10] sm:$0xff] }
 0x1f7   : > { %9184 = vmatprep.subr.mxu1 %v10494_v21  ;;  %9131 = vmatprep.subr.mxu0 %v10494_v21  ;;  %v763_v30 = vld [vmem:[%s10773_s22 + $0x70] sm:$0xff]  ;;  %v750_v31 = vld [vmem:[%s10773_s22 + $0x8] sm:$0xff]  ;;  %v749_v33 = vld [vmem:[%s10773_s22] sm:$0xff] }
 0x1f8   : > { %9185 = vmatpush3.msra.mxu1 %v715_v40  ;;  %9132 = vmatpush3.msra.mxu0 %v694_v41  ;;  %v762_v32 = vld [vmem:[%s10773_s22 + $0x68] sm:$0xff]  ;;  %v760_v34 = vld [vmem:[%s10773_s22 + $0x58] sm:$0xff]  ;;  %v761_v35 = vld [vmem:[%s10773_s22 + $0x60] sm:$0xff] }
 0x1f9   : > { %9186 = vmatprep.subr.mxu1 %v10494_v21  ;;  %9133 = vmatprep.subr.mxu0 %v10494_v21  ;;  %v759_v36 = vld [vmem:[%s10773_s22 + $0x50] sm:$0xff]  ;;  %v772_v37 = vld [vmem:[%s10773_s22 + $0xb8] sm:$0xff]  ;;  %v758_v38 = vld [vmem:[%s10773_s22 + $0x48] sm:$0xff] }
 0x1fa   : > { %9187 = vmatpush3.msra.mxu1 %v714_v42  ;;  %9134 = vmatpush3.msra.mxu0 %v693_v43  ;;  %v771_v39 = vld [vmem:[%s10773_s22 + $0xb0] sm:$0xff]  ;;  %v757_v40 = vld [vmem:[%s10773_s22 + $0x40] sm:$0xff]  ;;  %v770_v41 = vld [vmem:[%s10773_s22 + $0xa8] sm:$0xff] }
 0x1fb   : > { %9188 = vmatprep.subr.mxu1 %v10494_v21  ;;  %9135 = vmatprep.mubr.msk.f32.mxu0 %vm10495_vm6, %v10494_v21  ;;  %v768_v42 = vld [vmem:[%s10773_s22 + $0x98] sm:$0xff]  ;;  %v769_v43 = vld [vmem:[%s10773_s22 + $0xa0] sm:$0xff] }
 0x1fc   : > { %9189 = vmatpush3.msra.mxu1 %v713_v44  ;;  %9136 = vmatmul.mubr.msk.f32.vlgmr.msra.gmra.mxu0 %vm820_vm5, %v10840_v28  ;;  %v767_v44 = vld [vmem:[%s10773_s22 + $0x90] sm:$0xff] }
 0x1fd   : > { %9149 = vmatprep.subr.mxu0 %v10494_v21  ;;  %9190 = vmatprep.mubr.msk.f32.mxu1 %vm10495_vm6, %v10494_v21 }
 0x1fe   : > { %9204 = vmatprep.subr.mxu1 %v10494_v21  ;;  %9150 = vmatpush3.msra.mxu0 %v704_v45  ;;  %v780_v45 = vld [vmem:[%s10773_s22 + $0xf8] sm:$0xff] }
 0x1ff   : > { %9191 = vmatmul.mubr.msk.f32.vlgmr.msra.gmra.mxu1 %vm820_vm5, %v10840_v28  ;;  %9151 = vmatprep.subr.mxu0 %v10494_v21 }
 0x200   : > { %9205 = vmatpush3.msra.mxu1 %v724_v46  ;;  %9152 = vmatpush3.msra.mxu0 %v703_v47  ;;  %v766_v46 = vld [vmem:[%s10773_s22 + $0x88] sm:$0xff]  ;;  %v779_v47 = vld [vmem:[%s10773_s22 + $0xf0] sm:$0xff] }
 0x201   : > { %9206 = vmatprep.subr.mxu1 %v10494_v21  ;;  %9153 = vmatprep.subr.mxu0 %v10494_v21 }
 0x202   : > { %9207 = vmatpush3.msra.mxu1 %v723_v48  ;;  %9154 = vmatpush3.msra.mxu0 %v702_v49  ;;  %v765_v48 = vld [vmem:[%s10773_s22 + $0x80] sm:$0xff]  ;;  %v778_v49 = vld [vmem:[%s10773_s22 + $0xe8] sm:$0xff] }
 0x203   : > { %9208 = vmatprep.subr.mxu1 %v10494_v21  ;;  %9155 = vmatprep.subr.mxu0 %v10494_v21 }
 0x204   : > { %9209 = vmatpush3.msra.mxu1 %v722_v50  ;;  %9156 = vmatpush3.msra.mxu0 %v701_v51  ;;  %v776_v50 = vld [vmem:[%s10773_s22 + $0xd8] sm:$0xff]  ;;  %v777_v51 = vld [vmem:[%s10773_s22 + $0xe0] sm:$0xff] }
 0x205   : > { %9210 = vmatprep.subr.mxu1 %v10494_v21  ;;  %9157 = vmatprep.mubr.msk.f32.mxu0 %vm10495_vm6, %v10494_v21 }
 0x206   : > { %9211 = vmatpush3.msra.mxu1 %v721_v52  ;;  %9158 = vmatmul.mubr.msk.f32.vlgmr.msra.gmra.mxu0 %vm820_vm5, %v10840_v28  ;;  %v775_v52 = vld [vmem:[%s10773_s22 + $0xd0] sm:$0xff] }
 0x207   : > { %9171 = vmatprep.subr.mxu0 %v10494_v21  ;;  %9212 = vmatprep.mubr.msk.f32.mxu1 %vm10495_vm6, %v10494_v21 }
 0x208   : > { %9226 = vmatprep.subr.mxu1 %v10494_v21  ;;  %9172 = vmatpush3.msra.mxu0 %v712_v53  ;;  %v774_v53 = vld [vmem:[%s10773_s22 + $0xc8] sm:$0xff] }
 0x209   : > { %9213 = vmatmul.mubr.msk.f32.vlgmr.msra.gmra.mxu1 %vm820_vm5, %v10840_v28  ;;  %9173 = vmatprep.subr.mxu0 %v10494_v21 }
 0x20a   : > { %9227 = vmatpush3.msra.mxu1 %v732_v54  ;;  %9174 = vmatpush3.msra.mxu0 %v711_v55  ;;  %v773_v54 = vld [vmem:[%s10773_s22 + $0xc0] sm:$0xff] }
 0x20b   : > { %9228 = vmatprep.subr.mxu1 %v10494_v21  ;;  %9175 = vmatprep.subr.mxu0 %v10494_v21 }
 0x20c   : > { %9229 = vmatpush3.msra.mxu1 %v731_v56  ;;  %9176 = vmatpush3.msra.mxu0 %v710_v57 }
 0x20d   : > { %9230 = vmatprep.subr.mxu1 %v10494_v21  ;;  %9177 = vmatprep.subr.mxu0 %v10494_v21 }
 0x20e   : > { %9231 = vmatpush3.msra.mxu1 %v730_v58  ;;  %9178 = vmatpush3.msra.mxu0 %v709_v59 }
 0x20f   : > { %9232 = vmatprep.subr.mxu1 %v10494_v21  ;;  %9179 = vmatprep.mubr.msk.f32.mxu0 %vm10495_vm6, %v10494_v21 }
 0x210   : > { %9233 = vmatpush3.msra.mxu1 %v729_v60  ;;  %9234 = vmatprep.mubr.msk.f32.mxu1 %vm10495_vm6, %v10494_v21 }
 0x211   : > { %9180 = vmatmul.mubr.msk.f32.vlgmr.msra.gmra.mxu0 %vm820_vm5, %v10840_v28  ;;  %9193 = vmatprep.subr.mxu0 %v10494_v21 }
 0x212   : > { %9235 = vmatmul.mubr.msk.f32.vlgmr.msra.gmra.mxu1 %vm820_vm5, %v10840_v28  ;;  %9248 = vmatprep.subr.mxu1 %v10494_v21 }
 0x213   : > { %9194 = vmatpush3.msra.mxu0 %v720_v61  ;;  %9249 = vmatpush3.msra.mxu1 %v740_v62 }
 0x214   : > { %9195 = vmatprep.subr.mxu0 %v10494_v21  ;;  %9250 = vmatprep.subr.mxu1 %v10494_v21 }
 0x215   : > { %9196 = vmatpush3.msra.mxu0 %v719_v63  ;;  %9251 = vmatpush3.msra.mxu1 %v739_v0 }
 0x216   : > { %9197 = vmatprep.subr.mxu0 %v10494_v21  ;;  %9252 = vmatprep.subr.mxu1 %v10494_v21 }
 0x217   : > { %9198 = vmatpush3.msra.mxu0 %v718_v1  ;;  %9253 = vmatpush3.msra.mxu1 %v738_v2 }
 0x218   : > { %9199 = vmatprep.subr.mxu0 %v10494_v21  ;;  %9254 = vmatprep.subr.mxu1 %v10494_v21 }
 0x219   : > { %9200 = vmatpush3.msra.mxu0 %v717_v3  ;;  %9201 = vmatprep.mubr.msk.f32.mxu0 %vm10495_vm6, %v10494_v21 }
 0x21a   : > { %9255 = vmatpush3.msra.mxu1 %v737_v4  ;;  %9256 = vmatprep.mubr.msk.f32.mxu1 %vm10495_vm6, %v10494_v21 }
 0x21b   : > { %9202 = vmatmul.mubr.msk.f32.vlgmr.msra.gmra.mxu0 %vm820_vm5, %v10840_v28  ;;  %9215 = vmatprep.subr.mxu0 %v10494_v21 }
 0x21c   : > { %9257 = vmatmul.mubr.msk.f32.vlgmr.msra.gmra.mxu1 %vm820_vm5, %v10840_v28  ;;  %9270 = vmatprep.subr.mxu1 %v10494_v21 }
 0x21d   : > { %9216 = vmatpush3.msra.mxu0 %v728_v5  ;;  %9271 = vmatpush3.msra.mxu1 %v748_v6 }
 0x21e   : > { %9217 = vmatprep.subr.mxu0 %v10494_v21  ;;  %9272 = vmatprep.subr.mxu1 %v10494_v21 }
 0x21f   : > { %9218 = vmatpush3.msra.mxu0 %v727_v7  ;;  %9273 = vmatpush3.msra.mxu1 %v747_v8 }
 0x220   : > { %9219 = vmatprep.subr.mxu0 %v10494_v21  ;;  %9274 = vmatprep.subr.mxu1 %v10494_v21 }
 0x221   : > { %9220 = vmatpush3.msra.mxu0 %v726_v9  ;;  %9275 = vmatpush3.msra.mxu1 %v746_v10 }
 0x222   : > { %9221 = vmatprep.subr.mxu0 %v10494_v21  ;;  %9276 = vmatprep.subr.mxu1 %v10494_v21 }
 0x223   : > { %9222 = vmatpush3.msra.mxu0 %v725_v11  ;;  %9223 = vmatprep.mubr.msk.f32.mxu0 %vm10495_vm6, %v10494_v21 }
 0x224   : > { %9277 = vmatpush3.msra.mxu1 %v745_v12  ;;  %9278 = vmatprep.mubr.msk.f32.mxu1 %vm10495_vm6, %v10494_v21 }
 0x225   : > { %9224 = vmatmul.mubr.msk.f32.vlgmr.msra.gmra.mxu0 %vm820_vm5, %v10840_v28  ;;  %9237 = vmatprep.subr.mxu0 %v10494_v21 }
 0x226   : > { %9279 = vmatmul.mubr.msk.f32.vlgmr.msra.gmra.mxu1 %vm820_vm5, %v10840_v28  ;;  %9238 = vmatpush3.msra.mxu0 %v736_v13 }
 0x227   : > { %9239 = vmatprep.subr.mxu0 %v10494_v21  ;;  %9245 = vmatprep.mubr.msk.f32.mxu0 %vm10495_vm6, %v10494_v21 }
 0x228   : > { %9240 = vmatpush3.msra.mxu0 %v735_v14  ;;  %9292 = vmatprep.subr.mxu1 %v10494_v21 }
 0x229   : > { %9241 = vmatprep.subr.mxu0 %v10494_v21  ;;  %9293 = vmatpush3.msra.mxu1 %v756_v16 }
 0x22a   : > { %9242 = vmatpush3.msra.mxu0 %v734_v15  ;;  %9294 = vmatprep.subr.mxu1 %v10494_v21 }
 0x22b   : > { %9243 = vmatprep.subr.mxu0 %v10494_v21  ;;  %9295 = vmatpush3.msra.mxu1 %v755_v18 }
 0x22c   : > { %9244 = vmatpush3.msra.mxu0 %v733_v17  ;;  %9296 = vmatprep.subr.mxu1 %v10494_v21 }
 0x22d   : > { %9246 = vmatmul.mubr.msk.f32.vlgmr.msra.gmra.mxu0 %vm820_vm5, %v10840_v28  ;;  %9259 = vmatprep.subr.mxu0 %v10494_v21 }
 0x22e   : > { %9260 = vmatpush3.msra.mxu0 %v744_v19  ;;  %9267 = vmatprep.mubr.msk.f32.mxu0 %vm10495_vm6, %v10494_v21 }
 0x22f   : > { %9261 = vmatprep.subr.mxu0 %v10494_v21  ;;  %9297 = vmatpush3.msra.mxu1 %v754_v20 }
 0x230   : > { %9262 = vmatpush3.msra.mxu0 %v743_v22  ;;  %9298 = vmatprep.subr.mxu1 %v10494_v21 }
 0x231   : > { %9263 = vmatprep.subr.mxu0 %v10494_v21  ;;  %9299 = vmatpush3.msra.mxu1 %v753_v23 }
 0x232   : > { %9264 = vmatpush3.msra.mxu0 %v742_v24  ;;  %9300 = vmatprep.mubr.msk.f32.mxu1 %vm10495_vm6, %v10494_v21 }
 0x233   : > { %9265 = vmatprep.subr.mxu0 %v10494_v21  ;;  %9314 = vmatprep.subr.mxu1 %v10494_v21 }
 0x234   : > { %9266 = vmatpush3.msra.mxu0 %v741_v25  ;;  %9301 = vmatmul.mubr.msk.f32.vlgmr.msra.gmra.mxu1 %vm820_vm5, %v10840_v28 }
 0x235   : > { %9268 = vmatmul.mubr.msk.f32.vlgmr.msra.gmra.mxu0 %vm820_vm5, %v10840_v28  ;;  %9281 = vmatprep.subr.mxu0 %v10494_v21 }
 0x236   : > { %9282 = vmatpush3.msra.mxu0 %v752_v26  ;;  %9315 = vmatpush3.msra.mxu1 %v764_v27 }
 0x237   : > { %9283 = vmatprep.subr.mxu0 %v10494_v21  ;;  %9316 = vmatprep.subr.mxu1 %v10494_v21 }
 0x238   : > { %9284 = vmatpush3.msra.mxu0 %v751_v29  ;;  %9317 = vmatpush3.msra.mxu1 %v763_v30 }
 0x239   : > { %9285 = vmatprep.subr.mxu0 %v10494_v21  ;;  %9318 = vmatprep.subr.mxu1 %v10494_v21 }
 0x23a   : > { %9286 = vmatpush3.msra.mxu0 %v750_v31  ;;  %9319 = vmatpush3.msra.mxu1 %v762_v32 }
 0x23b   : > { %9287 = vmatprep.subr.mxu0 %v10494_v21  ;;  %9289 = vmatprep.mubr.msk.f32.mxu0 %vm10495_vm6, %v10494_v21 }
 0x23c   : > { %9288 = vmatpush3.msra.mxu0 %v749_v33  ;;  %9320 = vmatprep.subr.mxu1 %v10494_v21 }
 0x23d   : > { %9303 = vmatprep.subr.mxu0 %v10494_v21  ;;  %9290 = vmatmul.mubr.msk.f32.vlgmr.msra.gmra.mxu0 %vm820_vm5, %v10840_v28 }
 0x23e   : > { %9304 = vmatpush3.msra.mxu0 %v760_v34  ;;  %9321 = vmatpush3.msra.mxu1 %v761_v35 }
 0x23f   : > { %9305 = vmatprep.subr.mxu0 %v10494_v21  ;;  %9322 = vmatprep.mubr.msk.f32.mxu1 %vm10495_vm6, %v10494_v21 }
 0x240   : > { %9336 = vmatprep.subr.mxu1 %v10494_v21  ;;  %9306 = vmatpush3.msra.mxu0 %v759_v36 }
 0x241   : > { %9323 = vmatmul.mubr.msk.f32.vlgmr.msra.gmra.mxu1 %vm820_vm5, %v10840_v28  ;;  %9307 = vmatprep.subr.mxu0 %v10494_v21 }
 0x242   : > { %9337 = vmatpush3.msra.mxu1 %v772_v37  ;;  %9308 = vmatpush3.msra.mxu0 %v758_v38 }
 0x243   : > { %9338 = vmatprep.subr.mxu1 %v10494_v21  ;;  %9309 = vmatprep.subr.mxu0 %v10494_v21 }
 0x244   : > { %9339 = vmatpush3.msra.mxu1 %v771_v39  ;;  %9310 = vmatpush3.msra.mxu0 %v757_v40 }
 0x245   : > { %9340 = vmatprep.subr.mxu1 %v10494_v21  ;;  %9311 = vmatprep.mubr.msk.f32.mxu0 %vm10495_vm6, %v10494_v21 }
 0x246   : > { %9341 = vmatpush3.msra.mxu1 %v770_v41  ;;  %9325 = vmatprep.subr.mxu0 %v10494_v21 }
 0x247   : > { %9342 = vmatprep.subr.mxu1 %v10494_v21  ;;  %9312 = vmatmul.mubr.msk.f32.vlgmr.msra.gmra.mxu0 %vm820_vm5, %v10840_v28 }
 0x248   : > { %9326 = vmatpush3.msra.mxu0 %v768_v42  ;;  %9343 = vmatpush3.msra.mxu1 %v769_v43 }
 0x249   : > { %9327 = vmatprep.subr.mxu0 %v10494_v21  ;;  %9344 = vmatprep.mubr.msk.f32.mxu1 %vm10495_vm6, %v10494_v21 }
 0x24a   : > { %9358 = vmatprep.subr.mxu1 %v10494_v21  ;;  %9328 = vmatpush3.msra.mxu0 %v767_v44 }
 0x24b   : > { %9345 = vmatmul.mubr.msk.f32.vlgmr.msra.gmra.mxu1 %vm820_vm5, %v10840_v28  ;;  %9329 = vmatprep.subr.mxu0 %v10494_v21 }
 0x24c   : > { %9359 = vmatpush3.msra.mxu1 %v780_v45  ;;  %9330 = vmatpush3.msra.mxu0 %v766_v46 }
 0x24d   : > { %9360 = vmatprep.subr.mxu1 %v10494_v21  ;;  %9331 = vmatprep.subr.mxu0 %v10494_v21 }
 0x24e   : > { %9361 = vmatpush3.msra.mxu1 %v779_v47  ;;  %9332 = vmatpush3.msra.mxu0 %v765_v48 }
 0x24f   : > { %9362 = vmatprep.subr.mxu1 %v10494_v21  ;;  %9333 = vmatprep.mubr.msk.f32.mxu0 %vm10495_vm6, %v10494_v21 }
 0x250   : > { %9363 = vmatpush3.msra.mxu1 %v778_v49  ;;  %9347 = vmatprep.subr.mxu0 %v10494_v21 }
 0x251   : > { %9364 = vmatprep.subr.mxu1 %v10494_v21  ;;  %9334 = vmatmul.mubr.msk.f32.vlgmr.msra.gmra.mxu0 %vm820_vm5, %v10840_v28 }
 0x252   : > { %9348 = vmatpush3.msra.mxu0 %v776_v50  ;;  %9365 = vmatpush3.msra.mxu1 %v777_v51 }
 0x253   : > { %9366 = vmatprep.mubr.msk.f32.mxu1 %vm10495_vm6, %v10494_v21  ;;  %9349 = vmatprep.subr.mxu0 %v10494_v21 }
 0x254   : > { %9367 = vmatmul.mubr.msk.f32.vlgmr.msra.gmra.mxu1 %vm820_vm5, %v10840_v28  ;;  %9384 = vmatprep.subr.mxu1 %v10494_v21 }
 0x255   : > { %9350 = vmatpush3.msra.mxu0 %v775_v52  ;;  %9386 = vmatprep.mubr.msk.f32.mxu1 %vm10495_vm6, %v10494_v21 }
 0x256   : > { %9351 = vmatprep.subr.mxu0 %v10494_v21  ;;  %9355 = vmatprep.mubr.msk.f32.mxu0 %vm10495_vm6, %v10494_v21 }
 0x257   : > { %9352 = vmatpush3.msra.mxu0 %v774_v53 }
 0x258   : > { %9353 = vmatprep.subr.mxu0 %v10494_v21 }
 0x259   : > { %9354 = vmatpush3.msra.mxu0 %v773_v54 }
 0x25a   : > { %9356 = vmatmul.mubr.msk.f32.vlgmr.msra.gmra.mxu0 %vm820_vm5, %v10840_v28  ;;  %9369 = vmatprep.subr.mxu0 %v10494_v21 }
 0x25b   : > { %9371 = vmatprep.mubr.msk.f32.mxu0 %vm10495_vm6, %v10494_v21 }
 0x2a8   : > { %v890_v55 = vpop.f32.mrf.mxu0 }
 0x2aa   : > { %v9115_v56 = vpop.f32.mrf.mxu0 }
 0x2ab   : > { %v1100_v57 = vpop.f32.mrf.mxu1 }
 0x2ad   : > { %v9148_v58 = vpop.f32.mrf.mxu1 }
 0x2b2   : > { %v960_v59 = vpop.f32.mrf.mxu0 }
 0x2b4   : > { %v9126_v60 = vpop.f32.mrf.mxu0 }
 0x2b5   : > { %v1240_v61 = vpop.f32.mrf.mxu1 }
 0x2b7   : > { %v9170_v62 = vpop.f32.mrf.mxu1 }
 0x2bc   : > { %v1030_v63 = vpop.f32.mrf.mxu0 }
 0x2be   : > { %v9137_v0 = vpop.f32.mrf.mxu0 }
 0x2bf   : > { %v1380_v1 = vpop.f32.mrf.mxu1 }
 0x2c1   : > { %v9192_v2 = vpop.f32.mrf.mxu1 }
 0x2c6   : > { %v1170_v3 = vpop.f32.mrf.mxu0 }
 0x2c8   : > { %v9159_v4 = vpop.f32.mrf.mxu0 }
 0x2c9   : > { %v1520_v28 = vpop.f32.mrf.mxu1 }
 0x2cb   : > { %v9214_v5 = vpop.f32.mrf.mxu1 }
 0x2d1   : > { %v1310_v6 = vpop.f32.mrf.mxu0 }
 0x2d2   : > { %v1660_v7 = vpop.f32.mrf.mxu1 }
 0x2d3   : > { %9385 = vmatpush3.xpose.msk.msra.mxu1 %vm820_vm5, %v1660_v7  ;;  %v9181_v8 = vpop.f32.mrf.mxu0 }
 0x2d4   : > { %v9236_v9 = vpop.f32.mrf.mxu1  ;;  %9394 = vmatprep.subr.mxu1 %v10494_v21 }
 0x2d6   : > { %9387 = vmatmul.mubr.msk.f32.vlgmr.msra.gmra.mxu1 %vm820_vm5, %v1100_v57 }
 0x2d7   : > { %9396 = vmatprep.mubr.msk.f32.mxu1 %vm10495_vm6, %v10494_v21 }
 0x2db   : > { %v1450_v10 = vpop.f32.mrf.mxu0 }
 0x2dc   : > { %v1800_v11 = vpop.f32.mrf.mxu1  ;;  %9370 = vmatpush3.xpose.msk.msra.mxu0 %vm820_vm5, %v1450_v10 }
 0x2dd   : > { %9395 = vmatpush3.xpose.msk.msra.mxu1 %vm820_vm5, %v1800_v11  ;;  %v9203_v12 = vpop.f32.mrf.mxu0  ;;  %9374 = vmatprep.subr.mxu0 %v10494_v21 }
 0x2de   : > { %v9258_v13 = vpop.f32.mrf.mxu1  ;;  %9404 = vmatprep.subr.mxu1 %v10494_v21 }
 0x2df   : > { %9372 = vmatmul.mubr.msk.f32.vlgmr.msra.gmra.mxu0 %vm820_vm5, %v890_v55 }
 0x2e0   : > { %9397 = vmatmul.mubr.msk.f32.vlgmr.msra.gmra.mxu1 %vm820_vm5, %v1240_v61  ;;  %9375 = vmatpush3.xpose.msk.msra.mxu0 %vm820_vm5, %v1520_v28 }
 0x2e1   : > { %9376 = vmatprep.mubr.msk.f32.mxu0 %vm10495_vm6, %v10494_v21  ;;  %9379 = vmatprep.subr.mxu0 %v10494_v21 }
 0x2e2   : > { %9406 = vmatprep.mubr.msk.f32.mxu1 %vm10495_vm6, %v10494_v21 }
 0x2e3   : > { %9377 = vmatmul.mubr.msk.f32.vlgmr.msra.gmra.mxu0 %vm820_vm5, %v960_v59 }
 0x2e4   : > { %9381 = vmatprep.mubr.msk.f32.mxu0 %vm10495_vm6, %v10494_v21 }
 0x2e5   : > { %v1590_v14 = vpop.f32.mrf.mxu0 }
 0x2e6   : > { %v1940_v15 = vpop.f32.mrf.mxu1  ;;  %9380 = vmatpush3.xpose.msk.msra.mxu0 %vm820_vm5, %v1590_v14 }
 0x2e7   : > { %9405 = vmatpush3.xpose.msk.msra.mxu1 %vm820_vm5, %v1940_v15  ;;  %v9225_v16 = vpop.f32.mrf.mxu0  ;;  %9389 = vmatprep.subr.mxu0 %v10494_v21 }
 0x2e8   : > { %v9280_v17 = vpop.f32.mrf.mxu1  ;;  %9414 = vmatprep.subr.mxu1 %v10494_v21 }
 0x2e9   : > { %9382 = vmatmul.mubr.msk.f32.vlgmr.msra.gmra.mxu0 %vm820_vm5, %v1030_v63 }
 0x2ea   : > { %9407 = vmatmul.mubr.msk.f32.vlgmr.msra.gmra.mxu1 %vm820_vm5, %v1380_v1  ;;  %9391 = vmatprep.mubr.msk.f32.mxu0 %vm10495_vm6, %v10494_v21 }
 0x2eb   : > { %9416 = vmatprep.mubr.msk.f32.mxu1 %vm10495_vm6, %v10494_v21 }
 0x2ed   : > { %v1730_v18 = vpop.f32.mrf.mxu0 }
 0x2ee   : > { %9390 = vmatpush3.xpose.msk.msra.mxu0 %vm820_vm5, %v1730_v18 }
 0x2ef   : > { %v9247_v19 = vpop.f32.mrf.mxu0  ;;  %9399 = vmatprep.subr.mxu0 %v10494_v21 }
 0x2f1   : > { %9392 = vmatmul.mubr.msk.f32.vlgmr.msra.gmra.mxu0 %vm820_vm5, %v1170_v3 }
 0x2f2   : > { %9401 = vmatprep.mubr.msk.f32.mxu0 %vm10495_vm6, %v10494_v21 }
 0x2f4   : > { %v2080_v20 = vpop.f32.mrf.mxu1 }
 0x2f5   : > { %v1870_v22 = vpop.f32.mrf.mxu0  ;;  %9415 = vmatpush3.msra.mxu1 %v2080_v20 }
 0x2f6   : > { %9400 = vmatpush3.xpose.msk.msra.mxu0 %vm820_vm5, %v1870_v22  ;;  %v9302_v23 = vpop.f32.mrf.mxu1  ;;  %9424 = vmatprep.subr.mxu1 %v10494_v21 }
 0x2f7   : > { %v9269_v24 = vpop.f32.mrf.mxu0  ;;  %9409 = vmatprep.subr.mxu0 %v10494_v21 }
 0x2f9   : > { %9402 = vmatmul.mubr.msk.f32.vlgmr.msra.gmra.mxu0 %vm820_vm5, %v1310_v6 }
 0x2fa   : > { %9411 = vmatprep.mubr.msk.f32.mxu0 %vm10495_vm6, %v10494_v21 }
 0x2fd   : > { %v2010_v25 = vpop.f32.mrf.mxu0 }
 0x2fe   : > { %9410 = vmatpush3.msra.mxu0 %v2010_v25 }
 0x2ff   : > { %v9291_v26 = vpop.f32.mrf.mxu0  ;;  %9419 = vmatprep.subr.mxu0 %v10494_v21 }
 0x301   : > { %v11164_v27 = vpop.f32.mrf.mxu1 }
 0x303   : > { %v9324_v29 = vpop.f32.mrf.mxu1 }
 0x307   : > { %v11166_v30 = vpop.f32.mrf.mxu0 }
 0x309   : > { %v9313_v31 = vpop.f32.mrf.mxu0 }
 0x30b   : > { %v11168_v32 = vpop.f32.mrf.mxu1 }
 0x30d   : > { %v9346_v33 = vpop.f32.mrf.mxu1 }
 0x311   : > { %v11170_v34 = vpop.f32.mrf.mxu0 }
 0x313   : > { %v9335_v35 = vpop.f32.mrf.mxu0 }
 0x314   : > { %v11172_v36 = vpop.f32.mrf.mxu1 }
 0x316   : > { %v9368_v37 = vpop.f32.mrf.mxu1 }
 0x31a   : > { %v11174_v38 = vpop.f32.mrf.mxu0 }
 0x31c   : > { %v9357_v39 = vpop.f32.mrf.mxu0 }
 0x396   : > { %v2804_v40 = vpop.f32.mrf.mxu1 }
 0x397   : > { %v3122_v55 = vsel %vm3112_vm7, %v2804_v40, -inf }
 0x398   : > { %v9388_v41 = vpop.f32.mrf.mxu1 }
 0x39f   : > { %v2576_v42 = vpop.f32.mrf.mxu0 }
 0x3a0   : > { %v2956_v43 = vpop.f32.mrf.mxu1  ;;  %v3113_v44 = vsel %vm3112_vm7, %v2576_v42, -inf }
 0x3a1   : > { %3114 = vmax.xlane.f32.xlu0 %v3113_v44  ;;  %v9373_v45 = vpop.f32.mrf.mxu0  ;;  %v3128_v57 = vsel %vm3112_vm7, %v2956_v43, -inf }
 0x3a2   : > { %v9398_v46 = vpop.f32.mrf.mxu1 }
 0x3a3   : > { %v2652_v47 = vpop.f32.mrf.mxu0 }
 0x3a4   : > { %v3116_v48 = vsel %vm3112_vm7, %v2652_v47, -inf }
 0x3a5   : > { %3117 = vmax.xlane.f32.xlu0 %v3116_v48  ;;  %v9378_v49 = vpop.f32.mrf.mxu0 }
 0x3a9   : > { %v2728_v50 = vpop.f32.mrf.mxu0 }
 0x3aa   : > { %v3108_v51 = vpop.f32.mrf.mxu1  ;;  %v3119_v52 = vsel %vm3112_vm7, %v2728_v50, -inf }
 0x3ab   : > { %3120 = vmax.xlane.f32.xlu1 %v3119_v52  ;;  %v9383_v53 = vpop.f32.mrf.mxu0  ;;  %v3134_v60 = vsel %vm3112_vm7, %v3108_v51, -inf }
 0x3ac   : > { %v9408_v54 = vpop.f32.mrf.mxu1 }
 0x3af   : > { %3123 = vmax.xlane.f32.xlu1 %v3122_v55 }
 0x3b1   : > { %v2880_v56 = vpop.f32.mrf.mxu0 }
 0x3b2   : > { %v3125_v58 = vsel %vm3112_vm7, %v2880_v56, -inf }
 0x3b3   : > { %3129 = vmax.xlane.f32.xlu1 %v3128_v57  ;;  %3126 = vmax.xlane.f32.xlu0 %v3125_v58  ;;  %v9393_v59 = vpop.f32.mrf.mxu0 }
 0x3b7   : > { %3135 = vmax.xlane.f32.xlu1 %v3134_v60 }
 0x3b9   : > { %v3032_v61 = vpop.f32.mrf.mxu0 }
 0x3ba   : > { %v3131_v62 = vsel %vm3112_vm7, %v3032_v61, -inf }
 0x3bb   : > { %3132 = vmax.xlane.f32.xlu0 %v3131_v62  ;;  %v9403_v63 = vpop.f32.mrf.mxu0 }
 0x42a   : > { %v3115_v0 = vpop.xlane.xlu0 %3114 }
 0x42b   : > { %v3137_v1 = vsub.f32 %v2576_v42, %v3115_v0 }
 0x42d   : > { %v3145_v2 = vmul.f32 1.442695, %v3137_v1  ;;  %v788_v1 = vld [vmem:[%s10775_s3 + $0x38] sm:$0xff] }
 0x42e   : > { %v3118_v3 = vpop.xlane.xlu0 %3117 }
 0x42f   : > { %10096 = vpow2.f32 %v3145_v2  ;;  %v3138_v4 = vsub.f32 %v2652_v47, %v3118_v3  ;;  %v787_v2 = vld [vmem:[%s10775_s3 + $0x30] sm:$0xff]  ;;  %v784_v3 = vld [vmem:[%s10775_s3 + $0x18] sm:$0xff] }
 0x431   : > { %v3147_v28 = vmul.f32 1.442695, %v3138_v4  ;;  %v783_v4 = vld [vmem:[%s10775_s3 + $0x10] sm:$0xff] }
 0x433   : > { %10098 = vpow2.f32 %v3147_v28  ;;  %v782_v28 = vld [vmem:[%s10775_s3 + $0x8] sm:$0xff] }
 0x434   : > { %v3121_v5 = vpop.xlane.xlu1 %3120 }
 0x435   : > { %v3139_v6 = vsub.f32 %v2728_v50, %v3121_v5  ;;  %v781_v5 = vld [vmem:[%s10775_s3] sm:$0xff] }
 0x437   : > { %v3149_v7 = vmul.f32 1.442695, %v3139_v6  ;;  %v786_v6 = vld [vmem:[%s10775_s3 + $0x28] sm:$0xff] }
 0x438   : > { %v3124_v8 = vpop.xlane.xlu1 %3123 }
 0x439   : > { %10100 = vpow2.f32 %v3149_v7  ;;  %v3140_v9 = vsub.f32 %v2804_v40, %v3124_v8  ;;  %v785_v7 = vld [vmem:[%s10775_s3 + $0x20] sm:$0xff]  ;;  %v792_v8 = vld [vmem:[%s10775_s3 + $0x58] sm:$0xff] }
 0x43b   : > { %v3151_v10 = vmul.f32 1.442695, %v3140_v9 }
 0x43c   : > { %v10097_v11 = vpop.eup %10096  ;;  %v3130_v12 = vpop.xlane.xlu1 %3129 }
 0x43d   : > { %v3127_v13 = vpop.xlane.xlu0 %3126  ;;  %10102 = vpow2.f32 %v3151_v10  ;;  %v3142_v14 = vsub.f32 %v2956_v43, %v3130_v12  ;;  %v3161_v16 = vsel %vm3112_vm7, %v10097_v11, 0.0  ;;  %v791_v10 = vld [vmem:[%s10775_s3 + $0x50] sm:$0xff]  ;;  %v790_v12 = vld [vmem:[%s10775_s3 + $0x48] sm:$0xff] }
 0x43e   : > { %v3141_v15 = vsub.f32 %v2880_v56, %v3127_v13  ;;  %3162 = vadd.xlane.f32.xlu0 %v3161_v16  ;;  %v796_v13 = vld [vmem:[%s10775_s3 + $0x78] sm:$0xff]  ;;  %v795_v16 = vld [vmem:[%s10775_s3 + $0x70] sm:$0xff] }
 0x43f   : > { %v3155_v17 = vmul.f32 1.442695, %v3142_v14 }
 0x440   : > { %v3153_v18 = vmul.f32 1.442695, %v3141_v15  ;;  %v10099_v19 = vpop.eup %10098  ;;  %v3136_v20 = vpop.xlane.xlu1 %3135  ;;  %v789_v15 = vld [vmem:[%s10775_s3 + $0x40] sm:$0xff] }
 0x441   : > { %10104 = vpow2.f32 %v3155_v17  ;;  %v3144_v22 = vsub.f32 %v3108_v51, %v3136_v20  ;;  %v3164_v23 = vsel %vm3112_vm7, %v10099_v19, 0.0  ;;  %v793_v20 = vld [vmem:[%s10775_s3 + $0x60] sm:$0xff] }
 0x442   : > { %10106 = vpow2.f32 %v3153_v18  ;;  %3165 = vadd.xlane.f32.xlu1 %v3164_v23  ;;  %v794_v18 = vld [vmem:[%s10775_s3 + $0x68] sm:$0xff]  ;;  %v799_v23 = vld [vmem:[%s10775_s3 + $0x90] sm:$0xff] }
 0x443   : > { %v3159_v24 = vmul.f32 1.442695, %v3144_v22 }
 0x444   : > { %v3133_v25 = vpop.xlane.xlu0 %3132 }
 0x445   : > { %10108 = vpow2.f32 %v3159_v24  ;;  %v3143_v26 = vsub.f32 %v3032_v61, %v3133_v25  ;;  %v798_v25 = vld [vmem:[%s10775_s3 + $0x88] sm:$0xff] }
 0x446   : > { %v10101_v29 = vpop.eup %10100 }
 0x447   : > { %v3157_v31 = vmul.f32 1.442695, %v3143_v26  ;;  %v3167_v33 = vsel %vm3112_vm7, %v10101_v29, 0.0  ;;  %v804_v26 = vld [vmem:[%s10775_s3 + $0xb8] sm:$0xff] }
 0x448   : > { %3168 = vadd.xlane.f32.xlu0 %v3167_v33  ;;  %v803_v33 = vld [vmem:[%s10775_s3 + $0xb0] sm:$0xff] }
 0x449   : > { %10110 = vpow2.f32 %v3157_v31  ;;  %v797_v31 = vld [vmem:[%s10775_s3 + $0x80] sm:$0xff] }
 0x44a   : > { %v10103_v35 = vpop.eup %10102 }
 0x44b   : > { %v3170_v37 = vsel %vm3112_vm7, %v10103_v35, 0.0 }
 0x44c   : > { %3171 = vadd.xlane.f32.xlu1 %v3170_v37  ;;  %v802_v37 = vld [vmem:[%s10775_s3 + $0xa8] sm:$0xff] }
 0x44e   : > { %v10105_v39 = vpop.eup %10104 }
 0x44f   : > { %v10107_v40 = vpop.eup %10106  ;;  %v3176_v41 = vsel %vm3112_vm7, %v10105_v39, 0.0 }
 0x450   : > { %3177 = vadd.xlane.f32.xlu1 %v3176_v41  ;;  %v3173_v42 = vsel %vm3112_vm7, %v10107_v40, 0.0 }
 0x451   : > { %3174 = vadd.xlane.f32.xlu0 %v3173_v42  ;;  %v801_v42 = vld [vmem:[%s10775_s3 + $0xa0] sm:$0xff] }
 0x452   : > { %v10109_v43 = vpop.eup %10108 }
 0x453   : > { %v3182_v44 = vsel %vm3112_vm7, %v10109_v43, 0.0 }
 0x454   : > { %3183 = vadd.xlane.f32.xlu1 %v3182_v44  ;;  %v807_v44 = vld [vmem:[%s10775_s3 + $0xd0] sm:$0xff] }
 0x456   : > { %v11191_v45 = vpop.eup %10110 }
 0x457   : > { %v3179_v46 = vsel %vm3112_vm7, %v11191_v45, 0.0 }
 0x458   : > { %3180 = vadd.xlane.f32.xlu0 %v3179_v46 }
 0x4c7   : > { %v3163_v47 = vpop.xlane.xlu0 %3162 }
 0x4c8   : > { %10112 = vrcp.f32 %v3163_v47  ;;  %v806_v47 = vld [vmem:[%s10775_s3 + $0xc8] sm:$0xff] }
 0x4cb   : > { %v3166_v48 = vpop.xlane.xlu1 %3165 }
 0x4cc   : > { %10114 = vrcp.f32 %v3166_v48  ;;  %v812_v48 = vld [vmem:[%s10775_s3 + $0xf8] sm:$0xff] }
 0x4d1   : > { %v3169_v49 = vpop.xlane.xlu0 %3168 }
 0x4d2   : > { %10116 = vrcp.f32 %v3169_v49 }
 0x4d5   : > { %v10113_v50 = vpop.eup %10112  ;;  %v3172_v51 = vpop.xlane.xlu1 %3171 }
 0x4d6   : > { %10118 = vrcp.f32 %v3172_v51  ;;  %v3193_v52 = vmul.f32 %v10113_v50, %v10097_v11  ;;  %v805_v50 = vld [vmem:[%s10775_s3 + $0xc0] sm:$0xff]  ;;  %v811_v51 = vld [vmem:[%s10775_s3 + $0xf0] sm:$0xff] }
 0x4d8   : > { %9412 = vmatmul.mubr.msk.f32.vlgmr.msra.gmra.mxu0 %vm3112_vm7, %v3193_v52 }
 0x4d9   : > { %v10115_v53 = vpop.eup %10114  ;;  %v3178_v54 = vpop.xlane.xlu1 %3177  ;;  %9420 = vmatpush3.msra.mxu0 %v11166_v30  ;;  %9421 = vmatprep.mubr.msk.f32.mxu0 %vm10495_vm6, %v10494_v21 }
 0x4da   : > { %10120 = vrcp.f32 %v3178_v54  ;;  %v3175_v55 = vpop.xlane.xlu0 %3174  ;;  %v3194_v56 = vmul.f32 %v10115_v53, %v10099_v19  ;;  %9429 = vmatprep.subr.mxu0 %v10494_v21  ;;  %v800_v19 = vld [vmem:[%s10775_s3 + $0x98] sm:$0xff]  ;;  %v810_v53 = vld [vmem:[%s10775_s3 + $0xe8] sm:$0xff] }
 0x4db   : > { %10122 = vrcp.f32 %v3175_v55  ;;  %v809_v55 = vld [vmem:[%s10775_s3 + $0xe0] sm:$0xff] }
 0x4dc   : > { %9417 = vmatmul.mubr.msk.f32.vlgmr.msra.gmra.mxu1 %vm3112_vm7, %v3194_v56  ;;  %v10168_v56 = vld [vmem:[%s10760_s13 + $0x18] sm:$0xff] }
 0x4dd   : > { %v3184_v57 = vpop.xlane.xlu1 %3183  ;;  %9425 = vmatpush3.msra.mxu1 %v11164_v27  ;;  %9426 = vmatprep.mubr.msk.f32.mxu1 %vm10495_vm6, %v10494_v21 }
 0x4de   : > { %10124 = vrcp.f32 %v3184_v57  ;;  %9434 = vmatprep.subr.mxu1 %v10494_v21  ;;  %v10169_v57 = vld [vmem:[%s10760_s13 + $0x10] sm:$0xff] }
 0x4df   : > { %v10117_v30 = vpop.eup %10116 }
 0x4e0   : > { %v3195_v58 = vmul.f32 %v10117_v30, %v10101_v29  ;;  %v10170_v30 = vld [vmem:[%s10760_s13 + $0x8] sm:$0xff] }
 0x4e1   : > { %v3181_v59 = vpop.xlane.xlu0 %3180 }
 0x4e2   : > { %10126 = vrcp.f32 %v3181_v59  ;;  %9422 = vmatmul.mubr.msk.f32.vlgmr.msra.gmra.mxu0 %vm3112_vm7, %v3195_v58  ;;  %v10171_v58 = vld [vmem:[%s10760_s13 + $0x38] sm:$0xff]  ;;  %v10172_v59 = vld [vmem:[%s10760_s13] sm:$0xff] }
 0x4e3   : > { %v10119_v60 = vpop.eup %10118  ;;  %9430 = vmatpush3.msra.mxu0 %v11170_v34  ;;  %9431 = vmatprep.mubr.msk.f32.mxu0 %vm10495_vm6, %v10494_v21 }
 0x4e4   : > { %v3196_v61 = vmul.f32 %v10119_v60, %v10103_v35  ;;  %9439 = vmatprep.subr.mxu0 %v10494_v21  ;;  %v11325_v60 = vld [vmem:[#allocation2 + $0x8] sm:$0xff] }
 0x4e6   : > { %9427 = vmatmul.mubr.msk.f32.vlgmr.msra.gmra.mxu1 %vm3112_vm7, %v3196_v61  ;;  %v10173_v61 = vld [vmem:[%s10760_s13 + $0x30] sm:$0xff] }
 0x4e7   : > { %v10121_v27 = vpop.eup %10120  ;;  %9435 = vmatpush3.msra.mxu1 %v11168_v32  ;;  %9436 = vmatprep.mubr.msk.f32.mxu1 %vm10495_vm6, %v10494_v21 }
 0x4e8   : > { %v10123_v62 = vpop.eup %10122  ;;  %9444 = vmatprep.subr.mxu1 %v10494_v21  ;;  %v3198_v34 = vmul.f32 %v10121_v27, %v10105_v39  ;;  %v10174_v27 = vld [vmem:[%s10760_s13 + $0x28] sm:$0xff] }
 0x4e9   : > { %v3197_v63 = vmul.f32 %v10123_v62, %v10107_v40  ;;  %v808_v40 = vld [vmem:[%s10775_s3 + $0xd8] sm:$0xff] }
 0x4ea   : > { %9437 = vmatmul.mubr.msk.f32.vlgmr.msra.gmra.mxu1 %vm3112_vm7, %v3198_v34  ;;  %v10175_v62 = vld [vmem:[%s10760_s13 + $0x58] sm:$0xff]  ;;  %v10176_v34 = vld [vmem:[%s10760_s13 + $0x20] sm:$0xff] }
 0x4eb   : > { %v10125_v0 = vpop.eup %10124  ;;  %9432 = vmatmul.mubr.msk.f32.vlgmr.msra.gmra.mxu0 %vm3112_vm7, %v3197_v63  ;;  %9445 = vmatpush3.msra.mxu1 %v11172_v36  ;;  %v10177_v63 = vld [vmem:[%s10760_s13 + $0x50] sm:$0xff] }
 0x4ec   : > { %9440 = vmatpush3.msra.mxu0 %v11174_v38  ;;  %9446 = vmatprep.mubr.msk.f32.mxu1 %vm10495_vm6, %v10494_v21  ;;  %v3200_v32 = vmul.f32 %v10125_v0, %v10109_v43  ;;  %v10178_v0 = vld [vmem:[%s10760_s13 + $0x48] sm:$0xff] }
 0x4ed   : > { %9441 = vmatprep.mubr.msk.f32.mxu0 %vm10495_vm6, %v10494_v21  ;;  %9449 = vmatprep.subr.mxu0 %v10494_v21 }
 0x4ee   : > { %9447 = vmatmul.mubr.msk.f32.vlgmr.msra.gmra.mxu1 %vm3112_vm7, %v3200_v32  ;;  %9460 = vmatprep.subr.mxu1 %v10494_v21  ;;  %v10179_v32 = vld [vmem:[%s10760_s13 + $0x78] sm:$0xff] }
 0x4ef   : > { %v10127_v36 = vpop.eup %10126  ;;  %9461 = vmatpush3.msra.mxu1 %v788_v1  ;;  %9468 = vmatprep.mubr.msk.f32.mxu1 %vm10495_vm6, %v10494_v21  ;;  %v10180_v1 = vld [vmem:[%s10760_s13 + $0x40] sm:$0xff] }
 0x4f0   : > { %v3199_v38 = vmul.f32 %v10127_v36, %v11191_v45  ;;  %9462 = vmatprep.subr.mxu1 %v10494_v21  ;;  %v10182_v36 = vld [vmem:[%s10760_s13 + $0x68] sm:$0xff] }
 0x4f1   : > { %9463 = vmatpush3.msra.mxu1 %v787_v2  ;;  %v10181_v2 = vld [vmem:[%s10760_s13 + $0x70] sm:$0xff] }
 0x4f2   : > { %9442 = vmatmul.mubr.msk.f32.vlgmr.msra.gmra.mxu0 %vm3112_vm7, %v3199_v38  ;;  %9464 = vmatprep.subr.mxu1 %v10494_v21  ;;  %v10183_v38 = vld [vmem:[%s10760_s13 + $0x98] sm:$0xff] }
 0x4f3   : > { %9450 = vmatpush3.msra.mxu0 %v784_v3  ;;  %9457 = vmatprep.mubr.msk.f32.mxu0 %vm10495_vm6, %v10494_v21  ;;  %v10184_v3 = vld [vmem:[%s10760_s13 + $0x60] sm:$0xff] }
 0x4f4   : > { %9451 = vmatprep.subr.mxu0 %v10494_v21  ;;  %9465 = vmatpush3.msra.mxu1 %v786_v6  ;;  %v10188_v6 = vld [vmem:[%s10760_s13 + $0x80] sm:$0xff] }
 0x4f5   : > { %9452 = vmatpush3.msra.mxu0 %v783_v4  ;;  %9466 = vmatprep.subr.mxu1 %v10494_v21  ;;  %v10185_v4 = vld [vmem:[%s10760_s13 + $0x90] sm:$0xff] }
 0x4f6   : > { %9453 = vmatprep.subr.mxu0 %v10494_v21  ;;  %9467 = vmatpush3.msra.mxu1 %v785_v7  ;;  %v10189_v7 = vld [vmem:[%s10760_s13 + $0xb0] sm:$0xff] }
 0x4f7   : > { %9454 = vmatpush3.msra.mxu0 %v782_v28  ;;  %9482 = vmatprep.subr.mxu1 %v10494_v21  ;;  %v10186_v28 = vld [vmem:[%s10760_s13 + $0x88] sm:$0xff] }
 0x4f8   : > { %9455 = vmatprep.subr.mxu0 %v10494_v21 }
 0x4f9   : > { %9456 = vmatpush3.msra.mxu0 %v781_v5  ;;  %v10187_v5 = vld [vmem:[%s10760_s13 + $0xb8] sm:$0xff] }
 0x4fa   : > { %9471 = vmatprep.subr.mxu0 %v10494_v21 }
 0x598   : > { %v3270_v9 = vpop.f32.mrf.mxu0 }
 0x599   : > { %9458 = vmatmul.mubr.msk.f32.vlgmr.msra.gmra.mxu0 %vm820_vm5, %v3270_v9  ;;  %v10191_v9 = vld [vmem:[%s10760_s13 + $0xd8] sm:$0xff] }
 0x59a   : > { %9472 = vmatpush3.msra.mxu0 %v792_v8  ;;  %v9413_v11 = vpop.f32.mrf.mxu0  ;;  %9479 = vmatprep.mubr.msk.f32.mxu0 %vm10495_vm6, %v10494_v21  ;;  %v10190_v8 = vld [vmem:[%s10760_s13 + $0xa8] sm:$0xff] }
 0x59b   : > { %9473 = vmatprep.subr.mxu0 %v10494_v21  ;;  %v10193_v11 = vld [vmem:[%s10760_s13 + $0xd0] sm:$0xff] }
 0x59c   : > { %9474 = vmatpush3.msra.mxu0 %v791_v10  ;;  %v3343_v14 = vpop.f32.mrf.mxu1  ;;  %v10192_v10 = vld [vmem:[%s10760_s13 + $0xa0] sm:$0xff] }
 0x59d   : > { %9475 = vmatprep.subr.mxu0 %v10494_v21  ;;  %9469 = vmatmul.mubr.msk.f32.vlgmr.msra.gmra.mxu1 %vm820_vm5, %v3343_v14  ;;  %v10196_v14 = vld [vmem:[%s10760_s13 + $0xc0] sm:$0xff] }
 0x59e   : > { %9476 = vmatpush3.msra.mxu0 %v790_v12  ;;  %9483 = vmatpush3.msra.mxu1 %v796_v13  ;;  %v9418_v17 = vpop.f32.mrf.mxu1  ;;  %v10194_v12 = vld [vmem:[%s10760_s13 + $0xc8] sm:$0xff]  ;;  %v10195_v13 = vld [vmem:[%s10760_s13 + $0xf8] sm:$0xff] }
 0x59f   : > { %9477 = vmatprep.subr.mxu0 %v10494_v21  ;;  %9484 = vmatprep.subr.mxu1 %v10494_v21  ;;  %v10199_v17 = vld [vmem:[%s10767_s9 + $0x18] sm:$0xff] }
 0x5a0   : > { %9478 = vmatpush3.msra.mxu0 %v789_v15  ;;  %9485 = vmatpush3.msra.mxu1 %v795_v16  ;;  %v10197_v15 = vld [vmem:[%s10760_s13 + $0xf0] sm:$0xff]  ;;  %v10198_v16 = vld [vmem:[%s10760_s13 + $0xe8] sm:$0xff] }
 0x5a1   : > { %9486 = vmatprep.subr.mxu1 %v10494_v21  ;;  %9493 = vmatprep.subr.mxu0 %v10494_v21 }
 0x5a2   : > { %v3416_v22 = vpop.f32.mrf.mxu0  ;;  %9487 = vmatpush3.msra.mxu1 %v794_v18  ;;  %9490 = vmatprep.mubr.msk.f32.mxu1 %vm10495_vm6, %v10494_v21  ;;  %v10200_v18 = vld [vmem:[%s10760_s13 + $0xe0] sm:$0xff] }
 0x5a3   : > { %9480 = vmatmul.mubr.msk.f32.vlgmr.msra.gmra.mxu0 %vm820_vm5, %v3416_v22  ;;  %9488 = vmatprep.subr.mxu1 %v10494_v21  ;;  %v10203_v22 = vld [vmem:[%s10767_s9 + $0x38] sm:$0xff] }
 0x5a4   : > { %9494 = vmatpush3.msra.mxu0 %v800_v19  ;;  %v9423_v24 = vpop.f32.mrf.mxu0  ;;  %9489 = vmatpush3.msra.mxu1 %v793_v20  ;;  %v10201_v19 = vld [vmem:[%s10767_s9 + $0x10] sm:$0xff]  ;;  %v10202_v20 = vld [vmem:[%s10767_s9 + $0x8] sm:$0xff] }
 0x5a5   : > { %9495 = vmatprep.subr.mxu0 %v10494_v21  ;;  %9504 = vmatprep.subr.mxu1 %v10494_v21  ;;  %v10205_v24 = vld [vmem:[%s10767_s9 + $0x30] sm:$0xff] }
 0x5a6   : > { %9496 = vmatpush3.msra.mxu0 %v799_v23  ;;  %v3489_v29 = vpop.f32.mrf.mxu1  ;;  %9501 = vmatprep.mubr.msk.f32.mxu0 %vm10495_vm6, %v10494_v21  ;;  %v10204_v23 = vld [vmem:[%s10767_s9] sm:$0xff] }
 0x5a7   : > { %9497 = vmatprep.subr.mxu0 %v10494_v21  ;;  %9491 = vmatmul.mubr.msk.f32.vlgmr.msra.gmra.mxu1 %vm820_vm5, %v3489_v29  ;;  %v10208_v29 = vld [vmem:[%s10767_s9 + $0x20] sm:$0xff] }
 0x5a8   : > { %9498 = vmatpush3.msra.mxu0 %v798_v25  ;;  %9505 = vmatpush3.msra.mxu1 %v804_v26  ;;  %v9428_v35 = vpop.f32.mrf.mxu1  ;;  %v10206_v25 = vld [vmem:[%s10767_s9 + $0x28] sm:$0xff]  ;;  %v10207_v26 = vld [vmem:[%s10767_s9 + $0x58] sm:$0xff] }
 0x5a9   : > { %9499 = vmatprep.subr.mxu0 %v10494_v21  ;;  %9506 = vmatprep.subr.mxu1 %v10494_v21  ;;  %v10211_v35 = vld [vmem:[%s10767_s9 + $0x78] sm:$0xff] }
 0x5aa   : > { %9500 = vmatpush3.msra.mxu0 %v797_v31  ;;  %9507 = vmatpush3.msra.mxu1 %v803_v33  ;;  %v3635_v39 = vpop.f32.mrf.mxu1  ;;  %v10209_v31 = vld [vmem:[%s10767_s9 + $0x50] sm:$0xff]  ;;  %v10210_v33 = vld [vmem:[%s10767_s9 + $0x48] sm:$0xff] }
 0x5ab   : > { %v3562_v41 = vpop.f32.mrf.mxu0  ;;  %9508 = vmatprep.subr.mxu1 %v10494_v21  ;;  %9515 = vmatprep.subr.mxu0 %v10494_v21 }
 0x5ac   : > { %9502 = vmatmul.mubr.msk.f32.vlgmr.msra.gmra.mxu0 %vm820_vm5, %v3562_v41  ;;  %9509 = vmatpush3.msra.mxu1 %v802_v37  ;;  %v9438_v43 = vpop.f32.mrf.mxu1  ;;  %v10212_v37 = vld [vmem:[%s10767_s9 + $0x40] sm:$0xff]  ;;  %v10215_v41 = vld [vmem:[%s10767_s9 + $0x98] sm:$0xff] }
 0x5ad   : > { %9516 = vmatpush3.msra.mxu0 %v808_v40  ;;  %v9433_v45 = vpop.f32.mrf.mxu0  ;;  %9510 = vmatprep.subr.mxu1 %v10494_v21  ;;  %v10214_v40 = vld [vmem:[%s10767_s9 + $0x68] sm:$0xff]  ;;  %v10217_v43 = vld [vmem:[%s10767_s9 + $0x90] sm:$0xff] }
 0x5ae   : > { %9517 = vmatprep.subr.mxu0 %v10494_v21  ;;  %9511 = vmatpush3.msra.mxu1 %v801_v42  ;;  %v3781_v46 = vpop.f32.mrf.mxu1  ;;  %v10216_v42 = vld [vmem:[%s10767_s9 + $0x60] sm:$0xff]  ;;  %v10219_v45 = vld [vmem:[%s10767_s9 + $0xb8] sm:$0xff] }
 0x5af   : > { %9512 = vmatprep.mubr.msk.f32.mxu1 %vm10495_vm6, %v10494_v21  ;;  %9518 = vmatpush3.msra.mxu0 %v807_v44  ;;  %v10218_v44 = vld [vmem:[%s10767_s9 + $0x88] sm:$0xff] }
 0x5b0   : > { %9513 = vmatmul.mubr.msk.f32.vlgmr.msra.gmra.mxu1 %vm820_vm5, %v3635_v39  ;;  %9519 = vmatprep.subr.mxu0 %v10494_v21  ;;  %v9448_v49 = vpop.f32.mrf.mxu1  ;;  %v10213_v39 = vld [vmem:[%s10767_s9 + $0x70] sm:$0xff] }
 0x5b1   : > { %9526 = vmatprep.subr.mxu1 %v10494_v21  ;;  %9520 = vmatpush3.msra.mxu0 %v806_v47  ;;  %v10221_v47 = vld [vmem:[%s10767_s9 + $0xb0] sm:$0xff]  ;;  %v10223_v49 = vld [vmem:[%s10767_s9 + $0xd8] sm:$0xff] }
 0x5b2   : > { %9527 = vmatpush3.msra.mxu1 %v812_v48  ;;  %9521 = vmatprep.subr.mxu0 %v10494_v21  ;;  %v3708_v52 = vpop.f32.mrf.mxu0  ;;  %v10222_v48 = vld [vmem:[%s10767_s9 + $0xa8] sm:$0xff] }
 0x5b3   : > { %9528 = vmatprep.subr.mxu1 %v10494_v21  ;;  %9522 = vmatpush3.msra.mxu0 %v805_v50  ;;  %v10224_v50 = vld [vmem:[%s10767_s9 + $0xa0] sm:$0xff] }
 0x5b4   : > { %9529 = vmatpush3.msra.mxu1 %v811_v51  ;;  %9523 = vmatprep.mubr.msk.f32.mxu0 %vm10495_vm6, %v10494_v21  ;;  %v9443_v54 = vpop.f32.mrf.mxu0  ;;  %v10225_v51 = vld [vmem:[%s10767_s9 + $0xd0] sm:$0xff] }
 0x5b5   : > { %9530 = vmatprep.subr.mxu1 %v10494_v21  ;;  %9537 = vmatprep.subr.mxu0 %v10494_v21  ;;  %v10228_v54 = vld [vmem:[%s10767_s9 + $0xc0] sm:$0xff] }
 0x5b6   : > { %9524 = vmatmul.mubr.msk.f32.vlgmr.msra.gmra.mxu0 %vm820_vm5, %v3708_v52  ;;  %9531 = vmatpush3.msra.mxu1 %v810_v53  ;;  %v10226_v52 = vld [vmem:[%s10767_s9 + $0xc8] sm:$0xff]  ;;  %v10227_v53 = vld [vmem:[%s10767_s9 + $0xf8] sm:$0xff] }
 0x5b7   : > { %9538 = vmatpush3.msra.mxu0 %v10168_v56  ;;  %9532 = vmatprep.subr.mxu1 %v10494_v21  ;;  %v10230_v56 = vld [vmem:[%s10767_s9 + $0xe8] sm:$0xff] }
 0x5b8   : > { %9539 = vmatprep.subr.mxu0 %v10494_v21  ;;  %9533 = vmatpush3.msra.mxu1 %v809_v55  ;;  %v10229_v55 = vld [vmem:[%s10767_s9 + $0xf0] sm:$0xff] }
 0x5b9   : > { %9534 = vmatprep.mubr.msk.f32.mxu1 %vm10495_vm6, %v10494_v21  ;;  %9540 = vmatpush3.msra.mxu0 %v10169_v57  ;;  %v10231_v57 = vld [vmem:[%s10767_s9 + $0xe0] sm:$0xff] }
 0x5ba   : > { %9535 = vmatmul.mubr.msk.f32.vlgmr.msra.gmra.mxu1 %vm820_vm5, %v3781_v46  ;;  %9541 = vmatprep.subr.mxu0 %v10494_v21  ;;  %v10220_v46 = vld [vmem:[%s10767_s9 + $0x80] sm:$0xff] }
 0x5bb   : > { %9548 = vmatprep.subr.mxu1 %v10494_v21  ;;  %9542 = vmatpush3.msra.mxu0 %v10170_v30  ;;  %v10232_v30 = vld [vmem:[%s10773_s22 + $0x18] sm:$0xff] }
 0x5bc   : > { %9549 = vmatpush3.msra.mxu1 %v10171_v58  ;;  %9543 = vmatprep.subr.mxu0 %v10494_v21  ;;  %v10233_v58 = vld [vmem:[%s10773_s22 + $0x10] sm:$0xff] }
 0x5bd   : > { %9550 = vmatprep.subr.mxu1 %v10494_v21  ;;  %9544 = vmatpush3.msra.mxu0 %v10172_v59  ;;  %v10234_v59 = vld [vmem:[%s10773_s22 + $0x38] sm:$0xff] }
 0x5be   : > { %9551 = vmatpush3.msra.mxu1 %v10173_v61  ;;  %9545 = vmatprep.mubr.msk.f32.mxu0 %vm10495_vm6, %v10494_v21  ;;  %v10235_v61 = vld [vmem:[%s10773_s22 + $0x8] sm:$0xff] }
 0x5bf   : > { %9552 = vmatprep.subr.mxu1 %v10494_v21  ;;  %9559 = vmatprep.subr.mxu0 %v10494_v21 }
 0x5c0   : > { %9546 = vmatmul.mubr.msk.f32.vlgmr.msra.gmra.mxu0 %vm820_vm5, %v11325_v60  ;;  %9553 = vmatpush3.msra.mxu1 %v10174_v27  ;;  %v10236_v27 = vld [vmem:[%s10773_s22 + $0x30] sm:$0xff] }
 0x5c1   : > { %9560 = vmatpush3.msra.mxu0 %v10175_v62  ;;  %9554 = vmatprep.subr.mxu1 %v10494_v21  ;;  %v10237_v62 = vld [vmem:[%s10773_s22] sm:$0xff] }
 0x5c2   : > { %9561 = vmatprep.subr.mxu0 %v10494_v21  ;;  %9555 = vmatpush3.msra.mxu1 %v10176_v34  ;;  %v10238_v34 = vld [vmem:[%s10773_s22 + $0x28] sm:$0xff] }
 0x5c3   : > { %9556 = vmatprep.mubr.msk.f32.mxu1 %vm10495_vm6, %v10494_v21  ;;  %9562 = vmatpush3.msra.mxu0 %v10177_v63  ;;  %v10239_v63 = vld [vmem:[%s10773_s22 + $0x58] sm:$0xff] }
 0x5c4   : > { %9557 = vmatmul.mubr.msk.f32.vlgmr.msra.gmra.mxu1 %vm820_vm5, %v11325_v60  ;;  %9563 = vmatprep.subr.mxu0 %v10494_v21 }
 0x5c5   : > { %9570 = vmatprep.subr.mxu1 %v10494_v21  ;;  %9564 = vmatpush3.msra.mxu0 %v10178_v0  ;;  %v10240_v0 = vld [vmem:[%s10773_s22 + $0x20] sm:$0xff] }
 0x5c6   : > { %9571 = vmatpush3.msra.mxu1 %v10179_v32  ;;  %9565 = vmatprep.subr.mxu0 %v10494_v21  ;;  %v10241_v32 = vld [vmem:[%s10773_s22 + $0x50] sm:$0xff] }
 0x5c7   : > { %9572 = vmatprep.subr.mxu1 %v10494_v21  ;;  %9566 = vmatpush3.msra.mxu0 %v10180_v1  ;;  %v10242_v1 = vld [vmem:[%s10773_s22 + $0x48] sm:$0xff] }
 0x5c8   : > { %9573 = vmatpush3.msra.mxu1 %v10181_v2  ;;  %9567 = vmatprep.mubr.msk.f32.mxu0 %vm10495_vm6, %v10494_v21  ;;  %v10243_v2 = vld [vmem:[%s10773_s22 + $0x78] sm:$0xff] }
 0x5c9   : > { %9574 = vmatprep.subr.mxu1 %v10494_v21  ;;  %9581 = vmatprep.subr.mxu0 %v10494_v21 }
 0x5ca   : > { %9568 = vmatmul.mubr.msk.f32.vlgmr.msra.gmra.mxu0 %vm820_vm5, %v11325_v60  ;;  %9575 = vmatpush3.msra.mxu1 %v10182_v36  ;;  %v10244_v36 = vld [vmem:[%s10773_s22 + $0x40] sm:$0xff] }
 0x5cb   : > { %9582 = vmatpush3.msra.mxu0 %v10183_v38  ;;  %9576 = vmatprep.subr.mxu1 %v10494_v21  ;;  %v10245_v38 = vld [vmem:[%s10773_s22 + $0x70] sm:$0xff] }
 0x5cc   : > { %9583 = vmatprep.subr.mxu0 %v10494_v21  ;;  %9577 = vmatpush3.msra.mxu1 %v10184_v3  ;;  %v10246_v3 = vld [vmem:[%s10773_s22 + $0x68] sm:$0xff] }
 0x5cd   : > { %9578 = vmatprep.mubr.msk.f32.mxu1 %vm10495_vm6, %v10494_v21  ;;  %9584 = vmatpush3.msra.mxu0 %v10185_v4  ;;  %v10247_v4 = vld [vmem:[%s10773_s22 + $0x98] sm:$0xff] }
 0x5ce   : > { %9579 = vmatmul.mubr.msk.f32.vlgmr.msra.gmra.mxu1 %vm820_vm5, %v11325_v60  ;;  %9585 = vmatprep.subr.mxu0 %v10494_v21 }
 0x5cf   : > { %9592 = vmatprep.subr.mxu1 %v10494_v21  ;;  %9586 = vmatpush3.msra.mxu0 %v10186_v28  ;;  %v10248_v28 = vld [vmem:[%s10773_s22 + $0x60] sm:$0xff] }
 0x5d0   : > { %9593 = vmatpush3.msra.mxu1 %v10187_v5  ;;  %9587 = vmatprep.subr.mxu0 %v10494_v21  ;;  %v10249_v5 = vld [vmem:[%s10773_s22 + $0x90] sm:$0xff] }
 0x5d1   : > { %9594 = vmatprep.subr.mxu1 %v10494_v21  ;;  %9588 = vmatpush3.msra.mxu0 %v10188_v6  ;;  %v10250_v6 = vld [vmem:[%s10773_s22 + $0x88] sm:$0xff] }
 0x5d2   : > { %9595 = vmatpush3.msra.mxu1 %v10189_v7  ;;  %9589 = vmatprep.mubr.msk.f32.mxu0 %vm10495_vm6, %v10494_v21  ;;  %v10251_v7 = vld [vmem:[%s10773_s22 + $0xb8] sm:$0xff] }
 0x5d3   : > { %9596 = vmatprep.subr.mxu1 %v10494_v21  ;;  %9603 = vmatprep.subr.mxu0 %v10494_v21 }
 0x5d4   : > { %9590 = vmatmul.mubr.msk.f32.vlgmr.msra.gmra.mxu0 %vm820_vm5, %v11325_v60  ;;  %9597 = vmatpush3.msra.mxu1 %v10190_v8  ;;  %v10252_v8 = vld [vmem:[%s10773_s22 + $0x80] sm:$0xff] }
 0x5d5   : > { %9604 = vmatpush3.msra.mxu0 %v10191_v9  ;;  %9598 = vmatprep.subr.mxu1 %v10494_v21  ;;  %v10253_v9 = vld [vmem:[%s10773_s22 + $0xb0] sm:$0xff] }
 0x5d6   : > { %9605 = vmatprep.subr.mxu0 %v10494_v21  ;;  %9599 = vmatpush3.msra.mxu1 %v10192_v10  ;;  %v10254_v10 = vld [vmem:[%s10773_s22 + $0xa8] sm:$0xff] }
 0x5d7   : > { %9600 = vmatprep.mubr.msk.f32.mxu1 %vm10495_vm6, %v10494_v21  ;;  %9606 = vmatpush3.msra.mxu0 %v10193_v11  ;;  %v10255_v11 = vld [vmem:[%s10773_s22 + $0xd8] sm:$0xff] }
 0x5d8   : > { %9601 = vmatmul.mubr.msk.f32.vlgmr.msra.gmra.mxu1 %vm820_vm5, %v11325_v60  ;;  %9607 = vmatprep.subr.mxu0 %v10494_v21 }
 0x5d9   : > { %9614 = vmatprep.subr.mxu1 %v10494_v21  ;;  %9608 = vmatpush3.msra.mxu0 %v10194_v12  ;;  %v10256_v12 = vld [vmem:[%s10773_s22 + $0xa0] sm:$0xff] }
 0x5da   : > { %9615 = vmatpush3.msra.mxu1 %v10195_v13  ;;  %9609 = vmatprep.subr.mxu0 %v10494_v21  ;;  %v10257_v13 = vld [vmem:[%s10773_s22 + $0xd0] sm:$0xff] }
 0x5db   : > { %9616 = vmatprep.subr.mxu1 %v10494_v21  ;;  %9610 = vmatpush3.msra.mxu0 %v10196_v14  ;;  %v10258_v14 = vld [vmem:[%s10773_s22 + $0xc8] sm:$0xff] }
 0x5dc   : > { %9617 = vmatpush3.msra.mxu1 %v10197_v15  ;;  %9611 = vmatprep.mubr.msk.f32.mxu0 %vm10495_vm6, %v10494_v21  ;;  %v10259_v15 = vld [vmem:[%s10773_s22 + $0xf8] sm:$0xff] }
 0x5dd   : > { %9618 = vmatprep.subr.mxu1 %v10494_v21  ;;  %9625 = vmatprep.subr.mxu0 %v10494_v21 }
 0x5de   : > { %9612 = vmatmul.mubr.msk.f32.vlgmr.msra.gmra.mxu0 %vm820_vm5, %v11325_v60  ;;  %9619 = vmatpush3.msra.mxu1 %v10198_v16  ;;  %v10260_v16 = vld [vmem:[%s10773_s22 + $0xc0] sm:$0xff] }
 0x5df   : > { %9626 = vmatpush3.msra.mxu0 %v10199_v17  ;;  %9620 = vmatprep.subr.mxu1 %v10494_v21  ;;  %v10261_v17 = vld [vmem:[%s10773_s22 + $0xf0] sm:$0xff] }
 0x5e0   : > { %9627 = vmatprep.subr.mxu0 %v10494_v21  ;;  %9621 = vmatpush3.msra.mxu1 %v10200_v18  ;;  %v10262_v18 = vld [vmem:[%s10773_s22 + $0xe8] sm:$0xff] }
 0x5e1   : > { %9622 = vmatprep.mubr.msk.f32.mxu1 %vm10495_vm6, %v10494_v21  ;;  %9628 = vmatpush3.msra.mxu0 %v10201_v19  ;;  %v10263_v19 = vld [vmem:[%s10773_s22 + $0xe0] sm:$0xff]  ;;  %s11977_s22 = sld [smem:[#allocation21_spill]] (!%p8653_p11) }
 0x5e2   : > { %9623 = vmatmul.mubr.msk.f32.vlgmr.msra.gmra.mxu1 %vm820_vm5, %v11325_v60  ;;  %9629 = vmatprep.subr.mxu0 %v10494_v21 }
 0x5e3   : > { %9636 = vmatprep.subr.mxu1 %v10494_v21  ;;  %9630 = vmatpush3.msra.mxu0 %v10202_v20 }
 0x5e4   : > { %9637 = vmatpush3.msra.mxu1 %v10203_v22  ;;  %9631 = vmatprep.subr.mxu0 %v10494_v21 }
 0x5e5   : > { %9638 = vmatprep.subr.mxu1 %v10494_v21  ;;  %9632 = vmatpush3.msra.mxu0 %v10204_v23 }
 0x5e6   : > { %9633 = vmatprep.mubr.msk.f32.mxu0 %vm10495_vm6, %v10494_v21  ;;  %9639 = vmatpush3.msra.mxu1 %v10205_v24 }
 0x5e7   : > { %9634 = vmatmul.mubr.msk.f32.vlgmr.msra.gmra.mxu0 %vm820_vm5, %v11325_v60  ;;  %9640 = vmatprep.subr.mxu1 %v10494_v21 }
 0x5e8   : > { %9647 = vmatprep.subr.mxu0 %v10494_v21  ;;  %9641 = vmatpush3.msra.mxu1 %v10206_v25 }
 0x5e9   : > { %9648 = vmatpush3.msra.mxu0 %v10207_v26  ;;  %9642 = vmatprep.subr.mxu1 %v10494_v21 }
 0x5ea   : > { %9649 = vmatprep.subr.mxu0 %v10494_v21  ;;  %9643 = vmatpush3.msra.mxu1 %v10208_v29 }
 0x5eb   : > { %9644 = vmatprep.mubr.msk.f32.mxu1 %vm10495_vm6, %v10494_v21  ;;  %9650 = vmatpush3.msra.mxu0 %v10209_v31 }
 0x5ec   : > { %9645 = vmatmul.mubr.msk.f32.vlgmr.msra.gmra.mxu1 %vm820_vm5, %v11325_v60  ;;  %9651 = vmatprep.subr.mxu0 %v10494_v21 }
 0x5ed   : > { %9658 = vmatprep.subr.mxu1 %v10494_v21  ;;  %9652 = vmatpush3.msra.mxu0 %v10210_v33 }
 0x5ee   : > { %9659 = vmatpush3.msra.mxu1 %v10211_v35  ;;  %9653 = vmatprep.subr.mxu0 %v10494_v21 }
 0x5ef   : > { %9660 = vmatprep.subr.mxu1 %v10494_v21  ;;  %9654 = vmatpush3.msra.mxu0 %v10212_v37 }
 0x5f0   : > { %9655 = vmatprep.mubr.msk.f32.mxu0 %vm10495_vm6, %v10494_v21  ;;  %9661 = vmatpush3.msra.mxu1 %v10213_v39 }
 0x5f1   : > { %9656 = vmatmul.mubr.msk.f32.vlgmr.msra.gmra.mxu0 %vm820_vm5, %v11325_v60  ;;  %9662 = vmatprep.subr.mxu1 %v10494_v21 }
 0x5f2   : > { %9669 = vmatprep.subr.mxu0 %v10494_v21  ;;  %9663 = vmatpush3.msra.mxu1 %v10214_v40 }
 0x5f3   : > { %9670 = vmatpush3.msra.mxu0 %v10215_v41  ;;  %9664 = vmatprep.subr.mxu1 %v10494_v21 }
 0x5f4   : > { %9671 = vmatprep.subr.mxu0 %v10494_v21  ;;  %9665 = vmatpush3.msra.mxu1 %v10216_v42 }
 0x5f5   : > { %9666 = vmatprep.mubr.msk.f32.mxu1 %vm10495_vm6, %v10494_v21  ;;  %9672 = vmatpush3.msra.mxu0 %v10217_v43 }
 0x5f6   : > { %9667 = vmatmul.mubr.msk.f32.vlgmr.msra.gmra.mxu1 %vm820_vm5, %v11325_v60  ;;  %9673 = vmatprep.subr.mxu0 %v10494_v21 }
 0x5f7   : > { %9680 = vmatprep.subr.mxu1 %v10494_v21  ;;  %9674 = vmatpush3.msra.mxu0 %v10218_v44 }
 0x5f8   : > { %9681 = vmatpush3.msra.mxu1 %v10219_v45  ;;  %9675 = vmatprep.subr.mxu0 %v10494_v21 }
 0x5f9   : > { %9682 = vmatprep.subr.mxu1 %v10494_v21  ;;  %9676 = vmatpush3.msra.mxu0 %v10220_v46 }
 0x5fa   : > { %9677 = vmatprep.mubr.msk.f32.mxu0 %vm10495_vm6, %v10494_v21  ;;  %9683 = vmatpush3.msra.mxu1 %v10221_v47 }
 0x5fb   : > { %9678 = vmatmul.mubr.msk.f32.vlgmr.msra.gmra.mxu0 %vm820_vm5, %v11325_v60  ;;  %9684 = vmatprep.subr.mxu1 %v10494_v21 }
 0x5fc   : > { %9691 = vmatprep.subr.mxu0 %v10494_v21  ;;  %9685 = vmatpush3.msra.mxu1 %v10222_v48 }
 0x5fd   : > { %9692 = vmatpush3.msra.mxu0 %v10223_v49  ;;  %9686 = vmatprep.subr.mxu1 %v10494_v21 }
 0x5fe   : > { %9693 = vmatprep.subr.mxu0 %v10494_v21  ;;  %9687 = vmatpush3.msra.mxu1 %v10224_v50 }
 0x5ff   : > { %9688 = vmatprep.mubr.msk.f32.mxu1 %vm10495_vm6, %v10494_v21  ;;  %9694 = vmatpush3.msra.mxu0 %v10225_v51 }
 0x600   : > { %9689 = vmatmul.mubr.msk.f32.vlgmr.msra.gmra.mxu1 %vm820_vm5, %v11325_v60  ;;  %9695 = vmatprep.subr.mxu0 %v10494_v21 }
 0x601   : > { %9702 = vmatprep.subr.mxu1 %v10494_v21  ;;  %9696 = vmatpush3.msra.mxu0 %v10226_v52 }
 0x602   : > { %9703 = vmatpush3.msra.mxu1 %v10227_v53  ;;  %9697 = vmatprep.subr.mxu0 %v10494_v21 }
 0x603   : > { %9704 = vmatprep.subr.mxu1 %v10494_v21  ;;  %9698 = vmatpush3.msra.mxu0 %v10228_v54 }
 0x604   : > { %9699 = vmatprep.mubr.msk.f32.mxu0 %vm10495_vm6, %v10494_v21  ;;  %9705 = vmatpush3.msra.mxu1 %v10229_v55 }
 0x605   : > { %9700 = vmatmul.mubr.msk.f32.vlgmr.msra.gmra.mxu0 %vm820_vm5, %v11325_v60  ;;  %9706 = vmatprep.subr.mxu1 %v10494_v21 }
 0x606   : > { %9707 = vmatpush3.msra.mxu1 %v10230_v56  ;;  %9710 = vmatprep.mubr.msk.f32.mxu1 %vm10495_vm6, %v10494_v21 }
 0x607   : > { %9708 = vmatprep.subr.mxu1 %v10494_v21  ;;  %9713 = vmatprep.subr.mxu0 %v10494_v21 }
 0x608   : > { %9709 = vmatpush3.msra.mxu1 %v10231_v57  ;;  %9714 = vmatpush3.msra.mxu0 %v10232_v30 }
 0x609   : > { %9711 = vmatmul.mubr.msk.f32.vlgmr.msra.gmra.mxu1 %vm820_vm5, %v11325_v60  ;;  %9715 = vmatprep.subr.mxu0 %v10494_v21 }
 0x60a   : > { %9716 = vmatpush3.msra.mxu0 %v10233_v58  ;;  %9724 = vmatprep.subr.mxu1 %v10494_v21 }
 0x60b   : > { %9717 = vmatprep.subr.mxu0 %v10494_v21  ;;  %9725 = vmatpush3.msra.mxu1 %v10234_v59 }
 0x60c   : > { %9718 = vmatpush3.msra.mxu0 %v10235_v61  ;;  %9726 = vmatprep.subr.mxu1 %v10494_v21 }
 0x60d   : > { %9719 = vmatprep.subr.mxu0 %v10494_v21  ;;  %9727 = vmatpush3.msra.mxu1 %v10236_v27 }
 0x60e   : > { %9720 = vmatpush3.msra.mxu0 %v10237_v62  ;;  %9721 = vmatprep.mubr.msk.f32.mxu0 %vm10495_vm6, %v10494_v21 }
 0x60f   : > { %9728 = vmatprep.subr.mxu1 %v10494_v21  ;;  %9735 = vmatprep.subr.mxu0 %v10494_v21 }
 0x610   : > { %9722 = vmatmul.mubr.msk.f32.vlgmr.msra.gmra.mxu0 %vm820_vm5, %v11325_v60  ;;  %9729 = vmatpush3.msra.mxu1 %v10238_v34 }
 0x611   : > { %9736 = vmatpush3.msra.mxu0 %v10239_v63  ;;  %9730 = vmatprep.subr.mxu1 %v10494_v21 }
 0x612   : > { %9737 = vmatprep.subr.mxu0 %v10494_v21  ;;  %9731 = vmatpush3.msra.mxu1 %v10240_v0 }
 0x613   : > { %9732 = vmatprep.mubr.msk.f32.mxu1 %vm10495_vm6, %v10494_v21  ;;  %9738 = vmatpush3.msra.mxu0 %v10241_v32 }
 0x614   : > { %9733 = vmatmul.mubr.msk.f32.vlgmr.msra.gmra.mxu1 %vm820_vm5, %v11325_v60  ;;  %9739 = vmatprep.subr.mxu0 %v10494_v21 }
 0x615   : > { %9746 = vmatprep.subr.mxu1 %v10494_v21  ;;  %9740 = vmatpush3.msra.mxu0 %v10242_v1 }
 0x616   : > { %9747 = vmatpush3.msra.mxu1 %v10243_v2  ;;  %9741 = vmatprep.subr.mxu0 %v10494_v21 }
 0x617   : > { %9748 = vmatprep.subr.mxu1 %v10494_v21  ;;  %9742 = vmatpush3.msra.mxu0 %v10244_v36 }
 0x618   : > { %9749 = vmatpush3.msra.mxu1 %v10245_v38  ;;  %9743 = vmatprep.mubr.msk.f32.mxu0 %vm10495_vm6, %v10494_v21 }
 0x619   : > { %9750 = vmatprep.subr.mxu1 %v10494_v21  ;;  %9757 = vmatprep.subr.mxu0 %v10494_v21 }
 0x61a   : > { %9744 = vmatmul.mubr.msk.f32.vlgmr.msra.gmra.mxu0 %vm820_vm5, %v11325_v60  ;;  %9751 = vmatpush3.msra.mxu1 %v10246_v3 }
 0x61b   : > { %9758 = vmatpush3.msra.mxu0 %v10247_v4  ;;  %9752 = vmatprep.subr.mxu1 %v10494_v21 }
 0x61c   : > { %9759 = vmatprep.subr.mxu0 %v10494_v21  ;;  %9753 = vmatpush3.msra.mxu1 %v10248_v28 }
 0x61d   : > { %9754 = vmatprep.mubr.msk.f32.mxu1 %vm10495_vm6, %v10494_v21  ;;  %9760 = vmatpush3.msra.mxu0 %v10249_v5 }
 0x61e   : > { %9755 = vmatmul.mubr.msk.f32.vlgmr.msra.gmra.mxu1 %vm820_vm5, %v11325_v60  ;;  %9761 = vmatprep.subr.mxu0 %v10494_v21 }
 0x61f   : > { %9768 = vmatprep.subr.mxu1 %v10494_v21  ;;  %9762 = vmatpush3.msra.mxu0 %v10250_v6 }
 0x620   : > { %9769 = vmatpush3.msra.mxu1 %v10251_v7  ;;  %9763 = vmatprep.subr.mxu0 %v10494_v21 }
 0x621   : > { %9770 = vmatprep.subr.mxu1 %v10494_v21  ;;  %9764 = vmatpush3.msra.mxu0 %v10252_v8 }
 0x622   : > { %9771 = vmatpush3.msra.mxu1 %v10253_v9  ;;  %9765 = vmatprep.mubr.msk.f32.mxu0 %vm10495_vm6, %v10494_v21 }
 0x623   : > { %9772 = vmatprep.subr.mxu1 %v10494_v21  ;;  %9779 = vmatprep.subr.mxu0 %v10494_v21 }
 0x624   : > { %9766 = vmatmul.mubr.msk.f32.vlgmr.msra.gmra.mxu0 %vm820_vm5, %v11325_v60  ;;  %9773 = vmatpush3.msra.mxu1 %v10254_v10 }
 0x625   : > { %9780 = vmatpush3.msra.mxu0 %v10255_v11  ;;  %9774 = vmatprep.subr.mxu1 %v10494_v21 }
 0x626   : > { %9781 = vmatprep.subr.mxu0 %v10494_v21  ;;  %9775 = vmatpush3.msra.mxu1 %v10256_v12 }
 0x627   : > { %9776 = vmatprep.mubr.msk.f32.mxu1 %vm10495_vm6, %v10494_v21  ;;  %9782 = vmatpush3.msra.mxu0 %v10257_v13 }
 0x628   : > { %9777 = vmatmul.mubr.msk.f32.vlgmr.msra.gmra.mxu1 %vm820_vm5, %v11325_v60  ;;  %9783 = vmatprep.subr.mxu0 %v10494_v21 }
 0x629   : > { %9790 = vmatprep.subr.mxu1 %v10494_v21  ;;  %9784 = vmatpush3.msra.mxu0 %v10258_v14 }
 0x62a   : > { %9791 = vmatpush3.msra.mxu1 %v10259_v15  ;;  %9785 = vmatprep.subr.mxu0 %v10494_v21 }
 0x62b   : > { %9792 = vmatprep.subr.mxu1 %v10494_v21  ;;  %9786 = vmatpush3.msra.mxu0 %v10260_v16 }
 0x62c   : > { %9787 = vmatprep.mubr.msk.f32.mxu0 %vm10495_vm6, %v10494_v21  ;;  %9793 = vmatpush3.msra.mxu1 %v10261_v17 }
 0x62d   : > { %9788 = vmatmul.mubr.msk.f32.vlgmr.msra.gmra.mxu0 %vm820_vm5, %v11325_v60  ;;  %9794 = vmatprep.subr.mxu1 %v10494_v21 }
 0x62e   : > { %9801 = vmatprep.subr.mxu0 %v10494_v21  ;;  %9795 = vmatpush3.msra.mxu1 %v10262_v18 }
 0x62f   : > { %9796 = vmatprep.subr.mxu1 %v10494_v21  ;;  %9798 = vmatprep.mubr.msk.f32.mxu1 %vm10495_vm6, %v10494_v21 }
 0x630   : > { %9797 = vmatpush3.msra.mxu1 %v10263_v19  ;;  %9803 = vmatprep.mubr.msk.f32.mxu0 %vm10495_vm6, %v10494_v21 }
 0x631   : > { %9799 = vmatmul.mubr.msk.f32.vlgmr.msra.gmra.mxu1 %vm820_vm5, %v11325_v60  ;;  %9806 = vmatprep.subr.mxu1 %v10494_v21 }
 0x632   : > { %9808 = vmatprep.mubr.msk.f32.mxu1 %vm10495_vm6, %v10494_v21 }
 0x659   : > { %v3854_v20 = vpop.f32.mrf.mxu0 }
 0x65a   : > { %v4369_v24 = vsel %vm820_vm5, %v3854_v20, 0.0 }
 0x65b   : > { %v9459_v22 = vpop.f32.mrf.mxu0 }
 0x65d   : > { %v3927_v23 = vpop.f32.mrf.mxu1 }
 0x65e   : > { %v4370_v25 = vsel %vm820_vm5, %v3927_v23, 0.0 }
 0x65f   : > { %v4371_v26 = vadd.f32 %v4370_v25, %v4369_v24  ;;  %v9470_v29 = vpop.f32.mrf.mxu1 }
 0x663   : > { %v4000_v31 = vpop.f32.mrf.mxu0 }
 0x664   : > { %v4372_v33 = vsel %vm820_vm5, %v4000_v31, 0.0 }
 0x665   : > { %v4373_v35 = vadd.f32 %v4372_v33, %v4371_v26  ;;  %v9481_v37 = vpop.f32.mrf.mxu0 }
 0x667   : > { %v4073_v60 = vpop.f32.mrf.mxu1 }
 0x668   : > { %v4374_v39 = vsel %vm820_vm5, %v4073_v60, 0.0 }
 0x669   : > { %v4375_v40 = vadd.f32 %v4374_v39, %v4373_v35  ;;  %v9492_v41 = vpop.f32.mrf.mxu1 }
 0x66c   : > { %v4146_v42 = vpop.f32.mrf.mxu0 }
 0x66d   : > { %v4376_v43 = vsel %vm820_vm5, %v4146_v42, 0.0 }
 0x66e   : > { %v4377_v44 = vadd.f32 %v4376_v43, %v4375_v40  ;;  %v9503_v45 = vpop.f32.mrf.mxu0 }
 0x670   : > { %v4219_v46 = vpop.f32.mrf.mxu1 }
 0x671   : > { %v4378_v47 = vsel %vm820_vm5, %v4219_v46, 0.0 }
 0x672   : > { %v4379_v48 = vadd.f32 %v4378_v47, %v4377_v44  ;;  %v9514_v49 = vpop.f32.mrf.mxu1 }
 0x676   : > { %v4292_v50 = vpop.f32.mrf.mxu0 }
 0x677   : > { %v4380_v51 = vsel %vm820_vm5, %v4292_v50, 0.0 }
 0x678   : > { %v4381_v52 = vadd.f32 %v4380_v51, %v4379_v48  ;;  %v9525_v53 = vpop.f32.mrf.mxu0 }
 0x67a   : > { %v4365_v54 = vpop.f32.mrf.mxu1 }
 0x67b   : > { %v4382_v55 = vsel %vm820_vm5, %v4365_v54, 0.0 }
 0x67c   : > { %v11618_v56 = vadd.f32 %v4382_v55, %v4381_v52  ;;  %v9536_v57 = vpop.f32.mrf.mxu1 }
 0x680   : > { %v4453_v30 = vpop.f32.mrf.mxu0 }
 0x682   : > { %v9547_v58 = vpop.f32.mrf.mxu0 }
 0x684   : > { %v4523_v59 = vpop.f32.mrf.mxu1 }
 0x686   : > { %v9558_v61 = vpop.f32.mrf.mxu1 }
 0x68a   : > { %v4593_v27 = vpop.f32.mrf.mxu0 }
 0x68c   : > { %v9569_v62 = vpop.f32.mrf.mxu0 }
 0x68e   : > { %v4663_v34 = vpop.f32.mrf.mxu1 }
 0x690   : > { %v9580_v63 = vpop.f32.mrf.mxu1 }
 0x694   : > { %v4733_v0 = vpop.f32.mrf.mxu0 }
 0x696   : > { %v9591_v32 = vpop.f32.mrf.mxu0 }
 0x698   : > { %v4803_v1 = vpop.f32.mrf.mxu1 }
 0x69a   : > { %v9602_v2 = vpop.f32.mrf.mxu1 }
 0x69e   : > { %v4873_v36 = vpop.f32.mrf.mxu0 }
 0x6a0   : > { %v9613_v38 = vpop.f32.mrf.mxu0 }
 0x6a2   : > { %v4943_v3 = vpop.f32.mrf.mxu1 }
 0x6a4   : > { %v9624_v4 = vpop.f32.mrf.mxu1 }
 0x6a7   : > { %v5013_v28 = vpop.f32.mrf.mxu0 }
 0x6a8   : > { %9802 = vmatpush3.xpose.msk.msra.mxu0 %vm820_vm5, %v5013_v28 }
 0x6a9   : > { %v9635_v5 = vpop.f32.mrf.mxu0  ;;  %9811 = vmatprep.subr.mxu0 %v10494_v21 }
 0x6ab   : > { %9804 = vmatmul.mubr.msk.f32.vlgmr.msra.gmra.mxu0 %vm820_vm5, %v4453_v30 }
 0x6ac   : > { %v5083_v6 = vpop.f32.mrf.mxu1  ;;  %9813 = vmatprep.mubr.msk.f32.mxu0 %vm10495_vm6, %v10494_v21 }
 0x6ad   : > { %9807 = vmatpush3.xpose.msk.msra.mxu1 %vm820_vm5, %v5083_v6 }
 0x6ae   : > { %v9646_v7 = vpop.f32.mrf.mxu1  ;;  %9816 = vmatprep.subr.mxu1 %v10494_v21 }
 0x6b0   : > { %9809 = vmatmul.mubr.msk.f32.vlgmr.msra.gmra.mxu1 %vm820_vm5, %v4523_v59 }
 0x6b1   : > { %v5153_v8 = vpop.f32.mrf.mxu0  ;;  %9818 = vmatprep.mubr.msk.f32.mxu1 %vm10495_vm6, %v10494_v21 }
 0x6b2   : > { %9812 = vmatpush3.xpose.msk.msra.mxu0 %vm820_vm5, %v5153_v8 }
 0x6b3   : > { %v9657_v9 = vpop.f32.mrf.mxu0  ;;  %9821 = vmatprep.subr.mxu0 %v10494_v21 }
 0x6b5   : > { %9814 = vmatmul.mubr.msk.f32.vlgmr.msra.gmra.mxu0 %vm820_vm5, %v4593_v27 }
 0x6b6   : > { %v5223_v10 = vpop.f32.mrf.mxu1  ;;  %9823 = vmatprep.mubr.msk.f32.mxu0 %vm10495_vm6, %v10494_v21 }
 0x6b7   : > { %9817 = vmatpush3.xpose.msk.msra.mxu1 %vm820_vm5, %v5223_v10 }
 0x6b8   : > { %v9668_v11 = vpop.f32.mrf.mxu1  ;;  %9826 = vmatprep.subr.mxu1 %v10494_v21 }
 0x6ba   : > { %9819 = vmatmul.mubr.msk.f32.vlgmr.msra.gmra.mxu1 %vm820_vm5, %v4663_v34 }
 0x6bb   : > { %v5293_v12 = vpop.f32.mrf.mxu0  ;;  %9828 = vmatprep.mubr.msk.f32.mxu1 %vm10495_vm6, %v10494_v21 }
 0x6bc   : > { %9822 = vmatpush3.xpose.msk.msra.mxu0 %vm820_vm5, %v5293_v12 }
 0x6bd   : > { %v9679_v13 = vpop.f32.mrf.mxu0  ;;  %9831 = vmatprep.subr.mxu0 %v10494_v21 }
 0x6bf   : > { %9824 = vmatmul.mubr.msk.f32.vlgmr.msra.gmra.mxu0 %vm820_vm5, %v4733_v0 }
 0x6c0   : > { %v5363_v14 = vpop.f32.mrf.mxu1  ;;  %9833 = vmatprep.mubr.msk.f32.mxu0 %vm10495_vm6, %v10494_v21 }
 0x6c1   : > { %9827 = vmatpush3.xpose.msk.msra.mxu1 %vm820_vm5, %v5363_v14 }
 0x6c2   : > { %v9690_v15 = vpop.f32.mrf.mxu1  ;;  %9836 = vmatprep.subr.mxu1 %v10494_v21 }
 0x6c4   : > { %9829 = vmatmul.mubr.msk.f32.vlgmr.msra.gmra.mxu1 %vm820_vm5, %v4803_v1 }
 0x6c5   : > { %v5433_v16 = vpop.f32.mrf.mxu0  ;;  %9838 = vmatprep.mubr.msk.f32.mxu1 %vm10495_vm6, %v10494_v21 }
 0x6c6   : > { %9832 = vmatpush3.xpose.msk.msra.mxu0 %vm820_vm5, %v5433_v16 }
 0x6c7   : > { %v9701_v17 = vpop.f32.mrf.mxu0  ;;  %9841 = vmatprep.subr.mxu0 %v10494_v21 }
 0x6c9   : > { %v5503_v18 = vpop.f32.mrf.mxu1  ;;  %9834 = vmatmul.mubr.msk.f32.vlgmr.msra.gmra.mxu0 %vm820_vm5, %v4873_v36 }
 0x6ca   : > { %9837 = vmatpush3.xpose.msk.msra.mxu1 %vm820_vm5, %v5503_v18  ;;  %9843 = vmatprep.mubr.msk.f32.mxu0 %vm10495_vm6, %v10494_v21 }
 0x6cb   : > { %v9712_v19 = vpop.f32.mrf.mxu1  ;;  %9846 = vmatprep.subr.mxu1 %v10494_v21 }
 0x6cd   : > { %9839 = vmatmul.mubr.msk.f32.vlgmr.msra.gmra.mxu1 %vm820_vm5, %v4943_v3 }
 0x6ce   : > { %9848 = vmatprep.mubr.msk.f32.mxu1 %vm10495_vm6, %v10494_v21 }
 0x6d0   : > { %v5573_v20 = vpop.f32.mrf.mxu0 }
 0x6d1   : > { %9842 = vmatpush3.msra.mxu0 %v5573_v20 }
 0x6d2   : > { %v9723_v22 = vpop.f32.mrf.mxu0  ;;  %9851 = vmatprep.subr.mxu0 %v10494_v21 }
 0x6d4   : > { %v5643_v23 = vpop.f32.mrf.mxu1 }
 0x6d5   : > { %9847 = vmatpush3.msra.mxu1 %v5643_v23 }
 0x6d6   : > { %v9734_v24 = vpop.f32.mrf.mxu1  ;;  %9856 = vmatprep.subr.mxu1 %v10494_v21 }
 0x6da   : > { %v11662_v25 = vpop.f32.mrf.mxu0 }
 0x6dc   : > { %v9745_v26 = vpop.f32.mrf.mxu0 }
 0x6de   : > { %v11664_v29 = vpop.f32.mrf.mxu1 }
 0x6e0   : > { %v9756_v31 = vpop.f32.mrf.mxu1 }
 0x6e4   : > { %v11666_v33 = vpop.f32.mrf.mxu0 }
 0x6e6   : > { %v9767_v35 = vpop.f32.mrf.mxu0 }
 0x6e8   : > { %v11668_v37 = vpop.f32.mrf.mxu1 }
 0x6ea   : > { %v9778_v60 = vpop.f32.mrf.mxu1 }
 0x6ed   : > { %v11670_v39 = vpop.f32.mrf.mxu0 }
 0x6ef   : > { %v9789_v40 = vpop.f32.mrf.mxu0 }
 0x6f1   : > { %v11672_v41 = vpop.f32.mrf.mxu1 }
 0x6f3   : > { %v9800_v42 = vpop.f32.mrf.mxu1 }
 0x76b   : > { %v6139_v43 = vpop.f32.mrf.mxu0 }
 0x76c   : > { %v6675_v44 = vsel %vm3112_vm7, %v6139_v43, -inf }
 0x76d   : > { %6676 = vmax.xlane.f32.xlu0 %v6675_v44  ;;  %v9805_v45 = vpop.f32.mrf.mxu0 }
 0x76e   : > { %v11688_v45 = vld [vmem:[%s10796_s25] ss:$0 sm:$0xff] }
 0x770   : > { %v6215_v46 = vpop.f32.mrf.mxu1 }
 0x771   : > { %v6678_v47 = vsel %vm3112_vm7, %v6215_v46, -inf }
 0x772   : > { %6679 = vmax.xlane.f32.xlu1 %v6678_v47  ;;  %v9810_v48 = vpop.f32.mrf.mxu1 }
 0x773   : > { %v7950_v48 = vadd.f32 %v11688_v45, %v11618_v56 }
 0x775   : > { %v6291_v49 = vpop.f32.mrf.mxu0 }
 0x776   : > { %v6681_v50 = vsel %vm3112_vm7, %v6291_v49, -inf }
 0x777   : > { %6682 = vmax.xlane.f32.xlu0 %v6681_v50  ;;  %v9815_v51 = vpop.f32.mrf.mxu0 }
 0x778   : > { %v10264_v51 = vld [vmem:[#allocation2] sm:$0xff] }
 0x77a   : > { %v6367_v52 = vpop.f32.mrf.mxu1 }
 0x77b   : > { %v6684_v53 = vsel %vm3112_vm7, %v6367_v52, -inf }
 0x77c   : > { %6685 = vmax.xlane.f32.xlu1 %v6684_v53  ;;  %v9820_v54 = vpop.f32.mrf.mxu1 }
 0x77f   : > { %v6443_v55 = vpop.f32.mrf.mxu0 }
 0x780   : > { %v6687_v57 = vsel %vm3112_vm7, %v6443_v55, -inf }
 0x781   : > { %6688 = vmax.xlane.f32.xlu0 %v6687_v57  ;;  %v9825_v30 = vpop.f32.mrf.mxu0 }
 0x784   : > { %v6519_v58 = vpop.f32.mrf.mxu1 }
 0x785   : > { %v6690_v59 = vsel %vm3112_vm7, %v6519_v58, -inf }
 0x786   : > { %6691 = vmax.xlane.f32.xlu1 %v6690_v59  ;;  %v9830_v61 = vpop.f32.mrf.mxu1 }
 0x789   : > { %v6595_v27 = vpop.f32.mrf.mxu0 }
 0x78a   : > { %v6693_v62 = vsel %vm3112_vm7, %v6595_v27, -inf }
 0x78b   : > { %6694 = vmax.xlane.f32.xlu0 %v6693_v62  ;;  %v9835_v34 = vpop.f32.mrf.mxu0 }
 0x78d   : > { %v6671_v63 = vpop.f32.mrf.mxu1 }
 0x78e   : > { %v6696_v0 = vsel %vm3112_vm7, %v6671_v63, -inf }
 0x78f   : > { %6697 = vmax.xlane.f32.xlu1 %v6696_v0  ;;  %v9840_v32 = vpop.f32.mrf.mxu1 }
 0x7f6   : > { %v6677_v1 = vpop.xlane.xlu0 %6676 }
 0x7f7   : > { %v6699_v2 = vsub.f32 %v6139_v43, %v6677_v1 }
 0x7f9   : > { %v6707_v36 = vmul.f32 1.442695, %v6699_v2 }
 0x7fb   : > { %10128 = vpow2.f32 %v6707_v36  ;;  %v6680_v38 = vpop.xlane.xlu1 %6679 }
 0x7fc   : > { %v6700_v3 = vsub.f32 %v6215_v46, %v6680_v38 }
 0x7fe   : > { %v6709_v4 = vmul.f32 1.442695, %v6700_v3 }
 0x800   : > { %10130 = vpow2.f32 %v6709_v4  ;;  %v6683_v28 = vpop.xlane.xlu0 %6682 }
 0x801   : > { %v6701_v5 = vsub.f32 %v6291_v49, %v6683_v28 }
 0x803   : > { %v6711_v6 = vmul.f32 1.442695, %v6701_v5 }
 0x805   : > { %10132 = vpow2.f32 %v6711_v6  ;;  %v6686_v7 = vpop.xlane.xlu1 %6685 }
 0x806   : > { %v6702_v8 = vsub.f32 %v6367_v52, %v6686_v7  ;;  %v7952_v52 = vadd.f32 %v10264_v51, %v7950_v48  ;;  %v10281_v48 = vld [vmem:[%s10775_s3 + $0x60] sm:$0xff]  ;;  %v10283_v51 = vld [vmem:[%s10775_s3 + $0x88] sm:$0xff] }
 0x808   : > { %v10129_v9 = vpop.eup %10128  ;;  %v6713_v10 = vmul.f32 1.442695, %v6702_v8 }
 0x809   : > { %v6723_v11 = vsel %vm3112_vm7, %v10129_v9, 0.0 }
 0x80a   : > { %10134 = vpow2.f32 %v6713_v10  ;;  %v6689_v12 = vpop.xlane.xlu0 %6688  ;;  %6724 = vadd.xlane.f32.xlu0 %v6723_v11  ;;  %v10266_v10 = vld [vmem:[%s10775_s3 + $0x10] sm:$0xff]  ;;  %v10267_v11 = vld [vmem:[%s10775_s3 + $0x8] sm:$0xff] }
 0x80b   : > { %v6703_v13 = vsub.f32 %v6443_v55, %v6689_v12  ;;  %v7954_v55 = vsel %vm820_vm5, %v7952_v52, 0.0  ;;  %v10268_v12 = vld [vmem:[%s10775_s3 + $0x38] sm:$0xff] }
 0x80d   : > { %v10131_v14 = vpop.eup %10130  ;;  %v6715_v15 = vmul.f32 1.442695, %v6703_v13  ;;  %v10269_v13 = vld [vmem:[%s10775_s3] sm:$0xff] }
 0x80e   : > { %v6726_v16 = vsel %vm3112_vm7, %v10131_v14, 0.0 }
 0x80f   : > { %10136 = vpow2.f32 %v6715_v15  ;;  %v6692_v17 = vpop.xlane.xlu1 %6691  ;;  %6727 = vadd.xlane.f32.xlu1 %v6726_v16  ;;  %v10271_v15 = vld [vmem:[%s10775_s3 + $0x28] sm:$0xff]  ;;  %v10272_v16 = vld [vmem:[%s10775_s3 + $0x20] sm:$0xff] }
 0x810   : > { %v6704_v18 = vsub.f32 %v6519_v58, %v6692_v17 }
 0x812   : > { %v10133_v19 = vpop.eup %10132  ;;  %v6717_v20 = vmul.f32 1.442695, %v6704_v18 }
 0x813   : > { %v6729_v22 = vsel %vm3112_vm7, %v10133_v19, 0.0 }
 0x814   : > { %10138 = vpow2.f32 %v6717_v20  ;;  %v6695_v23 = vpop.xlane.xlu0 %6694  ;;  %6730 = vadd.xlane.f32.xlu0 %v6729_v22 }
 0x815   : > { %v6705_v24 = vsub.f32 %v6595_v27, %v6695_v23  ;;  %v10273_v23 = vld [vmem:[%s10775_s3 + $0x58] sm:$0xff] }
 0x817   : > { %v10135_v26 = vpop.eup %10134  ;;  %v6719_v31 = vmul.f32 1.442695, %v6705_v24  ;;  %v10274_v24 = vld [vmem:[%s10775_s3 + $0x50] sm:$0xff] }
 0x818   : > { %v6698_v35 = vpop.xlane.xlu1 %6697  ;;  %v6732_v60 = vsel %vm3112_vm7, %v10135_v26, 0.0 }
 0x819   : > { %10140 = vpow2.f32 %v6719_v31  ;;  %v6706_v40 = vsub.f32 %v6671_v63, %v6698_v35  ;;  %6733 = vadd.xlane.f32.xlu1 %v6732_v60  ;;  %v10275_v31 = vld [vmem:[%s10775_s3 + $0x48] sm:$0xff]  ;;  %v10276_v60 = vld [vmem:[%s10775_s3 + $0x78] sm:$0xff] }
 0x81b   : > { %v6721_v42 = vmul.f32 1.442695, %v6706_v40  ;;  %v10277_v40 = vld [vmem:[%s10775_s3 + $0x40] sm:$0xff] }
 0x81c   : > { %v10137_v43 = vpop.eup %10136 }
 0x81d   : > { %10142 = vpow2.f32 %v6721_v42  ;;  %v6735_v44 = vsel %vm3112_vm7, %v10137_v43, 0.0  ;;  %v10278_v42 = vld [vmem:[%s10775_s3 + $0x70] sm:$0xff] }
 0x81e   : > { %6736 = vadd.xlane.f32.xlu0 %v6735_v44  ;;  %v10279_v44 = vld [vmem:[%s10775_s3 + $0x68] sm:$0xff] }
 0x821   : > { %v11690_v46 = vpop.eup %10138 }
 0x822   : > { %v6738_v47 = vsel %vm3112_vm7, %v11690_v46, 0.0 }
 0x823   : > { %6739 = vadd.xlane.f32.xlu1 %v6738_v47  ;;  %v10280_v47 = vld [vmem:[%s10775_s3 + $0x98] sm:$0xff] }
 0x826   : > { %v11696_v49 = vpop.eup %10140 }
 0x827   : > { %v6741_v50 = vsel %vm3112_vm7, %v11696_v49, 0.0 }
 0x828   : > { %6742 = vadd.xlane.f32.xlu0 %v6741_v50 }
 0x82a   : > { %v11700_v53 = vpop.eup %10142 }
 0x82b   : > { %v6744_v54 = vsel %vm3112_vm7, %v11700_v53, 0.0 }
 0x82c   : > { %6745 = vadd.xlane.f32.xlu1 %v6744_v54  ;;  %7955 = vadd.xlane.f32.xlu0 %v7954_v55  ;;  %v10285_v54 = vld [vmem:[%s10775_s3 + $0x80] sm:$0xff] }
 0x893   : > { %v6725_v57 = vpop.xlane.xlu0 %6724 }
 0x894   : > { %10144 = vrcp.f32 %v6725_v57  ;;  %v10286_v57 = vld [vmem:[%s10775_s3 + $0xb0] sm:$0xff] }
 0x898   : > { %v6728_v56 = vpop.xlane.xlu1 %6727 }
 0x899   : > { %10146 = vrcp.f32 %v6728_v56 }
 0x89d   : > { %v6731_v30 = vpop.xlane.xlu0 %6730 }
 0x89e   : > { %10148 = vrcp.f32 %v6731_v30  ;;  %v10287_v30 = vld [vmem:[%s10775_s3 + $0xa8] sm:$0xff] }
 0x8a1   : > { %v10145_v58 = vpop.eup %10144 }
 0x8a2   : > { %v6734_v59 = vpop.xlane.xlu1 %6733  ;;  %v6755_v61 = vmul.f32 %v10145_v58, %v10129_v9  ;;  %v10265_v9 = vld [vmem:[%s10775_s3 + $0x18] sm:$0xff] }
 0x8a3   : > { %10150 = vrcp.f32 %v6734_v59  ;;  %v10288_v59 = vld [vmem:[%s10775_s3 + $0xd8] sm:$0xff] }
 0x8a4   : > { %9844 = vmatmul.mubr.msk.f32.vlgmr.msra.gmra.mxu0 %vm3112_vm7, %v6755_v61 }
 0x8a5   : > { %9852 = vmatpush3.msra.mxu0 %v11662_v25  ;;  %9853 = vmatprep.mubr.msk.f32.mxu0 %vm10495_vm6, %v10494_v21 }
 0x8a6   : > { %v10147_v27 = vpop.eup %10146  ;;  %9861 = vmatprep.subr.mxu0 %v10494_v21 }
 0x8a7   : > { %v6737_v62 = vpop.xlane.xlu0 %6736  ;;  %v6756_v34 = vmul.f32 %v10147_v27, %v10131_v14  ;;  %v10270_v14 = vld [vmem:[%s10775_s3 + $0x30] sm:$0xff]  ;;  %v10289_v27 = vld [vmem:[%s10775_s3 + $0xa0] sm:$0xff] }
 0x8a8   : > { %10152 = vrcp.f32 %v6737_v62  ;;  %v11813_v62 = vld [vmem:[%s10796_s25 + $0x1] ss:$0 sm:$0xff] }
 0x8a9   : > { %9849 = vmatmul.mubr.msk.f32.vlgmr.msra.gmra.mxu1 %vm3112_vm7, %v6756_v34  ;;  %v10290_v34 = vld [vmem:[%s10775_s3 + $0xd0] sm:$0xff] }
 0x8aa   : > { %9857 = vmatpush3.msra.mxu1 %v11664_v29  ;;  %9858 = vmatprep.mubr.msk.f32.mxu1 %vm10495_vm6, %v10494_v21 }
 0x8ab   : > { %v10149_v63 = vpop.eup %10148  ;;  %9866 = vmatprep.subr.mxu1 %v10494_v21 }
 0x8ac   : > { %v6740_v25 = vpop.xlane.xlu1 %6739  ;;  %v6757_v0 = vmul.f32 %v10149_v63, %v10133_v19 }
 0x8ad   : > { %10154 = vrcp.f32 %v6740_v25  ;;  %v10291_v25 = vld [vmem:[%s10775_s3 + $0xc8] sm:$0xff] }
 0x8ae   : > { %9854 = vmatmul.mubr.msk.f32.vlgmr.msra.gmra.mxu0 %vm3112_vm7, %v6757_v0 }
 0x8af   : > { %9862 = vmatpush3.msra.mxu0 %v11666_v33  ;;  %9863 = vmatprep.mubr.msk.f32.mxu0 %vm10495_vm6, %v10494_v21 }
 0x8b0   : > { %v10151_v32 = vpop.eup %10150  ;;  %9871 = vmatprep.subr.mxu0 %v10494_v21 }
 0x8b1   : > { %v6743_v29 = vpop.xlane.xlu0 %6742  ;;  %v6758_v1 = vmul.f32 %v10151_v32, %v10135_v26 }
 0x8b2   : > { %10156 = vrcp.f32 %v6743_v29  ;;  %v10292_v29 = vld [vmem:[%s10775_s3 + $0xf8] sm:$0xff] }
 0x8b3   : > { %9859 = vmatmul.mubr.msk.f32.vlgmr.msra.gmra.mxu1 %vm3112_vm7, %v6758_v1  ;;  %v11826_v1 = vld [vmem:[%s10796_s25 + $0x2] ss:$0 sm:$0xff] }
 0x8b4   : > { %9867 = vmatpush3.msra.mxu1 %v11668_v37  ;;  %9868 = vmatprep.mubr.msk.f32.mxu1 %vm10495_vm6, %v10494_v21 }
 0x8b5   : > { %v10153_v2 = vpop.eup %10152  ;;  %v6746_v36 = vpop.xlane.xlu1 %6745  ;;  %9876 = vmatprep.subr.mxu1 %v10494_v21 }
 0x8b6   : > { %v7956_v38 = vpop.xlane.xlu0 %7955  ;;  %10158 = vrcp.f32 %v6746_v36  ;;  %v6759_v3 = vmul.f32 %v10153_v2, %v10137_v43  ;;  %v10293_v2 = vld [vmem:[%s10775_s3 + $0xc0] sm:$0xff]  ;;  %v10294_v36 = vld [vmem:[%s10775_s3 + $0xf0] sm:$0xff] }
 0x8b7   : > { %v7961_v33 = vmul.f32 0.03125, %v7956_v38 }
 0x8b8   : > { %9864 = vmatmul.mubr.msk.f32.vlgmr.msra.gmra.mxu0 %vm3112_vm7, %v6759_v3  ;;  %v10295_v3 = vld [vmem:[%s10775_s3 + $0xe8] sm:$0xff] }
 0x8b9   : > { %v11725_v4 = vsub.f32 %v7952_v52, %v7961_v33  ;;  %9872 = vmatpush3.msra.mxu0 %v11670_v39  ;;  %9873 = vmatprep.mubr.msk.f32.mxu0 %vm10495_vm6, %v10494_v21 }
 0x8ba   : > { %v10155_v37 = vpop.eup %10154  ;;  %9881 = vmatprep.subr.mxu0 %v10494_v21 }
 0x8bb   : > { %v7965_v28 = vmul.f32 %v11725_v4, %v11725_v4  ;;  %v6760_v5 = vmul.f32 %v10155_v37, %v11690_v46  ;;  %v10296_v37 = vld [vmem:[%s10775_s3 + $0xe0] sm:$0xff] }
 0x8bd   : > { %v7967_v6 = vsel %vm820_vm5, %v7965_v28, 0.0  ;;  %9869 = vmatmul.mubr.msk.f32.vlgmr.msra.gmra.mxu1 %vm3112_vm7, %v6760_v5 }
 0x8be   : > { %7968 = vadd.xlane.f32.xlu0 %v7967_v6  ;;  %9877 = vmatpush3.msra.mxu1 %v11672_v41 }
 0x8bf   : > { %9878 = vmatprep.mubr.msk.f32.mxu1 %vm10495_vm6, %v10494_v21  ;;  %v10157_v39 = vpop.eup %10156  ;;  %9892 = vmatprep.subr.mxu1 %v10494_v21 }
 0x8c0   : > { %v6761_v7 = vmul.f32 %v10157_v39, %v11696_v49  ;;  %v10282_v49 = vld [vmem:[%s10775_s3 + $0x90] sm:$0xff] }
 0x8c2   : > { %9874 = vmatmul.mubr.msk.f32.vlgmr.msra.gmra.mxu0 %vm3112_vm7, %v6761_v7 }
 0x8c3   : > { %v10159_v8 = vpop.eup %10158  ;;  %9882 = vmatpush3.msra.mxu0 %v10265_v9  ;;  %9889 = vmatprep.mubr.msk.f32.mxu0 %vm10495_vm6, %v10494_v21 }
 0x8c4   : > { %v6762_v41 = vmul.f32 %v10159_v8, %v11700_v53  ;;  %9883 = vmatprep.subr.mxu0 %v10494_v21  ;;  %v10284_v53 = vld [vmem:[%s10775_s3 + $0xb8] sm:$0xff] }
 0x8c5   : > { %9884 = vmatpush3.msra.mxu0 %v10266_v10 }
 0x8c6   : > { %9879 = vmatmul.mubr.msk.f32.vlgmr.msra.gmra.mxu1 %vm3112_vm7, %v6762_v41  ;;  %9885 = vmatprep.subr.mxu0 %v10494_v21 }
 0x8c7   : > { %9886 = vmatpush3.msra.mxu0 %v10267_v11  ;;  %9893 = vmatpush3.msra.mxu1 %v10268_v12 }
 0x8c8   : > { %9887 = vmatprep.subr.mxu0 %v10494_v21  ;;  %9894 = vmatprep.subr.mxu1 %v10494_v21 }
 0x8c9   : > { %9888 = vmatpush3.msra.mxu0 %v10269_v13  ;;  %9895 = vmatpush3.msra.mxu1 %v10270_v14 }
 0x8ca   : > { %9896 = vmatprep.subr.mxu1 %v10494_v21  ;;  %9903 = vmatprep.subr.mxu0 %v10494_v21 }
 0x8cb   : > { %9897 = vmatpush3.msra.mxu1 %v10271_v15  ;;  %9900 = vmatprep.mubr.msk.f32.mxu1 %vm10495_vm6, %v10494_v21 }
 0x8cc   : > { %9898 = vmatprep.subr.mxu1 %v10494_v21 }
 0x8cd   : > { %9899 = vmatpush3.msra.mxu1 %v10272_v16 }
 0x8ce   : > { %9914 = vmatprep.subr.mxu1 %v10494_v21 }
 0x947   : > { %v7969_v17 = vpop.xlane.xlu0 %7968 }
 0x948   : > { %v7973_v18 = vmul.f32 0.03125, %v7969_v17 }
 0x94a   : > { %v7975_v20 = vadd.f32 1e-05, %v7973_v18 }
 0x94c   : > { %10160 = vrsqrt.f32 %v7975_v20 }
 0x959   : > { %v10161_v55 = vpop.eup %10160 }
 0x95a   : > { %v7979_v61 = vmul.f32 %v10161_v55, %v11725_v4 }
 0x95c   : > { %v7985_v0 = vmul.f32 %v11813_v62, %v7979_v61  ;;  %v8098_v61 = vld [vmem:[%s10791_s28 + $0x70] sm:$0xff] }
 0x95e   : > { %v11835_v33 = vadd.f32 %v11826_v1, %v7985_v0  ;;  %v8093_v0 = vld [vmem:[%s10791_s28 + $0x48] sm:$0xff] }
 0x964   : > { %v6832_v19 = vpop.f32.mrf.mxu0 }
 0x965   : > { %9890 = vmatmul.mubr.msk.f32.vlgmr.msra.gmra.mxu0 %vm820_vm5, %v6832_v19 }
 0x966   : > { %v9845_v22 = vpop.f32.mrf.mxu0  ;;  %9904 = vmatpush3.msra.mxu0 %v10273_v23  ;;  %9911 = vmatprep.mubr.msk.f32.mxu0 %vm10495_vm6, %v10494_v21 }
 0x967   : > { %9905 = vmatprep.subr.mxu0 %v10494_v21 }
 0x968   : > { %9906 = vmatpush3.msra.mxu0 %v10274_v24 }
 0x969   : > { %v6905_v26 = vpop.f32.mrf.mxu1  ;;  %9907 = vmatprep.subr.mxu0 %v10494_v21 }
 0x96a   : > { %9901 = vmatmul.mubr.msk.f32.vlgmr.msra.gmra.mxu1 %vm820_vm5, %v6905_v26  ;;  %9908 = vmatpush3.msra.mxu0 %v10275_v31 }
 0x96b   : > { %v9850_v35 = vpop.f32.mrf.mxu1  ;;  %9915 = vmatpush3.msra.mxu1 %v10276_v60  ;;  %9909 = vmatprep.subr.mxu0 %v10494_v21 }
 0x96c   : > { %9916 = vmatprep.subr.mxu1 %v10494_v21  ;;  %9910 = vmatpush3.msra.mxu0 %v10277_v40 }
 0x96d   : > { %9917 = vmatpush3.msra.mxu1 %v10278_v42  ;;  %9925 = vmatprep.subr.mxu0 %v10494_v21 }
 0x96e   : > { %v6978_v43 = vpop.f32.mrf.mxu0  ;;  %9918 = vmatprep.subr.mxu1 %v10494_v21  ;;  %9922 = vmatprep.mubr.msk.f32.mxu1 %vm10495_vm6, %v10494_v21 }
 0x96f   : > { %9912 = vmatmul.mubr.msk.f32.vlgmr.msra.gmra.mxu0 %vm820_vm5, %v6978_v43  ;;  %9919 = vmatpush3.msra.mxu1 %v10279_v44 }
 0x970   : > { %v9855_v46 = vpop.f32.mrf.mxu0  ;;  %9926 = vmatpush3.msra.mxu0 %v10280_v47  ;;  %9920 = vmatprep.subr.mxu1 %v10494_v21 }
 0x971   : > { %9927 = vmatprep.subr.mxu0 %v10494_v21  ;;  %9921 = vmatpush3.msra.mxu1 %v10281_v48 }
 0x972   : > { %9928 = vmatpush3.msra.mxu0 %v10282_v49  ;;  %9936 = vmatprep.subr.mxu1 %v10494_v21  ;;  %v10297_v49 = vld [vmem:[#allocation2 + $0x8] sm:$0xff] }
 0x973   : > { %v7051_v50 = vpop.f32.mrf.mxu1  ;;  %9929 = vmatprep.subr.mxu0 %v10494_v21  ;;  %9933 = vmatprep.mubr.msk.f32.mxu0 %vm10495_vm6, %v10494_v21 }
 0x974   : > { %9923 = vmatmul.mubr.msk.f32.vlgmr.msra.gmra.mxu1 %vm820_vm5, %v7051_v50  ;;  %9930 = vmatpush3.msra.mxu0 %v10283_v51 }
 0x975   : > { %v9860_v52 = vpop.f32.mrf.mxu1  ;;  %9937 = vmatpush3.msra.mxu1 %v10284_v53  ;;  %9931 = vmatprep.subr.mxu0 %v10494_v21 }
 0x976   : > { %9938 = vmatprep.subr.mxu1 %v10494_v21  ;;  %9932 = vmatpush3.msra.mxu0 %v10285_v54 }
 0x977   : > { %9939 = vmatpush3.msra.mxu1 %v10286_v57  ;;  %9947 = vmatprep.subr.mxu0 %v10494_v21 }
 0x978   : > { %v7124_v56 = vpop.f32.mrf.mxu0  ;;  %9940 = vmatprep.subr.mxu1 %v10494_v21  ;;  %9944 = vmatprep.mubr.msk.f32.mxu1 %vm10495_vm6, %v10494_v21 }
 0x979   : > { %9934 = vmatmul.mubr.msk.f32.vlgmr.msra.gmra.mxu0 %vm820_vm5, %v7124_v56  ;;  %9941 = vmatpush3.msra.mxu1 %v10287_v30  ;;  %v7996_v56 = vld [vmem:[%s10786_s11 + $0x18] sm:$0xff]  ;;  %v7994_v30 = vld [vmem:[%s10786_s11 + $0x8] sm:$0xff] }
 0x97a   : > { %v9865_v58 = vpop.f32.mrf.mxu0  ;;  %9948 = vmatpush3.msra.mxu0 %v10288_v59  ;;  %9942 = vmatprep.subr.mxu1 %v10494_v21  ;;  %v8099_v59 = vld [vmem:[%s10791_s28 + $0x78] sm:$0xff] }
 0x97b   : > { %9949 = vmatprep.subr.mxu0 %v10494_v21  ;;  %9943 = vmatpush3.msra.mxu1 %v10289_v27  ;;  %v7993_v58 = vld [vmem:[%s10786_s11] sm:$0xff]  ;;  %v8097_v27 = vld [vmem:[%s10791_s28 + $0x68] sm:$0xff] }
 0x97c   : > { %9950 = vmatpush3.msra.mxu0 %v10290_v34  ;;  %9958 = vmatprep.subr.mxu1 %v10494_v21  ;;  %v8096_v34 = vld [vmem:[%s10791_s28 + $0x60] sm:$0xff] }
 0x97d   : > { %v7197_v63 = vpop.f32.mrf.mxu1  ;;  %9951 = vmatprep.subr.mxu0 %v10494_v21  ;;  %9955 = vmatprep.mubr.msk.f32.mxu0 %vm10495_vm6, %v10494_v21 }
 0x97e   : > { %9945 = vmatmul.mubr.msk.f32.vlgmr.msra.gmra.mxu1 %vm820_vm5, %v7197_v63  ;;  %9952 = vmatpush3.msra.mxu0 %v10291_v25  ;;  %v8095_v63 = vld [vmem:[%s10791_s28 + $0x58] sm:$0xff]  ;;  %v8094_v25 = vld [vmem:[%s10791_s28 + $0x50] sm:$0xff] }
 0x97f   : > { %v9870_v32 = vpop.f32.mrf.mxu1  ;;  %9959 = vmatpush3.msra.mxu1 %v10292_v29  ;;  %9953 = vmatprep.subr.mxu0 %v10494_v21  ;;  %v8091_v29 = vld [vmem:[%s10791_s28 + $0x38] sm:$0xff] }
 0x980   : > { %9960 = vmatprep.subr.mxu1 %v10494_v21  ;;  %9954 = vmatpush3.msra.mxu0 %v10293_v2  ;;  %v8092_v32 = vld [vmem:[%s10791_s28 + $0x40] sm:$0xff]  ;;  %v8090_v2 = vld [vmem:[%s10791_s28 + $0x30] sm:$0xff] }
 0x981   : > { %9961 = vmatpush3.msra.mxu1 %v10294_v36  ;;  %9966 = vmatprep.mubr.msk.f32.mxu1 %vm10495_vm6, %v10494_v21  ;;  %v8089_v36 = vld [vmem:[%s10791_s28 + $0x28] sm:$0xff] }
 0x982   : > { %v7270_v38 = vpop.f32.mrf.mxu0  ;;  %9962 = vmatprep.subr.mxu1 %v10494_v21  ;;  %9969 = vmatprep.subr.mxu0 %v7996_v56 }
 0x983   : > { %9956 = vmatmul.mubr.msk.f32.vlgmr.msra.gmra.mxu0 %vm820_vm5, %v7270_v38  ;;  %9963 = vmatpush3.msra.mxu1 %v10295_v3  ;;  %v8088_v38 = vld [vmem:[%s10791_s28 + $0x20] sm:$0xff] }
 0x984   : > { %v9875_v4 = vpop.f32.mrf.mxu0  ;;  %9977 = vmatprep.mubr.msk.f32.mxu0 %vm820_vm5, %v11835_v33  ;;  %9964 = vmatprep.subr.mxu1 %v10494_v21 }
 0x985   : > { %9965 = vmatpush3.msra.mxu1 %v10296_v37  ;;  %9970 = vmatpush3.msra.mxu0 %v7996_v56 }
 0x986   : > { %v7343_v28 = vpop.f32.mrf.mxu1  ;;  %9980 = vmatprep.subr.mxu1 %v8099_v59 }
 0x987   : > { %9967 = vmatmul.mubr.msk.f32.vlgmr.msra.gmra.mxu1 %vm820_vm5, %v7343_v28 }
 0x988   : > { %v9880_v5 = vpop.f32.mrf.mxu1  ;;  %9981 = vmatpush3.msra.mxu1 %v8099_v59 }
 0x989   : > { %9982 = vmatprep.subr.mxu1 %v8098_v61 }
 0x98a   : > { %9983 = vmatpush3.msra.mxu1 %v8098_v61 }
 0x98b   : > { %9984 = vmatprep.subr.mxu1 %v8097_v27 }
 0x98c   : > { %9985 = vmatpush3.msra.mxu1 %v8097_v27 }
 0x98d   : > { %9986 = vmatprep.subr.mxu1 %v8096_v34 }
 0x98e   : > { %9987 = vmatpush3.msra.mxu1 %v8096_v34 }
 0x98f   : > { %9988 = vmatprep.subr.mxu1 %v8095_v63 }
 0x990   : > { %9989 = vmatpush3.msra.mxu1 %v8095_v63 }
 0x991   : > { %9990 = vmatprep.subr.mxu1 %v8094_v25 }
 0x992   : > { %9991 = vmatpush3.msra.mxu1 %v8094_v25 }
 0x993   : > { %9992 = vmatprep.subr.mxu1 %v8093_v0 }
 0x994   : > { %9993 = vmatpush3.msra.mxu1 %v8093_v0 }
 0x995   : > { %9994 = vmatprep.subr.mxu1 %v8092_v32 }
 0x996   : > { %9995 = vmatpush3.msra.mxu1 %v8092_v32 }
 0x997   : > { %9996 = vmatprep.subr.mxu1 %v8091_v29 }
 0x998   : > { %9997 = vmatpush3.msra.mxu1 %v8091_v29 }
 0x999   : > { %9998 = vmatprep.subr.mxu1 %v8090_v2 }
 0x99a   : > { %9999 = vmatpush3.msra.mxu1 %v8090_v2 }
 0x99b   : > { %10000 = vmatprep.subr.mxu1 %v8089_v36 }
 0x99c   : > { %10001 = vmatpush3.msra.mxu1 %v8089_v36 }
 0x99d   : > { %10002 = vmatprep.subr.mxu1 %v8088_v38 }
 0x99e   : > { %10003 = vmatpush3.msra.mxu1 %v8088_v38 }
 0xa25   : > { %v7416_v6 = vpop.f32.mrf.mxu0 }
 0xa26   : > { %v7931_v21 = vsel %vm820_vm5, %v7416_v6, 0.0 }
 0xa27   : > { %v9891_v39 = vpop.f32.mrf.mxu0 }
 0xa2a   : > { %v7489_v7 = vpop.f32.mrf.mxu1 }
 0xa2b   : > { %v7932_v13 = vsel %vm820_vm5, %v7489_v7, 0.0  ;;  %v8087_v7 = vld [vmem:[%s10791_s28 + $0x18] sm:$0xff] }
 0xa2c   : > { %v9902_v8 = vpop.f32.mrf.mxu1  ;;  %v7933_v16 = vadd.f32 %v7932_v13, %v7931_v21  ;;  %10004 = vmatprep.subr.mxu1 %v8087_v7  ;;  %v8650_v21 = vld [vmem:[%s10796_s25 + $0x4] ss:$0 sm:$0xff] }
 0xa2d   : > { %10005 = vmatpush3.msra.mxu1 %v8087_v7  ;;  %v8086_v8 = vld [vmem:[%s10791_s28 + $0x10] sm:$0xff] }
 0xa2e   : > { %10006 = vmatprep.subr.mxu1 %v8086_v8 }
 0xa2f   : > { %v7562_v9 = vpop.f32.mrf.mxu0  ;;  %10007 = vmatpush3.msra.mxu1 %v8086_v8 }
 0xa30   : > { %v7934_v15 = vsel %vm820_vm5, %v7562_v9, 0.0  ;;  %v8085_v9 = vld [vmem:[%s10791_s28 + $0x8] sm:$0xff] }
 0xa31   : > { %v9913_v41 = vpop.f32.mrf.mxu0  ;;  %v7935_v19 = vadd.f32 %v7934_v15, %v7933_v16  ;;  %10008 = vmatprep.subr.mxu1 %v8085_v9 }
 0xa32   : > { %10009 = vmatpush3.msra.mxu1 %v8085_v9  ;;  %v8084_v41 = vld [vmem:[%s10791_s28] sm:$0xff] }
 0xa33   : > { %10010 = vmatprep.subr.mxu1 %v8084_v41 }
 0xa34   : > { %v7635_v10 = vpop.f32.mrf.mxu1  ;;  %10011 = vmatpush3.msra.mxu1 %v8084_v41 }
 0xa35   : > { %v7936_v17 = vsel %vm820_vm5, %v7635_v10, 0.0  ;;  %v8647_v10 = vld [vmem:[%s10796_s25 + $0x3] ss:$0 sm:$0xff] }
 0xa36   : > { %v9924_v11 = vpop.f32.mrf.mxu1  ;;  %v7937_v23 = vadd.f32 %v7936_v17, %v7935_v19 }
 0xa39   : > { %v7708_v12 = vpop.f32.mrf.mxu0 }
 0xa3a   : > { %v7938_v20 = vsel %vm820_vm5, %v7708_v12, 0.0 }
 0xa3b   : > { %v9935_v14 = vpop.f32.mrf.mxu0  ;;  %v7939_v26 = vadd.f32 %v7938_v20, %v7937_v23 }
 0xa3e   : > { %v7781_v18 = vpop.f32.mrf.mxu1 }
 0xa3f   : > { %v7940_v24 = vsel %vm820_vm5, %v7781_v18, 0.0 }
 0xa40   : > { %v9946_v22 = vpop.f32.mrf.mxu1  ;;  %v7941_v60 = vadd.f32 %v7940_v24, %v7939_v26 }
 0xa43   : > { %v7854_v31 = vpop.f32.mrf.mxu0 }
 0xa44   : > { %v7942_v35 = vsel %vm820_vm5, %v7854_v31, 0.0 }
 0xa45   : > { %v9957_v40 = vpop.f32.mrf.mxu0  ;;  %v7943_v42 = vadd.f32 %v7942_v35, %v7941_v60 }
 0xa47   : > { %v7927_v43 = vpop.f32.mrf.mxu1 }
 0xa48   : > { %v7944_v44 = vsel %vm820_vm5, %v7927_v43, 0.0 }
 0xa49   : > { %v7945_v46 = vadd.f32 %v7944_v44, %v7943_v42  ;;  %v9968_v47 = vpop.f32.mrf.mxu1 }
 0xa4b   : > { %v7951_v48 = vadd.f32 %v11688_v45, %v7945_v46  ;;  %v7995_v45 = vld [vmem:[%s10786_s11 + $0x10] sm:$0xff] }
 0xa4c   : > { %9971 = vmatprep.subr.mxu0 %v7995_v45 }
 0xa4d   : > { %v7953_v50 = vadd.f32 %v10297_v49, %v7951_v48  ;;  %9972 = vmatpush3.msra.mxu0 %v7995_v45 }
 0xa4e   : > { %9973 = vmatprep.subr.mxu0 %v7994_v30 }
 0xa4f   : > { %v7957_v51 = vsel %vm820_vm5, %v7953_v50, 0.0  ;;  %9974 = vmatpush3.msra.mxu0 %v7994_v30 }
 0xa50   : > { %7958 = vadd.xlane.f32.xlu1 %v7957_v51  ;;  %9975 = vmatprep.subr.mxu0 %v7993_v58 }
 0xa51   : > { %9976 = vmatpush3.msra.mxu0 %v7993_v58 }
 0xad9   : > { %v7959_v52 = vpop.xlane.xlu1 %7958 }
 0xada   : > { %v7962_v53 = vmul.f32 0.03125, %v7959_v52 }
 0xadc   : > { %v7964_v54 = vsub.f32 %v7953_v50, %v7962_v53  ;;  %v8651_v53 = vld [vmem:[%s10796_s25 + $0x5] ss:$0 sm:$0xff] }
 0xade   : > { %v7966_v55 = vmul.f32 %v7964_v54, %v7964_v54 }
 0xae0   : > { %v7970_v57 = vsel %vm820_vm5, %v7966_v55, 0.0 }
 0xae1   : > { %7971 = vadd.xlane.f32.xlu1 %v7970_v57  ;;  %v8652_v57 = vld [vmem:[%s10796_s25 + $0x6] ss:$0 sm:$0xff] }
 0xb6a   : > { %v7972_v3 = vpop.xlane.xlu1 %7971 }
 0xb6b   : > { %v7974_v4 = vmul.f32 0.03125, %v7972_v3 }
 0xb6d   : > { %v7976_v37 = vadd.f32 1e-05, %v7974_v4 }
 0xb6f   : > { %10162 = vrsqrt.f32 %v7976_v37 }
 0xb7c   : > { %v10163_v28 = vpop.eup %10162 }
 0xb7d   : > { %v7980_v5 = vmul.f32 %v10163_v28, %v7964_v54 }
 0xb7f   : > { %v7986_v6 = vmul.f32 %v11813_v62, %v7980_v5 }
 0xb81   : > { %v7992_v39 = vadd.f32 %v11826_v1, %v7986_v6 }
 0xb83   : > { %9978 = vmatmul.mubr.msk.f32.vlgmr.msra.gmra.mxu0 %vm820_vm5, %v7992_v39 }
 0xc43   : > { %v9979_v11 = vpop.f32.mrf.mxu0 }
 0xc44   : > { %v8079_v62 = vadd.f32 %v9979_v11, %v8647_v10 }
 0xc45   : > { %v8073_v12 = vpop.f32.mrf.mxu0 }
 0xc46   : > { %v8074_v1 = vadd.f32 %v8647_v10, %v8073_v12  ;;  %v8083_v14 = vmax.f32 %v8079_v62, 0.0 }
 0xc48   : > { %v8082_v13 = vmax.f32 %v8074_v1, 0.0 }
 0xc4a   : > { %10012 = vmatprep.mubr.f32.mxu1 %v8082_v13 }
 0xc4b   : > { %10013 = vmatmul.mubr.f32.vlgmr.msra.gmra.mxu1 %v8083_v14 }
 0xd0b   : > { %v10014_v15 = vpop.f32.mrf.mxu1 }
 0xd0c   : > { %v8176_v16 = vadd.f32 %v10014_v15, %v8650_v21 }
 0xd0d   : > { %v8170_v17 = vpop.f32.mrf.mxu1 }
 0xd0e   : > { %v8171_v18 = vadd.f32 %v8650_v21, %v8170_v17  ;;  %v8180_v19 = vadd.f32 %v8176_v16, %v7992_v39 }
 0xd10   : > { %v8184_v20 = vsel %vm820_vm5, %v8180_v19, 0.0  ;;  %v8179_v22 = vadd.f32 %v8171_v18, %v11835_v33 }
 0xd11   : > { %8185 = vadd.xlane.f32.xlu1 %v8184_v20 }
 0xd12   : > { %v8181_v23 = vsel %vm820_vm5, %v8179_v22, 0.0 }
 0xd13   : > { %8182 = vadd.xlane.f32.xlu0 %v8181_v23 }
 0xd9a   : > { %v8186_v24 = vpop.xlane.xlu1 %8185 }
 0xd9b   : > { %v8188_v26 = vmul.f32 0.03125, %v8186_v24 }
 0xd9c   : > { %v8183_v31 = vpop.xlane.xlu0 %8182 }
 0xd9d   : > { %v8190_v35 = vsub.f32 %v8180_v19, %v8188_v26  ;;  %v8187_v60 = vmul.f32 0.03125, %v8183_v31 }
 0xd9f   : > { %v8189_v40 = vsub.f32 %v8179_v22, %v8187_v60  ;;  %v8192_v42 = vmul.f32 %v8190_v35, %v8190_v35 }
 0xda1   : > { %v8196_v43 = vsel %vm820_vm5, %v8192_v42, 0.0  ;;  %v8191_v44 = vmul.f32 %v8189_v40, %v8189_v40 }
 0xda2   : > { %8197 = vadd.xlane.f32.xlu1 %v8196_v43 }
 0xda3   : > { %v8193_v46 = vsel %vm820_vm5, %v8191_v44, 0.0 }
 0xda4   : > { %8194 = vadd.xlane.f32.xlu0 %v8193_v46 }
 0xe2b   : > { %v8198_v33 = vpop.xlane.xlu1 %8197 }
 0xe2c   : > { %v8200_v47 = vmul.f32 0.03125, %v8198_v33 }
 0xe2d   : > { %v8195_v48 = vpop.xlane.xlu0 %8194 }
 0xe2e   : > { %v8202_v49 = vadd.f32 1e-05, %v8200_v47  ;;  %v8199_v50 = vmul.f32 0.03125, %v8195_v48 }
 0xe30   : > { %10164 = vrsqrt.f32 %v8202_v49  ;;  %v8201_v51 = vadd.f32 1e-05, %v8199_v50 }
 0xe32   : > { %10166 = vrsqrt.f32 %v8201_v51 }
 0xe3d   : > { %v10165_v52 = vpop.eup %10164 }
 0xe3e   : > { %v8206_v54 = vmul.f32 %v10165_v52, %v8190_v35 }
 0xe3f   : > { %v10167_v55 = vpop.eup %10166 }
 0xe40   : > { %v8212_v56 = vmul.f32 %v8651_v53, %v8206_v54  ;;  %v8205_v45 = vmul.f32 %v10167_v55, %v8189_v40 }
 0xe42   : > { %v8218_v30 = vadd.f32 %v8652_v57, %v8212_v56  ;;  %v8211_v58 = vmul.f32 %v8651_v53, %v8205_v45  ;;  %8224 = sbr.rel (%p8653_p11) target bundleno = 4181 (0x1055), region = 88 }
 0xe44   : > { %8220 = vst.msk [vmem:[#allocation2 + $0x8] sm:$0xff] %vm820_vm5, %v8218_v30  ;;  %v8217_v59 = vadd.f32 %v8652_v57, %v8211_v58 }
 0xe46   : > { %8219 = vst.msk [vmem:[#allocation2] sm:$0xff] %vm820_vm5, %v8217_v59 }
 0xe47   : > { %v8247_v61 = vld [vmem:[%s11977_s22 + $0x18] sm:$0xff]  ;;  %v8225_v27 = vsel %vm820_vm5, %v8217_v59, 0.0  ;;  %v10496_v34 = vmov 0.0   ;;  %v8246_v63 = vld [vmem:[%s11977_s22 + $0x10] sm:$0xff]  ;;  %vm10497_vm8 = vmmov 0   ;;  %v8234_v0 = vsel %vm820_vm5, %v8218_v30, 0.0 }
 0xe48   : > { %10015 = vmatprep.subr.mxu0 %v10496_v34  ;;  %10023 = vmatprep.mubr.msk.f32.mxu0 %vm10497_vm8, %v10496_v34  ;;  %v8226_v25 = vrot.slane %v8225_v27, 4  ;;  %v8235_v32 = vrot.slane %v8234_v0, 4  ;;  %v8245_v29 = vld [vmem:[%s11977_s22 + $0x8] sm:$0xff]  ;;  %v8244_v38 = vld [vmem:[%s11977_s22] sm:$0xff]  ;;  %vm8242_vm9 = vcmask 1040384   ;;  %vm8328_vm10 = vcmask 41984  }
 0xe49   : > { %10016 = vmatpush3.msra.mxu0 %v8247_v61  ;;  %v8654_v10 = vld [vmem:[%s11978_s14] ss:$0 sm:$0xff] }
 0xe4a   : > { %10017 = vmatprep.subr.mxu0 %v10496_v34  ;;  %v8227_v2 = vadd.f32 %v8226_v25, %v8225_v27  ;;  %v8236_v36 = vadd.f32 %v8235_v32, %v8234_v0 }
 0xe4b   : > { %10018 = vmatpush3.msra.mxu0 %v8246_v63 }
 0xe4c   : > { %10019 = vmatprep.subr.mxu0 %v10496_v34  ;;  %v8228_v3 = vrot.slane %v8227_v2, 2  ;;  %v8237_v4 = vrot.slane %v8236_v36, 2 }
 0xe4d   : > { %10020 = vmatpush3.msra.mxu0 %v8245_v29 }
 0xe4e   : > { %10021 = vmatprep.subr.mxu0 %v10496_v34  ;;  %v8229_v37 = vadd.f32 %v8228_v3, %v8227_v2  ;;  %v8238_v28 = vadd.f32 %v8237_v4, %v8236_v36 }
 0xe4f   : > { %10022 = vmatpush3.msra.mxu0 %v8244_v38 }
 0xe50   : > { %v8230_v5 = vrot.slane %v8229_v37, 1  ;;  %v8239_v6 = vrot.slane %v8238_v28, 1 }
 0xe52   : > { %v8231_v39 = vadd.f32 %v8230_v5, %v8229_v37  ;;  %v8240_v7 = vadd.f32 %v8239_v6, %v8238_v28 }
 0xe54   : > { %v8233_v8 = vmul.f32 0.125, %v8231_v39  ;;  %v8241_v9 = vmul.f32 0.125, %v8240_v7 }
 0xe56   : > { %v8243_v41 = vsel %vm8242_vm9, %v8233_v8, %v8241_v9 }
 0xe57   : > { %10024 = vmatmul.mubr.msk.f32.vlgmr.msra.gmra.mxu0 %vm820_vm5, %v8243_v41 }
 0xf17   : > { %v8324_v11 = vpop.f32.mrf.mxu0 }
 0xf18   : > { %v8325_v62 = vadd.f32 %v8654_v10, %v8324_v11 }
 0xf19   : > { %v10025_v12 = vpop.f32.mrf.mxu0 }
 0xf1a   : > { %v8329_v1 = vsel %vm8328_vm10, %v8325_v62, -inf }
 0xf1b   : > { %8330 = vmax.xlane.f32.xlu0 %v8329_v1 }
 0xfa4   : > { %v8331_v13 = vpop.xlane.xlu0 %8330 }
 0xfa5   : > { %v8332_v14 = vsub.f32 %v8325_v62, %v8331_v13 }
 0xfa7   : > { %v8333_v21 = vmul.f32 1.442695, %v8332_v14 }
 0xfa9   : > { %10298 = vpow2.f32 %v8333_v21 }
 0xfb6   : > { %v10299_v15 = vpop.eup %10298 }
 0xfb7   : > { %v8335_v16 = vsel %vm8328_vm10, %v10299_v15, 0.0 }
 0xfb8   : > { %8336 = vadd.xlane.f32.xlu0 %v8335_v16 }
0x1041   : > { %v8337_v17 = vpop.xlane.xlu0 %8336 }
0x1042   : > { %10300 = vlog2.f32 %v8337_v17 }
0x104f   : > { %v10301_v18 = vpop.eup %10300 }
0x1050   : > { %v8339_v19 = vmul.f32 0.6931472, %v10301_v18 }
0x1052   : > { %v8340_v20 = vsub.f32 %v8332_v14, %v8339_v19 }
0x1054   : > { %8341 = vst.msk [vmem:[#allocation11] sm:$0x3] %vm8328_vm10, %v8340_v20 }
0x1055 PF: > { %p10052_p13 = scmp.eq.s32.totalorder %s10578_s21, 5  ;;  %s10498_s23 = smov [#allocation11]  }
0x1056   : > { %s8349_s20 = sshll.u32 %s10498_s23, 4  ;;  %s8350_s20 = int_to_ptr.vmem [resolvable:$true] %s8349_s20 }
0x1057   : > { %s10414_s29 = scalar_lea.vmem %s8350_s20, 32  ;;  %p10421_p1 = scmp.lt.s32.totalorder %s8350_s20, %s8350_s20 }
0x1058   : > { %p10415_p9 = scmp.ne.s32.totalorder %s8350_s20, %s10414_s29  ;;  %p10422_p2 = scmp.lt.s32.totalorder %s10414_s29, %s10414_s29 }
0x105a   : > { %p10416_p7 = pnand %p10415_p9, %p10052_p13  ;;  %p10423_p10 = por %p10422_p2, %p10421_p1 }
0x105c   : > { %p10417_p0 = pneg %p10416_p7 }
0x105e   : > { %p10424_p3 = pnand %p10423_p10, %p10417_p0 }
0x1060   : > { %10427 = shalt.err (!%p10424_p3)
}
0x1061   : > { %s11979_s19 = sld [smem:[#allocation23_spill]] }
0x1067   : > { %10035 = dma.vmem_to_hbm [thread:$0]  (%p10052_p13), %s8350_s20, 32, %s11979_s19, [#allocation5]  }
0x1068   : > { %10467 = dma.done.wait (%p10052_p13), [#allocation5], 32  }
0x1069   : > { %10469 = vsyncadd (%p10052_p13), [#allocation5], 4294967264 }
0x106a PF: > { %s11980_s20 = sld [smem:[#allocation17_spill]]  ;;  %s11983_s17 = smov %s10476_s18 }
0x106b   : > { %s11981_s26 = sld [smem:[#allocation16_spill]] }
0x106c   : > { %s11982_s19 = sld [smem:[#allocation18_spill]] }
0x1070   : > { %p28_p4 = scmp.ge.s32.totalorder %s11980_s20, 8  }
0x1071   : > { %s11984_s18 = smov %s11981_s26 }
0x1072   :  { %30 = sbr.rel (!%p28_p4) target bundleno = 14 (0xe), region = 155 }
0x1077   :  { %8362 = vsyncpa [#allocation4], 1 }
0x1078   :  { %8364 = vsyncpa [#allocation4 + $0x1], 1 }
0x1079   :  { %8365 = vsyncpa [#allocation7], 1 }
0x107a   :  { %8367 = vsyncpa [#allocation7 + $0x1], 1 }
0x107b   :  { %8368 = vsyncpa [#allocation10], 1 }
0x107c   :  { %8370 = vsyncpa [#allocation10 + $0x1], 1 }
0x107d   :  { %8371 = vsyncpa [#allocation5], 1 }
0x107e   :  { %8373 = vsyncpa [#allocation5 + $0x1], 1 }

</bundles_post_ra>
